<compile_context>
chip_gen: v6e
topology: v6e:2x2x1
jax: 0.10.0
libtpu: 0.0.40
codegen_flags: <defaults>
</compile_context>

<pallas_src>
import functools

import jax
import jax.numpy as jnp
from jax.experimental import pallas as pl
from jax.experimental.pallas import tpu as pltpu


# ------------------------------ layout helpers -------------------------------

def _round_up(x, m):
    return ((x + m - 1) // m) * m


def _pad_to_layout(x_nchw, P):
    """(N, C, H, W) -> (N, C, P): 1-pixel zero ring, row-major flatten, zero tail."""
    N, C, H, W = x_nchw.shape
    Hp, Wp = H + 2, W + 2
    xp = jnp.pad(x_nchw, ((0, 0), (0, 0), (1, 1), (1, 1)))
    xp = xp.reshape(N, C, Hp * Wp)
    if P > Hp * Wp:
        xp = jnp.pad(xp, ((0, 0), (0, 0), (0, P - Hp * Wp)))
    return xp


def _unpad_from_layout(y, H, W):
    """(N, C, P) -> (N, C, H, W): drop the zero tail and the pad ring."""
    N, C, _ = y.shape
    Hp, Wp = H + 2, W + 2
    y = y[:, :, : Hp * Wp].reshape(N, C, Hp, Wp)
    return y[:, :, 1:H + 1, 1:W + 1]


def _interior_mask(H, W, P):
    """(1, P) f32 mask: 1 on the H x W interior, 0 on the pad ring / tail."""
    Hp, Wp = H + 2, W + 2
    m = jnp.zeros((Hp, Wp), jnp.float32).at[1:H + 1, 1:W + 1].set(1.0)
    m = m.reshape(1, Hp * Wp)
    if P > Hp * Wp:
        m = jnp.pad(m, ((0, 0), (0, P - Hp * Wp)))
    return m


def _prep_w(w):
    """HWIO (3, 3, Cin, Cout) -> (Cout, 9*Cin), tap-major over (ky, kx).

    NOTE: real PyTorch Conv2d checkpoints are OIHW (Cout, Cin, 3, 3); transpose
    with (2, 3, 1, 0) to HWIO before calling this.
    """
    kh, kw, cin, cout = w.shape
    return jnp.transpose(w, (3, 0, 1, 2)).reshape(cout, kh * kw * cin).astype(jnp.float32)


def _prep_b(b):
    return b.reshape(-1, 1).astype(jnp.float32)


# ------------------------------ in-kernel conv --------------------------------

def _conv3x3(x, w, b, Wp, *, ring=None, relu=False):
    """3x3 'same' conv on a zero-padded, lane-flattened frame.

    x   : (Cin, P) f32, zero on the pad ring and tail
    w   : (Cout, 9*Cin) tap-major stacked weights
    b   : (Cout, 1) bias
    ring: optional (1, P) 0/1 mask; re-zeroes the pad ring / tail of the
          output (required whenever the result feeds another conv)

    The 9 taps are lane rotations of the whole slab; only interior outputs are
    meaningful (ring outputs pick up wrap-around garbage and are masked).
    One K = 9*Cin matmul replaces the nine K = Cin matmuls of the old version.
    """
    P = x.shape[-1]
    taps = []
    for dy in (-1, 0, 1):
        for dx in (-1, 0, 1):
            s = dy * Wp + dx
            taps.append(x if s == 0 else pltpu.roll(x, shift=(-s) % P, axis=1))
    xk = jnp.concatenate(taps, axis=0)                       # (9*Cin, P)
    y = jnp.dot(w, xk, preferred_element_type=jnp.float32) + b
    if relu:
        y = jnp.maximum(y, 0.0)
    if ring is not None:
        y = y * ring
    return y


# ------------------------------- Pallas kernels -------------------------------

def _trunk_kernel(x_ref, ring_ref, ws_ref, bs_ref, wb_ref, bb_ref,
                  wt_ref, bt_ref, wu_ref, bu_ref, o_ref, *,
                  Wp, n_resblocks, res_scale):
    """start conv -> n ResBlocks -> tail conv -> + res_scale*xs -> up conv."""
    ring = ring_ref[...]
    x = x_ref[0]
    xs = _conv3x3(x, ws_ref[...], bs_ref[...], Wp, ring=ring)           # self.start
    h = xs
    for i in range(n_resblocks):                                         # ResBlocks
        t = _conv3x3(h, wb_ref[2 * i], bb_ref[2 * i], Wp, ring=ring, relu=True)
        u = _conv3x3(t, wb_ref[2 * i + 1], bb_ref[2 * i + 1], Wp, ring=ring)
        h = res_scale * u + h
    # trailing conv of self.resblocks, fused with the global skip (+0.15*xs)
    h = _conv3x3(h, wt_ref[...], bt_ref[...], Wp, ring=ring) + res_scale * xs
    # upsampler conv (n_feat -> 4*n_feat); ring garbage is sliced away on host
    o_ref[0] = _conv3x3(h, wu_ref[...], bu_ref[...], Wp, ring=None).astype(o_ref.dtype)


def _end_kernel(z_ref, w_ref, b_ref, o_ref, *, Wp):
    o_ref[0] = _conv3x3(z_ref[0], w_ref[...], b_ref[...], Wp, ring=None).astype(o_ref.dtype)


# ------------------------------- host wrappers --------------------------------

def _compiler_params(vmem_hint_bytes):
    # Explicit scoped-VMEM sizing (review item); clamp so the same value is
    # legal on v5e/v6e (128 MiB physical) and v7x (64 MiB physical).
    limit = int(min(64 * 2**20, max(32 * 2**20, vmem_hint_bytes)))
    return pltpu.CompilerParams(dimension_semantics=("parallel",),
                                vmem_limit_bytes=limit)


def _full_spec(shape):
    nd = len(shape)
    return pl.BlockSpec(shape, lambda n, _nd=nd: (0,) * _nd)


def _trunk_call(x_pad, ring, w_s, b_s, w_b, b_b, w_t, b_t, w_u, b_u, *,
                Wp, n_resblocks, res_scale):
    N, Cin, P = x_pad.shape
    n_feat = w_t.shape[0]
    Cup = w_u.shape[0]

    kernel = functools.partial(_trunk_kernel, Wp=Wp, n_resblocks=n_resblocks,
                               res_scale=res_scale)

    weights = (w_s, b_s, w_b, b_b, w_t, b_t, w_u, b_u)
    w_bytes = sum(int(a.size) * 4 for a in weights)
    # per-grid-step live VMEM: double-buffered in/out blocks + the 9-tap
    # stacked operand and a few (n_feat, P) temporaries + weights
    hint = 4 * (2 * (Cin + Cup) * P + (9 + 4) * n_feat * P) + 2 * w_bytes

    flops = 2 * N * P * (n_feat * 9 * Cin
                         + (2 * n_resblocks + 1) * n_feat * 9 * n_feat
                         + Cup * 9 * n_feat)
    bytes_accessed = 4 * N * (Cin + Cup) * P + w_bytes

    return pl.pallas_call(
        kernel,
        out_shape=jax.ShapeDtypeStruct((N, Cup, P), jnp.float32),
        grid=(N,),
        in_specs=[
            pl.BlockSpec((1, Cin, P), lambda n: (n, 0, 0)),
            _full_spec(ring.shape),
            _full_spec(w_s.shape), _full_spec(b_s.shape),
            _full_spec(w_b.shape), _full_spec(b_b.shape),
            _full_spec(w_t.shape), _full_spec(b_t.shape),
            _full_spec(w_u.shape), _full_spec(b_u.shape),
        ],
        out_specs=pl.BlockSpec((1, Cup, P), lambda n: (n, 0, 0)),
        compiler_params=_compiler_params(hint),
        cost_estimate=pl.CostEstimate(flops=flops, transcendentals=0,
                                      bytes_accessed=bytes_accessed),
    )(x_pad, ring, w_s, b_s, w_b, b_b, w_t, b_t, w_u, b_u)


def _end_call(z_pad, w_e, b_e, *, Wp):
    N, Cin, P = z_pad.shape
    Cout = w_e.shape[0]
    kernel = functools.partial(_end_kernel, Wp=Wp)
    w_bytes = (int(w_e.size) + int(b_e.size)) * 4
    hint = 4 * (2 * (Cin + Cout) * P + 9 * Cin * P) + 2 * w_bytes
    flops = 2 * N * P * Cout * 9 * Cin
    bytes_accessed = 4 * N * (Cin + Cout) * P + w_bytes
    return pl.pallas_call(
        kernel,
        out_shape=jax.ShapeDtypeStruct((N, Cout, P), jnp.float32),
        grid=(N,),
        in_specs=[pl.BlockSpec((1, Cin, P), lambda n: (n, 0, 0)),
                  _full_spec(w_e.shape), _full_spec(b_e.shape)],
        out_specs=pl.BlockSpec((1, Cout, P), lambda n: (n, 0, 0)),
        compiler_params=_compiler_params(hint),
        cost_estimate=pl.CostEstimate(flops=flops, transcendentals=0,
                                      bytes_accessed=bytes_accessed),
    )(z_pad, w_e, b_e)


def _pixel_shuffle_nchw(x, r):
    """nn.PixelShuffle(r): (N, C*r*r, H, W) -> (N, C, H*r, W*r).  Layout glue."""
    N, Crr, H, W = x.shape
    c = Crr // (r * r)
    x = x.reshape(N, c, r, r, H, W).transpose(0, 1, 4, 2, 5, 3)
    return x.reshape(N, c, H * r, W * r)


# ----------------------------------- forward ----------------------------------

def resnet_forward(x_nchw, params, res_scale=0.15):
    N, C, H, W = x_nchw.shape
    blocks = params["resblocks"]
    n_resblocks = len(blocks)
    n_feat = params["start"][0].shape[-1]
    Wp = W + 2
    P = _round_up((H + 2) * Wp, 128)

    x_pad = _pad_to_layout(x_nchw.astype(jnp.float32), P)
    ring = _interior_mask(H, W, P)

    w_s, b_s = _prep_w(params["start"][0]), _prep_b(params["start"][1])
    if blocks:
        w_b = jnp.stack([_prep_w(w) for (w1, _, w2, _) in blocks for w in (w1, w2)])
        b_b = jnp.stack([_prep_b(b) for (_, b1, _, b2) in blocks for b in (b1, b2)])
    else:  # degenerate config: keep the kernel signature stable
        w_b = jnp.zeros((1, n_feat, 9 * n_feat), jnp.float32)
        b_b = jnp.zeros((1, n_feat, 1), jnp.float32)
    w_t, b_t = _prep_w(params["tail"][0]), _prep_b(params["tail"][1])
    w_u, b_u = _prep_w(params["up"][0]), _prep_b(params["up"][1])
    w_e, b_e = _prep_w(params["end"][0]), _prep_b(params["end"][1])

    # Fused trunk: start conv -> ResBlocks -> tail conv + 0.15*xs -> up conv.
    u_pad = _trunk_call(x_pad, ring, w_s, b_s, w_b, b_b, w_t, b_t, w_u, b_u,
                        Wp=Wp, n_resblocks=n_resblocks, res_scale=res_scale)

    # PixelShuffle(2) as layout glue, then re-pad for the end conv.
    u = _unpad_from_layout(u_pad, H, W)            # (N, 4*n_feat, H, W)
    u = _pixel_shuffle_nchw(u, 2)                  # (N, n_feat, 2H, 2W)
    H2, W2 = 2 * H, 2 * W
    P2 = _round_up((H2 + 2) * (W2 + 2), 128)
    z_pad = _pad_to_layout(u, P2)

    y_pad = _end_call(z_pad, w_e, b_e, Wp=W2 + 2)  # self.end
    return _unpad_from_layout(y_pad, H2, W2)       # (N, channels, 2H, 2W) f32


# --------------------------------- parameters ---------------------------------

def init_params(key, channels, n_features, n_resblocks):
    """He-style random init; weights kept in HWIO (3, 3, Cin, Cout) layout."""
    def conv_init(k, cin, cout):
        kw, kb = jax.random.split(k)
        fan_in = cin * 9
        w = jax.random.normal(kw, (3, 3, cin, cout), jnp.float32)
        w = w * (2.0 / fan_in) ** 0.5
        b = jax.random.normal(kb, (cout,), jnp.float32) * 0.01
        return w, b

    keys = jax.random.split(key, 4 + 2 * n_resblocks)
    params = {"start": conv_init(keys[0], channels, n_features)}
    blocks = []
    for i in range(n_resblocks):
        w1, b1 = conv_init(keys[1 + 2 * i], n_features, n_features)
        w2, b2 = conv_init(keys[2 + 2 * i], n_features, n_features)
        blocks.append((w1, b1, w2, b2))
    params["resblocks"] = blocks
    params["tail"] = conv_init(keys[1 + 2 * n_resblocks], n_features, n_features)
    params["up"] = conv_init(keys[2 + 2 * n_resblocks], n_features, 4 * n_features)
    params["end"] = conv_init(keys[3 + 2 * n_resblocks], n_features, channels)
    return params


# ------------------------------ pure-JAX reference ----------------------------

def _conv_ref(x, w, b):
    y = jax.lax.conv_general_dilated(
        x, w, window_strides=(1, 1), padding="SAME",
        dimension_numbers=("NCHW", "HWIO", "NCHW"),
        precision=jax.lax.Precision.HIGHEST)
    return y + b.reshape(1, -1, 1, 1)


def resnet_reference(x, params, res_scale=0.15):
    """Pure-JAX reference matching the PyTorch module (for verification)."""
    xs = _conv_ref(x, *params["start"])
    h = xs
    for (w1, b1, w2, b2) in params["resblocks"]:
        t = jax.nn.relu(_conv_ref(h, w1, b1))
        u = _conv_ref(t, w2, b2)
        h = res_scale * u + h
    h = _conv_ref(h, *params["tail"]) + res_scale * xs
    u = _pixel_shuffle_nchw(_conv_ref(h, *params["up"]), 2)
    return _conv_ref(u, *params["end"])


# ------------------------------------- main -----------------------------------

if __name__ == "__main__":
    key = jax.random.PRNGKey(0)
    kx, kp = jax.random.split(key)

    N, C, H, W = 2, 4, 16, 16          # small NCHW input (PyTorch convention)
    n_features, n_resblocks = 16, 2

    x = jax.random.normal(kx, (N, C, H, W), jnp.float32)
    params = init_params(kp, C, n_features, n_resblocks)

    y = jax.jit(resnet_forward)(x, params)
    jax.block_until_ready(y)

    assert y.shape == (N, C, 2 * H, 2 * W), y.shape
    assert y.dtype == jnp.float32, y.dtype

    y_ref = jax.jit(resnet_reference)(x, params)
    err = float(jnp.max(jnp.abs(y - y_ref)))
    assert err < 5e-2, f"max |pallas - reference| = {err}"

    print("KERNEL_OK")
</pallas_src>

<mosaic_0001>
module attributes {stable_mosaic.version = 11 : i64} {
  func.func @_trunk_kernel(%arg0: i32, %arg1: memref<1x4x384xf32, #tpu.memory_space<vmem>>, %arg2: memref<1x384xf32, #tpu.memory_space<vmem>>, %arg3: memref<16x36xf32, #tpu.memory_space<vmem>>, %arg4: memref<16x1xf32, #tpu.memory_space<vmem>>, %arg5: memref<4x16x144xf32, #tpu.memory_space<vmem>>, %arg6: memref<4x16x1xf32, #tpu.memory_space<vmem>>, %arg7: memref<16x144xf32, #tpu.memory_space<vmem>>, %arg8: memref<16x1xf32, #tpu.memory_space<vmem>>, %arg9: memref<64x144xf32, #tpu.memory_space<vmem>>, %arg10: memref<64x1xf32, #tpu.memory_space<vmem>>, %arg11: memref<1x64x384xf32, #tpu.memory_space<vmem>>) attributes {dimension_semantics = [#tpu.dimension_semantics<parallel>], iteration_bounds = array<i64: 2>, scalar_prefetch = 0 : i64, scratch_operands = 0 : i64, tpu.core_type = #tpu.core_type<tc>, window_params = [{transform_indices = @transform_0, window_bounds = array<i64: 1, 4, 384>}, {pipeline_mode = #tpu.pipeline_mode<synchronous>, transform_indices = @transform_1, window_bounds = array<i64: 1, 384>}, {pipeline_mode = #tpu.pipeline_mode<synchronous>, transform_indices = @transform_2, window_bounds = array<i64: 16, 36>}, {pipeline_mode = #tpu.pipeline_mode<synchronous>, transform_indices = @transform_3, window_bounds = array<i64: 16, 1>}, {pipeline_mode = #tpu.pipeline_mode<synchronous>, transform_indices = @transform_4, window_bounds = array<i64: 4, 16, 144>}, {pipeline_mode = #tpu.pipeline_mode<synchronous>, transform_indices = @transform_5, window_bounds = array<i64: 4, 16, 1>}, {pipeline_mode = #tpu.pipeline_mode<synchronous>, transform_indices = @transform_6, window_bounds = array<i64: 16, 144>}, {pipeline_mode = #tpu.pipeline_mode<synchronous>, transform_indices = @transform_7, window_bounds = array<i64: 16, 1>}, {pipeline_mode = #tpu.pipeline_mode<synchronous>, transform_indices = @transform_8, window_bounds = array<i64: 64, 144>}, {pipeline_mode = #tpu.pipeline_mode<synchronous>, transform_indices = @transform_9, window_bounds = array<i64: 64, 1>}, {transform_indices = @transform_10, window_bounds = array<i64: 1, 64, 384>}]} {
    %c0 = arith.constant 0 : index
    %c0_0 = arith.constant 0 : index
    %0 = vector.load %arg2[%c0, %c0_0] : memref<1x384xf32, #tpu.memory_space<vmem>>, vector<1x384xf32>
    %c0_1 = arith.constant 0 : index
    %c0_2 = arith.constant 0 : index
    %c0_3 = arith.constant 0 : index
    %1 = vector.load %arg1[%c0_1, %c0_2, %c0_3] : memref<1x4x384xf32, #tpu.memory_space<vmem>>, vector<1x4x384xf32>
    %2 = vector.shape_cast %1 : vector<1x4x384xf32> to vector<4x384xf32>
    %c0_4 = arith.constant 0 : index
    %c0_5 = arith.constant 0 : index
    %3 = vector.load %arg3[%c0_4, %c0_5] : memref<16x36xf32, #tpu.memory_space<vmem>>, vector<16x36xf32>
    %c0_6 = arith.constant 0 : index
    %c0_7 = arith.constant 0 : index
    %4 = vector.load %arg4[%c0_6, %c0_7] : memref<16x1xf32, #tpu.memory_space<vmem>>, vector<16x1xf32>
    %c19_i32 = arith.constant 19 : i32
    %5 = tpu.dynamic_rotate %2 by %c19_i32 dim 1 : vector<4x384xf32>, i32 -> vector<4x384xf32>
    %c18_i32 = arith.constant 18 : i32
    %6 = tpu.dynamic_rotate %2 by %c18_i32 dim 1 : vector<4x384xf32>, i32 -> vector<4x384xf32>
    %c17_i32 = arith.constant 17 : i32
    %7 = tpu.dynamic_rotate %2 by %c17_i32 dim 1 : vector<4x384xf32>, i32 -> vector<4x384xf32>
    %c1_i32 = arith.constant 1 : i32
    %8 = tpu.dynamic_rotate %2 by %c1_i32 dim 1 : vector<4x384xf32>, i32 -> vector<4x384xf32>
    %c383_i32 = arith.constant 383 : i32
    %9 = tpu.dynamic_rotate %2 by %c383_i32 dim 1 : vector<4x384xf32>, i32 -> vector<4x384xf32>
    %c367_i32 = arith.constant 367 : i32
    %10 = tpu.dynamic_rotate %2 by %c367_i32 dim 1 : vector<4x384xf32>, i32 -> vector<4x384xf32>
    %c366_i32 = arith.constant 366 : i32
    %11 = tpu.dynamic_rotate %2 by %c366_i32 dim 1 : vector<4x384xf32>, i32 -> vector<4x384xf32>
    %c365_i32 = arith.constant 365 : i32
    %12 = tpu.dynamic_rotate %2 by %c365_i32 dim 1 : vector<4x384xf32>, i32 -> vector<4x384xf32>
    %13 = tpu.concatenate %5, %6, %7, %8, %2, %9, %10, %11, %12 in 0 : vector<4x384xf32>, vector<4x384xf32>, vector<4x384xf32>, vector<4x384xf32>, vector<4x384xf32>, vector<4x384xf32>, vector<4x384xf32>, vector<4x384xf32>, vector<4x384xf32> -> vector<36x384xf32>
    %cst = arith.constant dense<0.000000e+00> : vector<16x384xf32>
    %14 = tpu.matmul %3, %13, %cst {dimension_numbers = #tpu.dot_dimension_numbers<[1], [0], [0], [1], [0, 0, 1, 1], [], []>} : vector<16x36xf32>, vector<36x384xf32>, vector<16x384xf32> -> vector<16x384xf32>
    %15 = vector.broadcast %4 : vector<16x1xf32> to vector<16x384xf32>
    %16 = arith.addf %14, %15 : vector<16x384xf32>
    %17 = vector.broadcast %0 : vector<1x384xf32> to vector<16x384xf32>
    %18 = arith.mulf %16, %17 : vector<16x384xf32>
    %c0_8 = arith.constant 0 : index
    %c0_9 = arith.constant 0 : index
    %c0_10 = arith.constant 0 : index
    %19 = vector.load %arg5[%c0_8, %c0_9, %c0_10] : memref<4x16x144xf32, #tpu.memory_space<vmem>>, vector<1x16x144xf32>
    %20 = vector.shape_cast %19 : vector<1x16x144xf32> to vector<16x144xf32>
    %c0_11 = arith.constant 0 : index
    %c0_12 = arith.constant 0 : index
    %c0_13 = arith.constant 0 : index
    %21 = vector.load %arg6[%c0_11, %c0_12, %c0_13] : memref<4x16x1xf32, #tpu.memory_space<vmem>>, vector<1x16x1xf32>
    %22 = vector.shape_cast %21 : vector<1x16x1xf32> to vector<16x1xf32>
    %c19_i32_14 = arith.constant 19 : i32
    %23 = tpu.dynamic_rotate %18 by %c19_i32_14 dim 1 : vector<16x384xf32>, i32 -> vector<16x384xf32>
    %c18_i32_15 = arith.constant 18 : i32
    %24 = tpu.dynamic_rotate %18 by %c18_i32_15 dim 1 : vector<16x384xf32>, i32 -> vector<16x384xf32>
    %c17_i32_16 = arith.constant 17 : i32
    %25 = tpu.dynamic_rotate %18 by %c17_i32_16 dim 1 : vector<16x384xf32>, i32 -> vector<16x384xf32>
    %c1_i32_17 = arith.constant 1 : i32
    %26 = tpu.dynamic_rotate %18 by %c1_i32_17 dim 1 : vector<16x384xf32>, i32 -> vector<16x384xf32>
    %c383_i32_18 = arith.constant 383 : i32
    %27 = tpu.dynamic_rotate %18 by %c383_i32_18 dim 1 : vector<16x384xf32>, i32 -> vector<16x384xf32>
    %c367_i32_19 = arith.constant 367 : i32
    %28 = tpu.dynamic_rotate %18 by %c367_i32_19 dim 1 : vector<16x384xf32>, i32 -> vector<16x384xf32>
    %c366_i32_20 = arith.constant 366 : i32
    %29 = tpu.dynamic_rotate %18 by %c366_i32_20 dim 1 : vector<16x384xf32>, i32 -> vector<16x384xf32>
    %c365_i32_21 = arith.constant 365 : i32
    %30 = tpu.dynamic_rotate %18 by %c365_i32_21 dim 1 : vector<16x384xf32>, i32 -> vector<16x384xf32>
    %31 = tpu.concatenate %23, %24, %25, %26, %18, %27, %28, %29, %30 in 0 : vector<16x384xf32>, vector<16x384xf32>, vector<16x384xf32>, vector<16x384xf32>, vector<16x384xf32>, vector<16x384xf32>, vector<16x384xf32>, vector<16x384xf32>, vector<16x384xf32> -> vector<144x384xf32>
    %cst_22 = arith.constant dense<0.000000e+00> : vector<16x384xf32>
    %32 = tpu.matmul %20, %31, %cst_22 {dimension_numbers = #tpu.dot_dimension_numbers<[1], [0], [0], [1], [0, 0, 1, 1], [], []>} : vector<16x144xf32>, vector<144x384xf32>, vector<16x384xf32> -> vector<16x384xf32>
    %33 = vector.broadcast %22 : vector<16x1xf32> to vector<16x384xf32>
    %34 = arith.addf %32, %33 : vector<16x384xf32>
    %cst_23 = arith.constant 0.000000e+00 : f32
    %35 = vector.broadcast %cst_23 : f32 to vector<16x384xf32>
    %36 = arith.maximumf %34, %35 : vector<16x384xf32>
    %37 = vector.broadcast %0 : vector<1x384xf32> to vector<16x384xf32>
    %38 = arith.mulf %36, %37 : vector<16x384xf32>
    %c1 = arith.constant 1 : index
    %c0_24 = arith.constant 0 : index
    %c0_25 = arith.constant 0 : index
    %39 = vector.load %arg5[%c1, %c0_24, %c0_25] : memref<4x16x144xf32, #tpu.memory_space<vmem>>, vector<1x16x144xf32>
    %40 = vector.shape_cast %39 : vector<1x16x144xf32> to vector<16x144xf32>
    %c1_26 = arith.constant 1 : index
    %c0_27 = arith.constant 0 : index
    %c0_28 = arith.constant 0 : index
    %41 = vector.load %arg6[%c1_26, %c0_27, %c0_28] : memref<4x16x1xf32, #tpu.memory_space<vmem>>, vector<1x16x1xf32>
    %42 = vector.shape_cast %41 : vector<1x16x1xf32> to vector<16x1xf32>
    %c19_i32_29 = arith.constant 19 : i32
    %43 = tpu.dynamic_rotate %38 by %c19_i32_29 dim 1 : vector<16x384xf32>, i32 -> vector<16x384xf32>
    %c18_i32_30 = arith.constant 18 : i32
    %44 = tpu.dynamic_rotate %38 by %c18_i32_30 dim 1 : vector<16x384xf32>, i32 -> vector<16x384xf32>
    %c17_i32_31 = arith.constant 17 : i32
    %45 = tpu.dynamic_rotate %38 by %c17_i32_31 dim 1 : vector<16x384xf32>, i32 -> vector<16x384xf32>
    %c1_i32_32 = arith.constant 1 : i32
    %46 = tpu.dynamic_rotate %38 by %c1_i32_32 dim 1 : vector<16x384xf32>, i32 -> vector<16x384xf32>
    %c383_i32_33 = arith.constant 383 : i32
    %47 = tpu.dynamic_rotate %38 by %c383_i32_33 dim 1 : vector<16x384xf32>, i32 -> vector<16x384xf32>
    %c367_i32_34 = arith.constant 367 : i32
    %48 = tpu.dynamic_rotate %38 by %c367_i32_34 dim 1 : vector<16x384xf32>, i32 -> vector<16x384xf32>
    %c366_i32_35 = arith.constant 366 : i32
    %49 = tpu.dynamic_rotate %38 by %c366_i32_35 dim 1 : vector<16x384xf32>, i32 -> vector<16x384xf32>
    %c365_i32_36 = arith.constant 365 : i32
    %50 = tpu.dynamic_rotate %38 by %c365_i32_36 dim 1 : vector<16x384xf32>, i32 -> vector<16x384xf32>
    %51 = tpu.concatenate %43, %44, %45, %46, %38, %47, %48, %49, %50 in 0 : vector<16x384xf32>, vector<16x384xf32>, vector<16x384xf32>, vector<16x384xf32>, vector<16x384xf32>, vector<16x384xf32>, vector<16x384xf32>, vector<16x384xf32>, vector<16x384xf32> -> vector<144x384xf32>
    %cst_37 = arith.constant dense<0.000000e+00> : vector<16x384xf32>
    %52 = tpu.matmul %40, %51, %cst_37 {dimension_numbers = #tpu.dot_dimension_numbers<[1], [0], [0], [1], [0, 0, 1, 1], [], []>} : vector<16x144xf32>, vector<144x384xf32>, vector<16x384xf32> -> vector<16x384xf32>
    %53 = vector.broadcast %42 : vector<16x1xf32> to vector<16x384xf32>
    %54 = arith.addf %52, %53 : vector<16x384xf32>
    %55 = vector.broadcast %0 : vector<1x384xf32> to vector<16x384xf32>
    %56 = arith.mulf %54, %55 : vector<16x384xf32>
    %cst_38 = arith.constant 1.500000e-01 : f32
    %57 = vector.broadcast %cst_38 : f32 to vector<16x384xf32>
    %58 = arith.mulf %57, %56 : vector<16x384xf32>
    %59 = arith.addf %58, %18 : vector<16x384xf32>
    %c2 = arith.constant 2 : index
    %c0_39 = arith.constant 0 : index
    %c0_40 = arith.constant 0 : index
    %60 = vector.load %arg5[%c2, %c0_39, %c0_40] : memref<4x16x144xf32, #tpu.memory_space<vmem>>, vector<1x16x144xf32>
    %61 = vector.shape_cast %60 : vector<1x16x144xf32> to vector<16x144xf32>
    %c2_41 = arith.constant 2 : index
    %c0_42 = arith.constant 0 : index
    %c0_43 = arith.constant 0 : index
    %62 = vector.load %arg6[%c2_41, %c0_42, %c0_43] : memref<4x16x1xf32, #tpu.memory_space<vmem>>, vector<1x16x1xf32>
    %63 = vector.shape_cast %62 : vector<1x16x1xf32> to vector<16x1xf32>
    %c19_i32_44 = arith.constant 19 : i32
    %64 = tpu.dynamic_rotate %59 by %c19_i32_44 dim 1 : vector<16x384xf32>, i32 -> vector<16x384xf32>
    %c18_i32_45 = arith.constant 18 : i32
    %65 = tpu.dynamic_rotate %59 by %c18_i32_45 dim 1 : vector<16x384xf32>, i32 -> vector<16x384xf32>
    %c17_i32_46 = arith.constant 17 : i32
    %66 = tpu.dynamic_rotate %59 by %c17_i32_46 dim 1 : vector<16x384xf32>, i32 -> vector<16x384xf32>
    %c1_i32_47 = arith.constant 1 : i32
    %67 = tpu.dynamic_rotate %59 by %c1_i32_47 dim 1 : vector<16x384xf32>, i32 -> vector<16x384xf32>
    %c383_i32_48 = arith.constant 383 : i32
    %68 = tpu.dynamic_rotate %59 by %c383_i32_48 dim 1 : vector<16x384xf32>, i32 -> vector<16x384xf32>
    %c367_i32_49 = arith.constant 367 : i32
    %69 = tpu.dynamic_rotate %59 by %c367_i32_49 dim 1 : vector<16x384xf32>, i32 -> vector<16x384xf32>
    %c366_i32_50 = arith.constant 366 : i32
    %70 = tpu.dynamic_rotate %59 by %c366_i32_50 dim 1 : vector<16x384xf32>, i32 -> vector<16x384xf32>
    %c365_i32_51 = arith.constant 365 : i32
    %71 = tpu.dynamic_rotate %59 by %c365_i32_51 dim 1 : vector<16x384xf32>, i32 -> vector<16x384xf32>
    %72 = tpu.concatenate %64, %65, %66, %67, %59, %68, %69, %70, %71 in 0 : vector<16x384xf32>, vector<16x384xf32>, vector<16x384xf32>, vector<16x384xf32>, vector<16x384xf32>, vector<16x384xf32>, vector<16x384xf32>, vector<16x384xf32>, vector<16x384xf32> -> vector<144x384xf32>
    %cst_52 = arith.constant dense<0.000000e+00> : vector<16x384xf32>
    %73 = tpu.matmul %61, %72, %cst_52 {dimension_numbers = #tpu.dot_dimension_numbers<[1], [0], [0], [1], [0, 0, 1, 1], [], []>} : vector<16x144xf32>, vector<144x384xf32>, vector<16x384xf32> -> vector<16x384xf32>
    %74 = vector.broadcast %63 : vector<16x1xf32> to vector<16x384xf32>
    %75 = arith.addf %73, %74 : vector<16x384xf32>
    %cst_53 = arith.constant 0.000000e+00 : f32
    %76 = vector.broadcast %cst_53 : f32 to vector<16x384xf32>
    %77 = arith.maximumf %75, %76 : vector<16x384xf32>
    %78 = vector.broadcast %0 : vector<1x384xf32> to vector<16x384xf32>
    %79 = arith.mulf %77, %78 : vector<16x384xf32>
    %c3 = arith.constant 3 : index
    %c0_54 = arith.constant 0 : index
    %c0_55 = arith.constant 0 : index
    %80 = vector.load %arg5[%c3, %c0_54, %c0_55] : memref<4x16x144xf32, #tpu.memory_space<vmem>>, vector<1x16x144xf32>
    %81 = vector.shape_cast %80 : vector<1x16x144xf32> to vector<16x144xf32>
    %c3_56 = arith.constant 3 : index
    %c0_57 = arith.constant 0 : index
    %c0_58 = arith.constant 0 : index
    %82 = vector.load %arg6[%c3_56, %c0_57, %c0_58] : memref<4x16x1xf32, #tpu.memory_space<vmem>>, vector<1x16x1xf32>
    %83 = vector.shape_cast %82 : vector<1x16x1xf32> to vector<16x1xf32>
    %c19_i32_59 = arith.constant 19 : i32
    %84 = tpu.dynamic_rotate %79 by %c19_i32_59 dim 1 : vector<16x384xf32>, i32 -> vector<16x384xf32>
    %c18_i32_60 = arith.constant 18 : i32
    %85 = tpu.dynamic_rotate %79 by %c18_i32_60 dim 1 : vector<16x384xf32>, i32 -> vector<16x384xf32>
    %c17_i32_61 = arith.constant 17 : i32
    %86 = tpu.dynamic_rotate %79 by %c17_i32_61 dim 1 : vector<16x384xf32>, i32 -> vector<16x384xf32>
    %c1_i32_62 = arith.constant 1 : i32
    %87 = tpu.dynamic_rotate %79 by %c1_i32_62 dim 1 : vector<16x384xf32>, i32 -> vector<16x384xf32>
    %c383_i32_63 = arith.constant 383 : i32
    %88 = tpu.dynamic_rotate %79 by %c383_i32_63 dim 1 : vector<16x384xf32>, i32 -> vector<16x384xf32>
    %c367_i32_64 = arith.constant 367 : i32
    %89 = tpu.dynamic_rotate %79 by %c367_i32_64 dim 1 : vector<16x384xf32>, i32 -> vector<16x384xf32>
    %c366_i32_65 = arith.constant 366 : i32
    %90 = tpu.dynamic_rotate %79 by %c366_i32_65 dim 1 : vector<16x384xf32>, i32 -> vector<16x384xf32>
    %c365_i32_66 = arith.constant 365 : i32
    %91 = tpu.dynamic_rotate %79 by %c365_i32_66 dim 1 : vector<16x384xf32>, i32 -> vector<16x384xf32>
    %92 = tpu.concatenate %84, %85, %86, %87, %79, %88, %89, %90, %91 in 0 : vector<16x384xf32>, vector<16x384xf32>, vector<16x384xf32>, vector<16x384xf32>, vector<16x384xf32>, vector<16x384xf32>, vector<16x384xf32>, vector<16x384xf32>, vector<16x384xf32> -> vector<144x384xf32>
    %cst_67 = arith.constant dense<0.000000e+00> : vector<16x384xf32>
    %93 = tpu.matmul %81, %92, %cst_67 {dimension_numbers = #tpu.dot_dimension_numbers<[1], [0], [0], [1], [0, 0, 1, 1], [], []>} : vector<16x144xf32>, vector<144x384xf32>, vector<16x384xf32> -> vector<16x384xf32>
    %94 = vector.broadcast %83 : vector<16x1xf32> to vector<16x384xf32>
    %95 = arith.addf %93, %94 : vector<16x384xf32>
    %96 = vector.broadcast %0 : vector<1x384xf32> to vector<16x384xf32>
    %97 = arith.mulf %95, %96 : vector<16x384xf32>
    %cst_68 = arith.constant 1.500000e-01 : f32
    %98 = vector.broadcast %cst_68 : f32 to vector<16x384xf32>
    %99 = arith.mulf %98, %97 : vector<16x384xf32>
    %100 = arith.addf %99, %59 : vector<16x384xf32>
    %c0_69 = arith.constant 0 : index
    %c0_70 = arith.constant 0 : index
    %101 = vector.load %arg7[%c0_69, %c0_70] : memref<16x144xf32, #tpu.memory_space<vmem>>, vector<16x144xf32>
    %c0_71 = arith.constant 0 : index
    %c0_72 = arith.constant 0 : index
    %102 = vector.load %arg8[%c0_71, %c0_72] : memref<16x1xf32, #tpu.memory_space<vmem>>, vector<16x1xf32>
    %c19_i32_73 = arith.constant 19 : i32
    %103 = tpu.dynamic_rotate %100 by %c19_i32_73 dim 1 : vector<16x384xf32>, i32 -> vector<16x384xf32>
    %c18_i32_74 = arith.constant 18 : i32
    %104 = tpu.dynamic_rotate %100 by %c18_i32_74 dim 1 : vector<16x384xf32>, i32 -> vector<16x384xf32>
    %c17_i32_75 = arith.constant 17 : i32
    %105 = tpu.dynamic_rotate %100 by %c17_i32_75 dim 1 : vector<16x384xf32>, i32 -> vector<16x384xf32>
    %c1_i32_76 = arith.constant 1 : i32
    %106 = tpu.dynamic_rotate %100 by %c1_i32_76 dim 1 : vector<16x384xf32>, i32 -> vector<16x384xf32>
    %c383_i32_77 = arith.constant 383 : i32
    %107 = tpu.dynamic_rotate %100 by %c383_i32_77 dim 1 : vector<16x384xf32>, i32 -> vector<16x384xf32>
    %c367_i32_78 = arith.constant 367 : i32
    %108 = tpu.dynamic_rotate %100 by %c367_i32_78 dim 1 : vector<16x384xf32>, i32 -> vector<16x384xf32>
    %c366_i32_79 = arith.constant 366 : i32
    %109 = tpu.dynamic_rotate %100 by %c366_i32_79 dim 1 : vector<16x384xf32>, i32 -> vector<16x384xf32>
    %c365_i32_80 = arith.constant 365 : i32
    %110 = tpu.dynamic_rotate %100 by %c365_i32_80 dim 1 : vector<16x384xf32>, i32 -> vector<16x384xf32>
    %111 = tpu.concatenate %103, %104, %105, %106, %100, %107, %108, %109, %110 in 0 : vector<16x384xf32>, vector<16x384xf32>, vector<16x384xf32>, vector<16x384xf32>, vector<16x384xf32>, vector<16x384xf32>, vector<16x384xf32>, vector<16x384xf32>, vector<16x384xf32> -> vector<144x384xf32>
    %cst_81 = arith.constant dense<0.000000e+00> : vector<16x384xf32>
    %112 = tpu.matmul %101, %111, %cst_81 {dimension_numbers = #tpu.dot_dimension_numbers<[1], [0], [0], [1], [0, 0, 1, 1], [], []>} : vector<16x144xf32>, vector<144x384xf32>, vector<16x384xf32> -> vector<16x384xf32>
    %113 = vector.broadcast %102 : vector<16x1xf32> to vector<16x384xf32>
    %114 = arith.addf %112, %113 : vector<16x384xf32>
    %115 = vector.broadcast %0 : vector<1x384xf32> to vector<16x384xf32>
    %116 = arith.mulf %114, %115 : vector<16x384xf32>
    %cst_82 = arith.constant 1.500000e-01 : f32
    %117 = vector.broadcast %cst_82 : f32 to vector<16x384xf32>
    %118 = arith.mulf %117, %18 : vector<16x384xf32>
    %119 = arith.addf %116, %118 : vector<16x384xf32>
    %c0_83 = arith.constant 0 : index
    %c0_84 = arith.constant 0 : index
    %120 = vector.load %arg9[%c0_83, %c0_84] : memref<64x144xf32, #tpu.memory_space<vmem>>, vector<64x144xf32>
    %c0_85 = arith.constant 0 : index
    %c0_86 = arith.constant 0 : index
    %121 = vector.load %arg10[%c0_85, %c0_86] : memref<64x1xf32, #tpu.memory_space<vmem>>, vector<64x1xf32>
    %c19_i32_87 = arith.constant 19 : i32
    %122 = tpu.dynamic_rotate %119 by %c19_i32_87 dim 1 : vector<16x384xf32>, i32 -> vector<16x384xf32>
    %c18_i32_88 = arith.constant 18 : i32
    %123 = tpu.dynamic_rotate %119 by %c18_i32_88 dim 1 : vector<16x384xf32>, i32 -> vector<16x384xf32>
    %c17_i32_89 = arith.constant 17 : i32
    %124 = tpu.dynamic_rotate %119 by %c17_i32_89 dim 1 : vector<16x384xf32>, i32 -> vector<16x384xf32>
    %c1_i32_90 = arith.constant 1 : i32
    %125 = tpu.dynamic_rotate %119 by %c1_i32_90 dim 1 : vector<16x384xf32>, i32 -> vector<16x384xf32>
    %c383_i32_91 = arith.constant 383 : i32
    %126 = tpu.dynamic_rotate %119 by %c383_i32_91 dim 1 : vector<16x384xf32>, i32 -> vector<16x384xf32>
    %c367_i32_92 = arith.constant 367 : i32
    %127 = tpu.dynamic_rotate %119 by %c367_i32_92 dim 1 : vector<16x384xf32>, i32 -> vector<16x384xf32>
    %c366_i32_93 = arith.constant 366 : i32
    %128 = tpu.dynamic_rotate %119 by %c366_i32_93 dim 1 : vector<16x384xf32>, i32 -> vector<16x384xf32>
    %c365_i32_94 = arith.constant 365 : i32
    %129 = tpu.dynamic_rotate %119 by %c365_i32_94 dim 1 : vector<16x384xf32>, i32 -> vector<16x384xf32>
    %130 = tpu.concatenate %122, %123, %124, %125, %119, %126, %127, %128, %129 in 0 : vector<16x384xf32>, vector<16x384xf32>, vector<16x384xf32>, vector<16x384xf32>, vector<16x384xf32>, vector<16x384xf32>, vector<16x384xf32>, vector<16x384xf32>, vector<16x384xf32> -> vector<144x384xf32>
    %cst_95 = arith.constant dense<0.000000e+00> : vector<64x384xf32>
    %131 = tpu.matmul %120, %130, %cst_95 {dimension_numbers = #tpu.dot_dimension_numbers<[1], [0], [0], [1], [0, 0, 1, 1], [], []>} : vector<64x144xf32>, vector<144x384xf32>, vector<64x384xf32> -> vector<64x384xf32>
    %132 = vector.broadcast %121 : vector<64x1xf32> to vector<64x384xf32>
    %133 = arith.addf %131, %132 : vector<64x384xf32>
    %c0_96 = arith.constant 0 : index
    %c0_97 = arith.constant 0 : index
    %c0_98 = arith.constant 0 : index
    %134 = vector.load %arg11[%c0_96, %c0_97, %c0_98] : memref<1x64x384xf32, #tpu.memory_space<vmem>>, vector<1x64x384xf32>
    %135 = vector.shape_cast %134 : vector<1x64x384xf32> to vector<64x384xf32>
    %136 = vector.shape_cast %133 : vector<64x384xf32> to vector<1x64x384xf32>
    tpu.vector_store %arg11[%c0_96, %c0_97, %c0_98], %136 {strides = array<i32>} : memref<1x64x384xf32, #tpu.memory_space<vmem>>, vector<1x64x384xf32>,
    return
  }
  func.func @transform_0(%arg0: i32) -> (i32, i32, i32) {
    %c0_i32 = arith.constant 0 : i32
    %c0_i32_0 = arith.constant 0 : i32
    %c0_i32_1 = arith.constant 0 : i32
    return %arg0, %c0_i32, %c0_i32_0 : i32, i32, i32
  }
  func.func @transform_1(%arg0: i32) -> (i32, i32) {
    %c0_i32 = arith.constant 0 : i32
    %c0_i32_0 = arith.constant 0 : i32
    %c0_i32_1 = arith.constant 0 : i32
    return %c0_i32, %c0_i32_0 : i32, i32
  }
  func.func @transform_2(%arg0: i32) -> (i32, i32) {
    %c0_i32 = arith.constant 0 : i32
    %c0_i32_0 = arith.constant 0 : i32
    %c0_i32_1 = arith.constant 0 : i32
    return %c0_i32, %c0_i32_0 : i32, i32
  }
  func.func @transform_3(%arg0: i32) -> (i32, i32) {
    %c0_i32 = arith.constant 0 : i32
    %c0_i32_0 = arith.constant 0 : i32
    %c0_i32_1 = arith.constant 0 : i32
    return %c0_i32, %c0_i32_0 : i32, i32
  }
  func.func @transform_4(%arg0: i32) -> (i32, i32, i32) {
    %c0_i32 = arith.constant 0 : i32
    %c0_i32_0 = arith.constant 0 : i32
    %c0_i32_1 = arith.constant 0 : i32
    %c0_i32_2 = arith.constant 0 : i32
    return %c0_i32, %c0_i32_0, %c0_i32_1 : i32, i32, i32
  }
  func.func @transform_5(%arg0: i32) -> (i32, i32, i32) {
    %c0_i32 = arith.constant 0 : i32
    %c0_i32_0 = arith.constant 0 : i32
    %c0_i32_1 = arith.constant 0 : i32
    %c0_i32_2 = arith.constant 0 : i32
    return %c0_i32, %c0_i32_0, %c0_i32_1 : i32, i32, i32
  }
  func.func @transform_6(%arg0: i32) -> (i32, i32) {
    %c0_i32 = arith.constant 0 : i32
    %c0_i32_0 = arith.constant 0 : i32
    %c0_i32_1 = arith.constant 0 : i32
    return %c0_i32, %c0_i32_0 : i32, i32
  }
  func.func @transform_7(%arg0: i32) -> (i32, i32) {
    %c0_i32 = arith.constant 0 : i32
    %c0_i32_0 = arith.constant 0 : i32
    %c0_i32_1 = arith.constant 0 : i32
    return %c0_i32, %c0_i32_0 : i32, i32
  }
  func.func @transform_8(%arg0: i32) -> (i32, i32) {
    %c0_i32 = arith.constant 0 : i32
    %c0_i32_0 = arith.constant 0 : i32
    %c0_i32_1 = arith.constant 0 : i32
    return %c0_i32, %c0_i32_0 : i32, i32
  }
  func.func @transform_9(%arg0: i32) -> (i32, i32) {
    %c0_i32 = arith.constant 0 : i32
    %c0_i32_0 = arith.constant 0 : i32
    %c0_i32_1 = arith.constant 0 : i32
    return %c0_i32, %c0_i32_0 : i32, i32
  }
  func.func @transform_10(%arg0: i32) -> (i32, i32, i32) {
    %c0_i32 = arith.constant 0 : i32
    %c0_i32_0 = arith.constant 0 : i32
    %c0_i32_1 = arith.constant 0 : i32
    return %arg0, %c0_i32, %c0_i32_0 : i32, i32, i32
  }
}

module attributes {stable_mosaic.version = 11 : i64} {
  func.func @_end_kernel(%arg0: i32, %arg1: memref<1x16x1280xf32, #tpu.memory_space<vmem>>, %arg2: memref<4x144xf32, #tpu.memory_space<vmem>>, %arg3: memref<4x1xf32, #tpu.memory_space<vmem>>, %arg4: memref<1x4x1280xf32, #tpu.memory_space<vmem>>) attributes {dimension_semantics = [#tpu.dimension_semantics<parallel>], iteration_bounds = array<i64: 2>, scalar_prefetch = 0 : i64, scratch_operands = 0 : i64, tpu.core_type = #tpu.core_type<tc>, window_params = [{transform_indices = @transform_0, window_bounds = array<i64: 1, 16, 1280>}, {pipeline_mode = #tpu.pipeline_mode<synchronous>, transform_indices = @transform_1, window_bounds = array<i64: 4, 144>}, {pipeline_mode = #tpu.pipeline_mode<synchronous>, transform_indices = @transform_2, window_bounds = array<i64: 4, 1>}, {transform_indices = @transform_3, window_bounds = array<i64: 1, 4, 1280>}]} {
    %c0 = arith.constant 0 : index
    %c0_0 = arith.constant 0 : index
    %c0_1 = arith.constant 0 : index
    %0 = vector.load %arg1[%c0, %c0_0, %c0_1] : memref<1x16x1280xf32, #tpu.memory_space<vmem>>, vector<1x16x1280xf32>
    %1 = vector.shape_cast %0 : vector<1x16x1280xf32> to vector<16x1280xf32>
    %c0_2 = arith.constant 0 : index
    %c0_3 = arith.constant 0 : index
    %2 = vector.load %arg2[%c0_2, %c0_3] : memref<4x144xf32, #tpu.memory_space<vmem>>, vector<4x144xf32>
    %c0_4 = arith.constant 0 : index
    %c0_5 = arith.constant 0 : index
    %3 = vector.load %arg3[%c0_4, %c0_5] : memref<4x1xf32, #tpu.memory_space<vmem>>, vector<4x1xf32>
    %c35_i32 = arith.constant 35 : i32
    %4 = tpu.dynamic_rotate %1 by %c35_i32 dim 1 : vector<16x1280xf32>, i32 -> vector<16x1280xf32>
    %c34_i32 = arith.constant 34 : i32
    %5 = tpu.dynamic_rotate %1 by %c34_i32 dim 1 : vector<16x1280xf32>, i32 -> vector<16x1280xf32>
    %c33_i32 = arith.constant 33 : i32
    %6 = tpu.dynamic_rotate %1 by %c33_i32 dim 1 : vector<16x1280xf32>, i32 -> vector<16x1280xf32>
    %c1_i32 = arith.constant 1 : i32
    %7 = tpu.dynamic_rotate %1 by %c1_i32 dim 1 : vector<16x1280xf32>, i32 -> vector<16x1280xf32>
    %c1279_i32 = arith.constant 1279 : i32
    %8 = tpu.dynamic_rotate %1 by %c1279_i32 dim 1 : vector<16x1280xf32>, i32 -> vector<16x1280xf32>
    %c1247_i32 = arith.constant 1247 : i32
    %9 = tpu.dynamic_rotate %1 by %c1247_i32 dim 1 : vector<16x1280xf32>, i32 -> vector<16x1280xf32>
    %c1246_i32 = arith.constant 1246 : i32
    %10 = tpu.dynamic_rotate %1 by %c1246_i32 dim 1 : vector<16x1280xf32>, i32 -> vector<16x1280xf32>
    %c1245_i32 = arith.constant 1245 : i32
    %11 = tpu.dynamic_rotate %1 by %c1245_i32 dim 1 : vector<16x1280xf32>, i32 -> vector<16x1280xf32>
    %12 = tpu.concatenate %4, %5, %6, %7, %1, %8, %9, %10, %11 in 0 : vector<16x1280xf32>, vector<16x1280xf32>, vector<16x1280xf32>, vector<16x1280xf32>, vector<16x1280xf32>, vector<16x1280xf32>, vector<16x1280xf32>, vector<16x1280xf32>, vector<16x1280xf32> -> vector<144x1280xf32>
    %cst = arith.constant dense<0.000000e+00> : vector<4x1280xf32>
    %13 = tpu.matmul %2, %12, %cst {dimension_numbers = #tpu.dot_dimension_numbers<[1], [0], [0], [1], [0, 0, 1, 1], [], []>} : vector<4x144xf32>, vector<144x1280xf32>, vector<4x1280xf32> -> vector<4x1280xf32>
    %14 = vector.broadcast %3 : vector<4x1xf32> to vector<4x1280xf32>
    %15 = arith.addf %13, %14 : vector<4x1280xf32>
    %c0_6 = arith.constant 0 : index
    %c0_7 = arith.constant 0 : index
    %c0_8 = arith.constant 0 : index
    %16 = vector.load %arg4[%c0_6, %c0_7, %c0_8] : memref<1x4x1280xf32, #tpu.memory_space<vmem>>, vector<1x4x1280xf32>
    %17 = vector.shape_cast %16 : vector<1x4x1280xf32> to vector<4x1280xf32>
    %18 = vector.shape_cast %15 : vector<4x1280xf32> to vector<1x4x1280xf32>
    tpu.vector_store %arg4[%c0_6, %c0_7, %c0_8], %18 {strides = array<i32>} : memref<1x4x1280xf32, #tpu.memory_space<vmem>>, vector<1x4x1280xf32>,
    return
  }
  func.func @transform_0(%arg0: i32) -> (i32, i32, i32) {
    %c0_i32 = arith.constant 0 : i32
    %c0_i32_0 = arith.constant 0 : i32
    %c0_i32_1 = arith.constant 0 : i32
    return %arg0, %c0_i32, %c0_i32_0 : i32, i32, i32
  }
  func.func @transform_1(%arg0: i32) -> (i32, i32) {
    %c0_i32 = arith.constant 0 : i32
    %c0_i32_0 = arith.constant 0 : i32
    %c0_i32_1 = arith.constant 0 : i32
    return %c0_i32, %c0_i32_0 : i32, i32
  }
  func.func @transform_2(%arg0: i32) -> (i32, i32) {
    %c0_i32 = arith.constant 0 : i32
    %c0_i32_0 = arith.constant 0 : i32
    %c0_i32_1 = arith.constant 0 : i32
    return %c0_i32, %c0_i32_0 : i32, i32
  }
  func.func @transform_3(%arg0: i32) -> (i32, i32, i32) {
    %c0_i32 = arith.constant 0 : i32
    %c0_i32_0 = arith.constant 0 : i32
    %c0_i32_1 = arith.constant 0 : i32
    return %arg0, %c0_i32, %c0_i32_0 : i32, i32, i32
  }
}

</mosaic_0001>

<bundles_post_ra>
// kernel: resnet_forward.2
= control target key start
LH: loop header
LB: loop body
LE: loop exit
PB: predicated region body
PF: predicated region fallthrough
CT: control target
= control target key end

     0   :  { %s3091_s13 = smov 0   ;;  %s5384_s0 = inlined_call_operand.vmem [shape: f32[2,4,384], index: 0, kind: input, shape index: {}]   ;;  %s5385_s1 = inlined_call_operand.vmem [shape: f32[1,384], index: 1, kind: input, shape index: {}]   ;;  %s5386_s2 = inlined_call_operand.vmem [shape: f32[16,36], index: 2, kind: input, shape index: {}]   ;;  %s5387_s3 = inlined_call_operand.vmem [shape: f32[16,1], index: 3, kind: input, shape index: {}]   ;;  %s5388_s4 = inlined_call_operand.vmem [shape: f32[4,16,144], index: 4, kind: input, shape index: {}]   ;;  %s5389_s5 = inlined_call_operand.vmem [shape: f32[4,16,1], index: 5, kind: input, shape index: {}]   ;;  %s5390_s6 = inlined_call_operand.vmem [shape: f32[16,144], index: 6, kind: input, shape index: {}]   ;;  %s5391_s7 = inlined_call_operand.vmem [shape: f32[16,1], index: 7, kind: input, shape index: {}]   ;;  %s5392_s8 = inlined_call_operand.vmem [shape: f32[64,144], index: 8, kind: input, shape index: {}]   ;;  %s5393_s9 = inlined_call_operand.vmem [shape: f32[64,1], index: 9, kind: input, shape index: {}]   ;;  %s5394_s10 = inlined_call_operand.vmem [shape: f32[2,64,384], index: 10, kind: output, shape index: {}]  }
   0x1 LB: > { %s2905_s14 = sadd.s32 4294967295, %s3024_s13   ;;  %p2909_p0 = scmp.ge.s32.totalorder %s3024_s13, 1  ;;  %s3024_s13 = sphi %s3091_s13, %s20_s13  }
   0x2   : > { %p312_p1 = scmp.lt.s32.totalorder %s3024_s13, 3 }
   0x4   : > { %p313_p2 = pnand %p2909_p0, %p312_p1 }
   0x5   : > { %p350_p3 = scmp.lt.s32.totalorder (!%p313_p2), %s2905_s14, 1  ;;  %s3026_s19 = smov (!%p313_p2), 110  }
   0x6   : > { %316 = sbr.rel (%p313_p2) target bundleno = 2856 (0xb28), region = 60  ;;  %s3027_s20 = smov (!%p313_p2), 109  }
   0x7   : > { %s3028_s21 = smov (!%p313_p2), 127   ;;  %s3029_s22 = smov (!%p313_p2), 111  }
   0x8   : > { %s3030_s23 = smov (!%p313_p2), 1   ;;  %s3031_s24 = smov (!%p313_p2), 18  }
   0x9   : > { %s3032_s25 = smov (!%p313_p2), 17   ;;  %s3034_s28 = smov (!%p313_p2), 19  }
   0xb   : > { %s5396_s14 = smov (!%p350_p3, %s2905_s14), 1  ;;  %v3152_v3 = vld [vmem:[%s5386_s2] sm:$0xff]  ;;  %vm511_vm0 = vcmask 293888   ;;  %v3033_v4 = vmov 0.0   ;;  %v3035_v5 = vmov 0   ;;  %v366_v6 = vld [vmem:[%s5387_s3 + $0x8] sm:$0xff]  ;;  %v376_v8 = vlaneseq }
   0xc   : > { %s2995_s15 = smul.u32 12, %s5396_s14  ;;  %591 = vmatprep.mubr.f32.mxu0 %v3033_v4  ;;  %2992 = vmatprep.mubr.msk.f32.mxu1 %vm511_vm0, %v3152_v3  ;;  %v365_v7 = vld [vmem:[%s5387_s3] sm:$0xff]  ;;  %vm488_vm2 = vcmask 1043456   ;;  %vm861_vm10 = vcmask 130048  }
   0xd   : > { %3015 = vset.pattern.permute.xlu0 %v3035_v5  ;;  %3016 = vset.pattern.permute.xlu1 %v3035_v5  ;;  %v3176_v10 = vand.u32 127, %v376_v8  ;;  %s2996_s11 = smul.u32 192, %s5396_s14 }
   0xe   : > { %s354_s18 = scalar_lea.vmem %s5384_s0, %s2995_s15 }
   0xf   : > { %v3105_v0 = vld [vmem:[%s354_s18 + $0x8] sm:$0xf]  ;;  %v3107_v1 = vld [vmem:[%s354_s18] sm:$0xff]  ;;  %vm448_vm1 = vcmp.lt.s32.totalorder %v3176_v10, 109  ;;  %vm438_vm3 = vcmp.lt.s32.totalorder %v3176_v10, 110  ;;  %vm418_vm4 = vcmp.lt.s32.totalorder %v3176_v10, 127  ;;  %s5355_s16 = scalar_lea.vmem %s5394_s10, %s2996_s11 }
  0x10   : > { %436 = vrot.lane.b32.xlu0 %v3105_v0, %s3026_s19  ;;  %432 = vrot.lane.b32.xlu1 %v3107_v1, %s3026_s19  ;;  %v3115_v2 = vcombine.high %v3107_v1, %v3107_v1  ;;  %vm428_vm5 = vcmp.lt.s32.totalorder %v3176_v10, 111  ;;  %vm408_vm6 = vcmp.lt.s32.totalorder %v3176_v10, 1  ;;  %vm398_vm7 = vcmp.lt.s32.totalorder %v3176_v10, 17 }
  0x11   : > { %vm388_vm8 = vcmp.lt.s32.totalorder %v3176_v10, 18  ;;  %vm378_vm9 = vcmp.lt.s32.totalorder %v3176_v10, 19  ;;  %v2381_v10 = vld [vmem:[%s5392_s8 + $0x28] sm:$0xff] }
  0x14   : > { %446 = vrot.lane.b32.xlu0 %v3105_v0, %s3027_s20  ;;  %444 = vrot.lane.b32.xlu1 %v3115_v2, %s3027_s20 }
  0x18   : > { %414 = vrot.lane.b32.xlu1 %v3115_v2, %s3028_s21  ;;  %434 = vrot.lane.b32.xlu0 %v3115_v2, %s3026_s19 }
  0x1c   : > { %424 = vrot.lane.b32.xlu1 %v3115_v2, %s3029_s22  ;;  %416 = vrot.lane.b32.xlu0 %v3105_v0, %s3028_s21 }
  0x20   : > { %442 = vrot.lane.b32.xlu1 %v3107_v1, %s3027_s20  ;;  %426 = vrot.lane.b32.xlu0 %v3105_v0, %s3029_s22 }
  0x24   : > { %422 = vrot.lane.b32.xlu1 %v3107_v1, %s3029_s22  ;;  %412 = vrot.lane.b32.xlu0 %v3107_v1, %s3028_s21 }
  0x28   : > { %404 = vrot.lane.b32.xlu1 %v3115_v2, %s3030_s23  ;;  %402 = vrot.lane.b32.xlu0 %v3107_v1, %s3030_s23 }
  0x2c   : > { %382 = vrot.lane.b32.xlu1 %v3107_v1, %s3031_s24  ;;  %406 = vrot.lane.b32.xlu0 %v3105_v0, %s3030_s23 }
  0x30   : > { %392 = vrot.lane.b32.xlu1 %v3107_v1, %s3032_s25  ;;  %384 = vrot.lane.b32.xlu0 %v3115_v2, %s3031_s24 }
  0x34   : > { %386 = vrot.lane.b32.xlu1 %v3105_v0, %s3031_s24  ;;  %394 = vrot.lane.b32.xlu0 %v3115_v2, %s3032_s25 }
  0x38   : > { %370 = vrot.lane.b32.xlu1 %v3107_v1, %s3034_s28  ;;  %396 = vrot.lane.b32.xlu0 %v3105_v0, %s3032_s25 }
  0x3c   : > { %374 = vrot.lane.b32.xlu1 %v3105_v0, %s3034_s28  ;;  %372 = vrot.lane.b32.xlu0 %v3115_v2, %s3034_s28 }
  0x40   : > { %508 = vperm.xlu0 %3015, %v366_v6   ;;  %503 = vperm.xlu1 %3016, %v365_v7  }
  0x82   : > { %v437_v9 = vpop.permute.xlu0 %436  ;;  %v433_v11 = vpop.permute.xlu1 %432 }
  0x83   : > { %v441_v20 = vsel %vm438_vm3, %v437_v9, %v433_v11 }
  0x84   : > { %v484_v31 = vrot.slane %v441_v20, 4 }
  0x86   : > { %v447_v12 = vpop.permute.xlu0 %446  ;;  %v445_v13 = vpop.permute.xlu1 %444 }
  0x87   : > { %v449_v14 = vsel %vm448_vm1, %v445_v13, %v447_v12 }
  0x88   : > { %2912 = vmatprep.subr.msk.mxu0 %vm488_vm2, %v449_v14 }
  0x8a   : > { %v415_v15 = vpop.permute.xlu1 %414  ;;  %v435_v16 = vpop.permute.xlu0 %434 }
  0x8b   : > { %v439_v19 = vsel %vm438_vm3, %v435_v16, %v437_v9  ;;  %v440_v25 = vsel %vm438_vm3, %v433_v11, %v435_v16 }
  0x8c   : > { %v483_v21 = vrot.slane %v439_v19, 4  ;;  %v482_v32 = vrot.slane %v440_v25, 4  ;;  %v360_v25 = vld [vmem:[%s5385_s1] sm:$0x7] }
  0x8e   : > { %v425_v17 = vpop.permute.xlu1 %424  ;;  %v417_v18 = vpop.permute.xlu0 %416 }
  0x8f   : > { %v419_v22 = vsel %vm418_vm4, %v415_v15, %v417_v18 }
  0x90   : > { %v474_v30 = vrot.slane %v419_v22, 4  ;;  %v364_v22 = vld [vmem:[%s5386_s2 + $0x8] sm:$0xff] }
  0x92   : > { %v443_v23 = vpop.permute.xlu1 %442  ;;  %v427_v24 = vpop.permute.xlu0 %426  ;;  %v496_v43 = vsel %vm488_vm2, %v3115_v2, %v474_v30 }
  0x93   : > { %v429_v26 = vsel %vm428_vm5, %v425_v17, %v427_v24  ;;  %v450_v27 = vsel %vm448_vm1, %v443_v23, %v445_v13  ;;  %v451_v28 = vsel %vm448_vm1, %v447_v12, %v443_v23  ;;  %v681_v23 = vshrl.u32 %v376_v8, 7 }
  0x94   : > { %2913 = vmatpush1.msk.msra.mxu0 %vm488_vm2, %v450_v27  ;;  %2982 = vmatprep.subr.msk.mxu1 %vm488_vm2, %v451_v28  ;;  %v499_v29 = vsel %vm488_vm2, %v429_v26, %v483_v21 }
  0x95   : > { %551 = vmatprep.subr.mxu0 %v499_v29  ;;  %2983 = vmatpush3.msk.msra.mxu1 %vm488_vm2, %v451_v28  ;;  %v682_v8 = vsub.s32 0, %v681_v23 }
  0x96   : > { %v423_v33 = vpop.permute.xlu1 %422  ;;  %v413_v34 = vpop.permute.xlu0 %412 }
  0x97   : > { %v430_v35 = vsel %vm428_vm5, %v423_v33, %v425_v17  ;;  %v431_v36 = vsel %vm428_vm5, %v427_v24, %v423_v33  ;;  %v420_v37 = vsel %vm418_vm4, %v413_v34, %v415_v15  ;;  %v421_v38 = vsel %vm418_vm4, %v417_v18, %v413_v34 }
  0x98   : > { %v473_v39 = vrot.slane %v420_v37, 4  ;;  %v475_v40 = vrot.slane %v421_v38, 4  ;;  %v498_v41 = vsel %vm488_vm2, %v430_v35, %v482_v32  ;;  %v500_v42 = vsel %vm488_vm2, %v431_v36, %v484_v31 }
  0x99   : > { %552 = vmatpush1.msra.mxu0 %v498_v41  ;;  %2984 = vmatprep.subr.mxu1 %v500_v42  ;;  %v690_v24 = vsub.s32 2, %v681_v23  ;;  %v3279_v34 = vrot.slane %v360_v25, %v682_v8  ;;  %v686_v38 = vsub.s32 1, %v681_v23 }
  0x9a   : > { %v405_v44 = vpop.permute.xlu1 %404  ;;  %553 = vmatprep.subr.mxu0 %v496_v43  ;;  %2985 = vmatpush3.msra.mxu1 %v500_v42  ;;  %v403_v45 = vpop.permute.xlu0 %402  ;;  %v495_v46 = vsel %vm488_vm2, %v3107_v1, %v473_v39  ;;  %v497_v47 = vsel %vm488_vm2, %v3105_v0, %v475_v40 }
  0x9b   : > { %554 = vmatpush1.msra.mxu0 %v495_v46  ;;  %2986 = vmatprep.subr.mxu1 %v497_v47  ;;  %v410_v52 = vsel %vm408_vm6, %v403_v45, %v405_v44  ;;  %v3266_v27 = vrot.slane %v360_v25, %v690_v24  ;;  %v3299_v41 = vrot.slane %v360_v25, %v686_v38 }
  0x9c   : > { %2987 = vmatpush3.msra.mxu1 %v497_v47  ;;  %v465_v53 = vrot.slane %v410_v52, 4 }
  0x9e   : > { %v383_v48 = vpop.permute.xlu1 %382  ;;  %v407_v49 = vpop.permute.xlu0 %406 }
  0x9f   : > { %v409_v56 = vsel %vm408_vm6, %v405_v44, %v407_v49  ;;  %v411_v57 = vsel %vm408_vm6, %v407_v49, %v403_v45  ;;  %v702_v49 = vld [vmem:[%s5388_s4 + $0x8] sm:$0xff] }
  0xa0   : > { %v464_v60 = vrot.slane %v411_v57, 4  ;;  %v466_v61 = vrot.slane %v409_v56, 4 }
  0xa2   : > { %v393_v50 = vpop.permute.xlu1 %392  ;;  %v385_v51 = vpop.permute.xlu0 %384 }
  0xa3   : > { %v390_v62 = vsel %vm388_vm8, %v383_v48, %v385_v51 }
  0xa4   : > { %v456_v11 = vrot.slane %v390_v62, 4 }
  0xa6   : > { %v387_v54 = vpop.permute.xlu1 %386  ;;  %v395_v55 = vpop.permute.xlu0 %394 }
  0xa7   : > { %v400_v58 = vsel %vm398_vm7, %v393_v50, %v395_v55  ;;  %v389_v1 = vsel %vm388_vm8, %v385_v51, %v387_v54  ;;  %v391_v2 = vsel %vm388_vm8, %v387_v54, %v383_v48  ;;  %v706_v51 = vld [vmem:[%s5389_s5 + $0x8] sm:$0xff] }
  0xa8   : > { %v493_v59 = vsel %vm488_vm2, %v400_v58, %v465_v53  ;;  %v455_v12 = vrot.slane %v391_v2, 4  ;;  %v457_v13 = vrot.slane %v389_v1, 4 }
  0xa9   : > { %555 = vmatprep.subr.mxu0 %v493_v59 }
  0xaa   : > { %v371_v63 = vpop.permute.xlu1 %370  ;;  %v397_v0 = vpop.permute.xlu0 %396 }
  0xab   : > { %v399_v5 = vsel %vm398_vm7, %v395_v55, %v397_v0  ;;  %v401_v6 = vsel %vm398_vm7, %v397_v0, %v393_v50  ;;  %v705_v50 = vld [vmem:[%s5389_s5] sm:$0xff] }
  0xac   : > { %v492_v7 = vsel %vm488_vm2, %v401_v6, %v464_v60  ;;  %v494_v9 = vsel %vm488_vm2, %v399_v5, %v466_v61 }
  0xad   : > { %556 = vmatpush1.msra.mxu0 %v492_v7  ;;  %2988 = vmatprep.subr.mxu1 %v494_v9 }
  0xae   : > { %v375_v14 = vpop.permute.xlu1 %374  ;;  %2989 = vmatpush3.msra.mxu1 %v494_v9  ;;  %v373_v15 = vpop.permute.xlu0 %372 }
  0xaf   : > { %v381_v16 = vsel %vm378_vm9, %v375_v14, %v371_v63  ;;  %v379_v17 = vsel %vm378_vm9, %v373_v15, %v375_v14  ;;  %v380_v18 = vsel %vm378_vm9, %v371_v63, %v373_v15 }
  0xb0   : > { %v490_v19 = vsel %vm488_vm2, %v380_v18, %v456_v11  ;;  %v491_v20 = vsel %vm488_vm2, %v379_v17, %v457_v13  ;;  %v489_v21 = vsel %vm488_vm2, %v381_v16, %v455_v12 }
  0xb1   : > { %557 = vmatprep.subr.mxu0 %v490_v19  ;;  %2990 = vmatprep.subr.mxu1 %v491_v20 }
  0xb2   : > { %558 = vmatpush1.msra.mxu0 %v489_v21  ;;  %2991 = vmatpush3.msra.mxu1 %v491_v20 }
  0xb3   : > { %2914 = vmatmul.mubr.msk.f32.vlgmr.msra.gmra.mxu0 %vm511_vm0, %v3152_v3  ;;  %2993 = vmatmul.mubr.msk.f32.vlgmr.msra.gmra.mxu1 %vm511_vm0, %v364_v22 }
  0xb4   : > { %597 = vmatprep.mubr.f32.mxu0 %v3033_v4  ;;  %945 = vmatprep.subr.mxu1 %v3033_v4 }
  0xb5   : > { %2921 = vmatprep.mubr.msk.f32.mxu1 %vm861_vm10, %v702_v49 }
  0xb7   : > { %2915 = vmatmul.mubr.msk.f32.gmra.mxu0 %vm511_vm0, %v364_v22 }
  0xb8   : > { %2919 = vmatprep.mubr.msk.f32.mxu0 %vm861_vm10, %v702_v49 }
  0xbb   : > { %v509_v26 = vpop.permute.xlu0 %508  ;;  %v504_v30 = vpop.permute.xlu1 %503 }
 0x173   : > { %v2994_v28 = vpop.f32.mrf.mxu1  ;;  %v593_v31 = vpop.f32.mrf.mxu0 }
 0x174   : > { %v676_v3 = vadd.f32 %v2994_v28, %v509_v26  ;;  %v594_v33 = vadd.f32 %v593_v31, %v504_v30 }
 0x175   : > { %v670_v32 = vpop.f32.mrf.mxu1  ;;  %v595_v39 = vpop.f32.mrf.mxu0 }
 0x176   : > { %v3269_v29 = vmul.f32 %v3266_v27, %v676_v3  ;;  %v671_v35 = vadd.f32 %v670_v32, %v504_v30  ;;  %v3282_v36 = vmul.f32 %v3279_v34, %v594_v33  ;;  %v596_v40 = vadd.f32 %v595_v39, %v504_v30 }
 0x177   : > { %v599_v43 = vpop.f32.mrf.mxu0 }
 0x178   : > { %771 = vrot.lane.b32.xlu1 %v3269_v29, %s3030_s23  ;;  %825 = vrot.lane.b32.xlu0 %v3269_v29, %s3026_s19  ;;  %v3289_v37 = vmul.f32 %v3266_v27, %v671_v35  ;;  %v3306_v42 = vmul.f32 %v3299_v41, %v596_v40  ;;  %v600_v44 = vadd.f32 %v599_v43, %v509_v26 }
 0x179   : > { %v601_v46 = vpop.f32.mrf.mxu0 }
 0x17a   : > { %v3317_v45 = vmul.f32 %v3279_v34, %v600_v44  ;;  %v602_v47 = vadd.f32 %v601_v46, %v509_v26 }
 0x17c   : > { %753 = vrot.lane.b32.xlu1 %v3269_v29, %s3032_s25  ;;  %807 = vrot.lane.b32.xlu0 %v3269_v29, %s3029_s22  ;;  %v3344_v48 = vmul.f32 %v3299_v41, %v602_v47 }
 0x180   : > { %735 = vrot.lane.b32.xlu1 %v3269_v29, %s3031_s24  ;;  %789 = vrot.lane.b32.xlu0 %v3269_v29, %s3028_s21 }
 0x184   : > { %823 = vrot.lane.b32.xlu1 %v3289_v37, %s3026_s19  ;;  %815 = vrot.lane.b32.xlu0 %v3282_v36, %s3026_s19 }
 0x188   : > { %805 = vrot.lane.b32.xlu1 %v3289_v37, %s3029_s22  ;;  %797 = vrot.lane.b32.xlu0 %v3282_v36, %s3029_s22 }
 0x18c   : > { %787 = vrot.lane.b32.xlu1 %v3289_v37, %s3028_s21  ;;  %779 = vrot.lane.b32.xlu0 %v3282_v36, %s3028_s21 }
 0x190   : > { %765 = vrot.lane.b32.xlu1 %v3306_v42, %s3030_s23  ;;  %761 = vrot.lane.b32.xlu0 %v3282_v36, %s3030_s23 }
 0x194   : > { %747 = vrot.lane.b32.xlu1 %v3306_v42, %s3032_s25  ;;  %769 = vrot.lane.b32.xlu0 %v3289_v37, %s3030_s23 }
 0x198   : > { %743 = vrot.lane.b32.xlu0 %v3282_v36, %s3032_s25  ;;  %817 = vrot.lane.b32.xlu1 %v3317_v45, %s3026_s19 }
 0x19c   : > { %751 = vrot.lane.b32.xlu0 %v3289_v37, %s3032_s25  ;;  %799 = vrot.lane.b32.xlu1 %v3317_v45, %s3029_s22 }
 0x1a0   : > { %725 = vrot.lane.b32.xlu0 %v3282_v36, %s3031_s24  ;;  %781 = vrot.lane.b32.xlu1 %v3317_v45, %s3028_s21 }
 0x1a4   : > { %819 = vrot.lane.b32.xlu0 %v3306_v42, %s3026_s19  ;;  %763 = vrot.lane.b32.xlu1 %v3317_v45, %s3030_s23 }
 0x1a8   : > { %801 = vrot.lane.b32.xlu0 %v3306_v42, %s3029_s22  ;;  %745 = vrot.lane.b32.xlu1 %v3317_v45, %s3032_s25 }
 0x1ac   : > { %783 = vrot.lane.b32.xlu0 %v3306_v42, %s3028_s21  ;;  %727 = vrot.lane.b32.xlu1 %v3317_v45, %s3031_s24 }
 0x1b0   : > { %733 = vrot.lane.b32.xlu0 %v3289_v37, %s3031_s24  ;;  %821 = vrot.lane.b32.xlu1 %v3344_v48, %s3026_s19 }
 0x1b4   : > { %707 = vrot.lane.b32.xlu0 %v3282_v36, %s3034_s28  ;;  %803 = vrot.lane.b32.xlu1 %v3344_v48, %s3029_s22 }
 0x1b8   : > { %715 = vrot.lane.b32.xlu0 %v3289_v37, %s3034_s28  ;;  %785 = vrot.lane.b32.xlu1 %v3344_v48, %s3028_s21 }
 0x1bc   : > { %843 = vrot.lane.b32.xlu0 %v3269_v29, %s3027_s20  ;;  %729 = vrot.lane.b32.xlu1 %v3306_v42, %s3031_s24 }
 0x1c0   : > { %767 = vrot.lane.b32.xlu0 %v3344_v48, %s3030_s23  ;;  %709 = vrot.lane.b32.xlu1 %v3317_v45, %s3034_s28 }
 0x1c4   : > { %749 = vrot.lane.b32.xlu0 %v3344_v48, %s3032_s25  ;;  %717 = vrot.lane.b32.xlu1 %v3269_v29, %s3034_s28 }
 0x1c8   : > { %731 = vrot.lane.b32.xlu0 %v3344_v48, %s3031_s24  ;;  %711 = vrot.lane.b32.xlu1 %v3306_v42, %s3034_s28 }
 0x1cc   : > { %713 = vrot.lane.b32.xlu0 %v3344_v48, %s3034_s28  ;;  %835 = vrot.lane.b32.xlu1 %v3317_v45, %s3027_s20 }
 0x1d0   : > { %837 = vrot.lane.b32.xlu0 %v3306_v42, %s3027_s20  ;;  %839 = vrot.lane.b32.xlu1 %v3344_v48, %s3027_s20 }
 0x1d4   : > { %833 = vrot.lane.b32.xlu0 %v3282_v36, %s3027_s20  ;;  %841 = vrot.lane.b32.xlu1 %v3289_v37, %s3027_s20 }
 0x1d8   : > { %853 = vperm.xlu0 %3015, %v705_v50   ;;  %858 = vperm.xlu1 %3016, %v706_v51  }
 0x1ea   : > { %v3397_v52 = vpop.permute.xlu1 %771  ;;  %v826_v53 = vpop.permute.xlu0 %825 }
 0x1ee   : > { %v3399_v54 = vpop.permute.xlu1 %753  ;;  %v808_v55 = vpop.permute.xlu0 %807 }
 0x1f2   : > { %v3401_v56 = vpop.permute.xlu1 %735  ;;  %v3403_v57 = vpop.permute.xlu0 %789 }
 0x1f6   : > { %v824_v58 = vpop.permute.xlu1 %823  ;;  %v816_v59 = vpop.permute.xlu0 %815 }
 0x1f7   : > { %v831_v11 = vsel %vm438_vm3, %v824_v58, %v816_v59 }
 0x1fa   : > { %v806_v60 = vpop.permute.xlu1 %805  ;;  %v798_v61 = vpop.permute.xlu0 %797 }
 0x1fb   : > { %v813_v15 = vsel %vm428_vm5, %v806_v60, %v798_v61 }
 0x1fe   : > { %v3405_v62 = vpop.permute.xlu1 %787  ;;  %v3407_v63 = vpop.permute.xlu0 %779 }
 0x1ff   : > { %v795_v19 = vsel %vm418_vm4, %v3405_v62, %v3407_v63 }
 0x202   : > { %v3409_v0 = vpop.permute.xlu1 %765  ;;  %v3411_v1 = vpop.permute.xlu0 %761 }
 0x206   : > { %v3413_v2 = vpop.permute.xlu1 %747  ;;  %v3415_v5 = vpop.permute.xlu0 %769 }
 0x20a   : > { %v3417_v6 = vpop.permute.xlu0 %743  ;;  %v818_v7 = vpop.permute.xlu1 %817 }
 0x20b   : > { %v832_v9 = vsel %vm438_vm3, %v826_v53, %v818_v7 }
 0x20c   : > { %946 = vmatpush1.msra.mxu1 %v832_v9 }
 0x20d   : > { %947 = vmatprep.subr.mxu1 %v3033_v4 }
 0x20e   : > { %v3424_v12 = vpop.permute.xlu0 %751  ;;  %948 = vmatpush1.msra.mxu1 %v831_v11  ;;  %v800_v13 = vpop.permute.xlu1 %799 }
 0x20f   : > { %949 = vmatprep.subr.mxu1 %v3033_v4  ;;  %v814_v14 = vsel %vm428_vm5, %v808_v55, %v800_v13 }
 0x210   : > { %950 = vmatpush1.msra.mxu1 %v814_v14 }
 0x211   : > { %951 = vmatprep.subr.mxu1 %v3033_v4 }
 0x212   : > { %v3432_v16 = vpop.permute.xlu0 %725  ;;  %952 = vmatpush1.msra.mxu1 %v813_v15  ;;  %v782_v17 = vpop.permute.xlu1 %781 }
 0x213   : > { %953 = vmatprep.subr.mxu1 %v3033_v4  ;;  %v796_v18 = vsel %vm418_vm4, %v3403_v57, %v782_v17 }
 0x214   : > { %954 = vmatpush1.msra.mxu1 %v796_v18 }
 0x215   : > { %955 = vmatprep.subr.mxu1 %v3033_v4 }
 0x216   : > { %v820_v20 = vpop.permute.xlu0 %819  ;;  %956 = vmatpush1.msra.mxu1 %v795_v19  ;;  %v764_v21 = vpop.permute.xlu1 %763 }
 0x217   : > { %957 = vmatprep.subr.mxu1 %v3033_v4  ;;  %v827_v30 = vsel %vm438_vm3, %v820_v20, %v824_v58  ;;  %v829_v33 = vsel %vm438_vm3, %v816_v59, %v820_v20 }
 0x218   : > { %958 = vmatpush1.msra.mxu1 %v3269_v29 }
 0x219   : > { %959 = vmatprep.subr.mxu1 %v3033_v4 }
 0x21a   : > { %v802_v22 = vpop.permute.xlu0 %801  ;;  %960 = vmatpush1.msra.mxu1 %v3289_v37  ;;  %v3447_v23 = vpop.permute.xlu1 %745 }
 0x21b   : > { %961 = vmatprep.subr.mxu1 %v3033_v4  ;;  %v809_v39 = vsel %vm428_vm5, %v802_v22, %v806_v60  ;;  %v811_v44 = vsel %vm428_vm5, %v798_v61, %v802_v22  ;;  %v778_v60 = vsel %vm408_vm6, %v3397_v52, %v764_v21  ;;  %v775_v61 = vsel %vm408_vm6, %v3411_v1, %v3409_v0 }
 0x21c   : > { %v760_v11 = vsel %vm398_vm7, %v3399_v54, %v3447_v23 }
 0x21e   : > { %v784_v24 = vpop.permute.xlu0 %783  ;;  %v3450_v25 = vpop.permute.xlu1 %727 }
 0x21f   : > { %v791_v49 = vsel %vm418_vm4, %v784_v24, %v3405_v62  ;;  %v773_v62 = vsel %vm408_vm6, %v3409_v0, %v3415_v5 }
 0x222   : > { %v3452_v26 = vpop.permute.xlu0 %733  ;;  %v822_v28 = vpop.permute.xlu1 %821 }
 0x223   : > { %v828_v3 = vsel %vm438_vm3, %v822_v28, %v826_v53  ;;  %v830_v8 = vsel %vm438_vm3, %v818_v7, %v822_v28  ;;  %v793_v53 = vsel %vm418_vm4, %v3407_v63, %v784_v24 }
 0x224   : > { %868 = vmatprep.subr.mxu0 %v828_v3 }
 0x225   : > { %869 = vmatpush1.msra.mxu0 %v830_v8 }
 0x226   : > { %v3460_v31 = vpop.permute.xlu0 %707  ;;  %870 = vmatprep.subr.mxu0 %v827_v30  ;;  %v804_v32 = vpop.permute.xlu1 %803 }
 0x227   : > { %871 = vmatpush1.msra.mxu0 %v829_v33  ;;  %v810_v35 = vsel %vm428_vm5, %v804_v32, %v808_v55  ;;  %v812_v38 = vsel %vm428_vm5, %v800_v13, %v804_v32  ;;  %v701_v32 = vld [vmem:[%s5388_s4] sm:$0xff] }
 0x228   : > { %872 = vmatprep.subr.mxu0 %v810_v35 }
 0x229   : > { %873 = vmatpush1.msra.mxu0 %v812_v38 }
 0x22a   : > { %v3470_v40 = vpop.permute.xlu0 %715  ;;  %874 = vmatprep.subr.mxu0 %v809_v39  ;;  %v786_v43 = vpop.permute.xlu1 %785  ;;  %v704_v39 = vld [vmem:[%s5388_s4 + $0x18] sm:$0xff] }
 0x22b   : > { %875 = vmatpush1.msra.mxu0 %v811_v44  ;;  %v792_v46 = vsel %vm418_vm4, %v786_v43, %v3403_v57  ;;  %v794_v47 = vsel %vm418_vm4, %v782_v17, %v786_v43  ;;  %v742_v17 = vsel %vm388_vm8, %v3401_v56, %v3450_v25 }
 0x22c   : > { %876 = vmatprep.subr.mxu0 %v792_v46 }
 0x22d   : > { %877 = vmatpush1.msra.mxu0 %v794_v47 }
 0x22e   : > { %v3482_v50 = vpop.permute.xlu0 %843  ;;  %878 = vmatprep.subr.mxu0 %v791_v49  ;;  %v730_v51 = vpop.permute.xlu1 %729 }
 0x22f   : > { %879 = vmatpush1.msra.mxu0 %v793_v53 }
 0x230   : > { %880 = vmatprep.subr.mxu0 %v3344_v48 }
 0x231   : > { %881 = vmatpush1.msra.mxu0 %v3317_v45 }
 0x232   : > { %v768_v55 = vpop.permute.xlu0 %767  ;;  %882 = vmatprep.subr.mxu0 %v3306_v42  ;;  %v710_v57 = vpop.permute.xlu1 %709 }
 0x233   : > { %883 = vmatpush1.msra.mxu0 %v3282_v36  ;;  %v776_v58 = vsel %vm408_vm6, %v764_v21, %v768_v55  ;;  %v774_v59 = vsel %vm408_vm6, %v768_v55, %v3397_v52  ;;  %v777_v52 = vsel %vm408_vm6, %v3415_v5, %v3411_v1  ;;  %v757_v1 = vsel %vm398_vm7, %v3417_v6, %v3413_v2 }
 0x234   : > { %884 = vmatprep.subr.mxu0 %v776_v58  ;;  %962 = vmatpush1.msra.mxu1 %v774_v59  ;;  %v755_v5 = vsel %vm398_vm7, %v3413_v2, %v3424_v12 }
 0x235   : > { %885 = vmatpush1.msra.mxu0 %v778_v60  ;;  %963 = vmatprep.subr.mxu1 %v3033_v4 }
 0x236   : > { %v750_v63 = vpop.permute.xlu0 %749  ;;  %886 = vmatprep.subr.mxu0 %v775_v61  ;;  %964 = vmatpush1.msra.mxu1 %v773_v62  ;;  %v718_v7 = vpop.permute.xlu1 %717 }
 0x237   : > { %887 = vmatpush1.msra.mxu0 %v777_v52  ;;  %965 = vmatprep.subr.mxu1 %v3033_v4  ;;  %v758_v9 = vsel %vm398_vm7, %v3447_v23, %v750_v63  ;;  %v756_v0 = vsel %vm398_vm7, %v750_v63, %v3399_v54  ;;  %v759_v54 = vsel %vm398_vm7, %v3424_v12, %v3417_v6 }
 0x238   : > { %888 = vmatprep.subr.mxu0 %v758_v9  ;;  %966 = vmatpush1.msra.mxu1 %v756_v0  ;;  %v739_v6 = vsel %vm388_vm8, %v3432_v16, %v730_v51  ;;  %v737_v12 = vsel %vm388_vm8, %v730_v51, %v3452_v26  ;;  %v724_v22 = vsel %vm378_vm9, %v718_v7, %v710_v57 }
 0x239   : > { %889 = vmatpush1.msra.mxu0 %v760_v11  ;;  %967 = vmatprep.subr.mxu1 %v3033_v4 }
 0x23a   : > { %v732_v13 = vpop.permute.xlu0 %731  ;;  %890 = vmatprep.subr.mxu0 %v757_v1  ;;  %968 = vmatpush1.msra.mxu1 %v755_v5  ;;  %v712_v14 = vpop.permute.xlu1 %711 }
 0x23b   : > { %891 = vmatpush1.msra.mxu0 %v759_v54  ;;  %969 = vmatprep.subr.mxu1 %v3033_v4  ;;  %v740_v15 = vsel %vm388_vm8, %v3450_v25, %v732_v13  ;;  %v738_v2 = vsel %vm388_vm8, %v732_v13, %v3401_v56  ;;  %v741_v56 = vsel %vm388_vm8, %v3452_v26, %v3432_v16 }
 0x23c   : > { %892 = vmatprep.subr.mxu0 %v740_v15  ;;  %970 = vmatpush1.msra.mxu1 %v738_v2  ;;  %v721_v16 = vsel %vm378_vm9, %v3460_v31, %v712_v14  ;;  %v719_v23 = vsel %vm378_vm9, %v712_v14, %v3470_v40  ;;  %v723_v26 = vsel %vm378_vm9, %v3470_v40, %v3460_v31  ;;  %v703_v40 = vld [vmem:[%s5388_s4 + $0x10] sm:$0xff] }
 0x23d   : > { %893 = vmatpush1.msra.mxu0 %v742_v17  ;;  %971 = vmatprep.subr.mxu1 %v3033_v4  ;;  %v2924_v17 = vld [vmem:[%s5388_s4 + $0x28] sm:$0xff] }
 0x23e   : > { %v714_v18 = vpop.permute.xlu0 %713  ;;  %894 = vmatprep.subr.mxu0 %v739_v6  ;;  %972 = vmatpush1.msra.mxu1 %v737_v12  ;;  %v836_v19 = vpop.permute.xlu1 %835  ;;  %v2927_v6 = vld [vmem:[%s5389_s5 + $0x10] sm:$0xff]  ;;  %v2928_v12 = vld [vmem:[%s5389_s5 + $0x18] sm:$0xff] }
 0x23f   : > { %895 = vmatpush1.msra.mxu0 %v741_v56  ;;  %973 = vmatprep.subr.mxu1 %v3033_v4  ;;  %v722_v20 = vsel %vm378_vm9, %v710_v57, %v714_v18  ;;  %v720_v21 = vsel %vm378_vm9, %v714_v18, %v718_v7  ;;  %v850_v3 = vsel %vm448_vm1, %v3482_v50, %v836_v19 }
 0x240   : > { %896 = vmatprep.subr.mxu0 %v722_v20  ;;  %974 = vmatpush1.msra.mxu1 %v720_v21 }
 0x241   : > { %897 = vmatpush1.msra.mxu0 %v724_v22  ;;  %975 = vmatprep.subr.mxu1 %v3033_v4 }
 0x242   : > { %v838_v24 = vpop.permute.xlu0 %837  ;;  %898 = vmatprep.subr.mxu0 %v721_v16  ;;  %976 = vmatpush1.msra.mxu1 %v719_v23  ;;  %v840_v25 = vpop.permute.xlu1 %839 }
 0x243   : > { %899 = vmatpush1.msra.mxu0 %v723_v26  ;;  %1005 = vmatprep.subr.mxu1 %v3033_v4  ;;  %v846_v28 = vsel %vm448_vm1, %v840_v25, %v3482_v50  ;;  %v848_v8 = vsel %vm448_vm1, %v836_v19, %v840_v25 }
 0x244   : > { %928 = vmatprep.subr.mxu0 %v846_v28  ;;  %1006 = vmatpush2.msra.mxu1 %v850_v3 }
 0x245   : > { %929 = vmatpush2.msra.mxu0 %v848_v8  ;;  %1007 = vmatprep.subr.mxu1 %v3033_v4 }
 0x246   : > { %v834_v30 = vpop.permute.xlu0 %833  ;;  %v842_v31 = vpop.permute.xlu1 %841 }
 0x247   : > { %v845_v33 = vsel %vm448_vm1, %v838_v24, %v842_v31  ;;  %v849_v35 = vsel %vm448_vm1, %v842_v31, %v834_v30  ;;  %v847_v38 = vsel %vm448_vm1, %v834_v30, %v838_v24 }
 0x248   : > { %930 = vmatprep.subr.mxu0 %v845_v33  ;;  %1008 = vmatpush2.msra.mxu1 %v849_v35 }
 0x249   : > { %931 = vmatpush2.msra.mxu0 %v847_v38  ;;  %1010 = vmatmul.mubr.f32.vlgmr.msra.gmra.mxu1 %v701_v32 }
 0x24a   : > { %933 = vmatmul.mubr.f32.vlgmr.msra.gmra.mxu0 %v701_v32  ;;  %2922 = vmatprep.mubr.msk.f32.mxu1 %vm861_vm10, %v704_v39 }
 0x24b   : > { %2920 = vmatprep.mubr.msk.f32.mxu0 %vm861_vm10, %v704_v39  ;;  %1277 = vmatprep.subr.mxu1 %v3033_v4 }
 0x24d   : > { %1015 = vmatmul.mubr.f32.gmra.mxu1 %v703_v40 }
 0x24e   : > { %939 = vmatmul.mubr.f32.gmra.mxu0 %v703_v40  ;;  %2931 = vmatprep.mubr.msk.f32.mxu1 %vm861_vm10, %v2924_v17 }
 0x24f   : > { %2929 = vmatprep.mubr.msk.f32.mxu0 %vm861_vm10, %v2924_v17 }
 0x253   : > { %v854_v43 = vpop.permute.xlu0 %853  ;;  %v859_v58 = vpop.permute.xlu1 %858 }
 0x309   : > { %v1011_v44 = vpop.f32.mrf.mxu1 }
 0x30a   : > { %v1012_v46 = vadd.f32 %v1011_v44, %v854_v43  ;;  %v934_v47 = vpop.f32.mrf.mxu0 }
 0x30b   : > { %v1013_v49 = vpop.f32.mrf.mxu1  ;;  %v935_v55 = vadd.f32 %v934_v47, %v854_v43 }
 0x30c   : > { %v1022_v50 = vmax.f32 %v1012_v46, 0.0  ;;  %v936_v7 = vpop.f32.mrf.mxu0 }
 0x30d   : > { %v1016_v51 = vpop.f32.mrf.mxu1  ;;  %v1020_v59 = vmax.f32 %v935_v55, 0.0  ;;  %v937_v52 = vadd.f32 %v936_v7, %v854_v43 }
 0x30e   : > { %v3605_v53 = vmul.f32 %v1022_v50, %v3266_v27  ;;  %v1017_v60 = vadd.f32 %v1016_v51, %v859_v58  ;;  %v940_v0 = vpop.f32.mrf.mxu0 }
 0x30f   : > { %v1018_v57 = vpop.f32.mrf.mxu1  ;;  %v3616_v61 = vmul.f32 %v1020_v59, %v3279_v34  ;;  %v1021_v9 = vmax.f32 %v937_v52, 0.0  ;;  %v941_v1 = vadd.f32 %v940_v0, %v859_v58 }
 0x310   : > { %1102 = vrot.lane.b32.xlu0 %v3605_v53, %s3030_s23  ;;  %1156 = vrot.lane.b32.xlu1 %v3605_v53, %s3026_s19  ;;  %v1025_v62 = vmax.f32 %v1017_v60, 0.0  ;;  %v942_v14 = vpop.f32.mrf.mxu0 }
 0x311   : > { %v3638_v11 = vmul.f32 %v1021_v9, %v3299_v41  ;;  %v1023_v5 = vmax.f32 %v941_v1, 0.0  ;;  %v943_v54 = vadd.f32 %v942_v14, %v859_v58 }
 0x312   : > { %v3623_v63 = vmul.f32 %v1025_v62, %v3266_v27 }
 0x313   : > { %v3649_v13 = vmul.f32 %v1023_v5, %v3279_v34  ;;  %v1024_v15 = vmax.f32 %v943_v54, 0.0 }
 0x314   : > { %1084 = vrot.lane.b32.xlu0 %v3605_v53, %s3032_s25  ;;  %1138 = vrot.lane.b32.xlu1 %v3605_v53, %s3029_s22 }
 0x315   : > { %v3676_v2 = vmul.f32 %v1024_v15, %v3299_v41 }
 0x318   : > { %1120 = vrot.lane.b32.xlu1 %v3605_v53, %s3028_s21  ;;  %1148 = vrot.lane.b32.xlu0 %v3616_v61, %s3026_s19 }
 0x31c   : > { %1130 = vrot.lane.b32.xlu0 %v3616_v61, %s3029_s22  ;;  %1104 = vrot.lane.b32.xlu1 %v3623_v63, %s3030_s23 }
 0x320   : > { %1112 = vrot.lane.b32.xlu0 %v3616_v61, %s3028_s21  ;;  %1086 = vrot.lane.b32.xlu1 %v3623_v63, %s3032_s25 }
 0x324   : > { %1094 = vrot.lane.b32.xlu0 %v3616_v61, %s3030_s23  ;;  %1068 = vrot.lane.b32.xlu1 %v3623_v63, %s3031_s24 }
 0x328   : > { %1076 = vrot.lane.b32.xlu0 %v3616_v61, %s3032_s25  ;;  %1098 = vrot.lane.b32.xlu1 %v3638_v11, %s3030_s23 }
 0x32c   : > { %1058 = vrot.lane.b32.xlu0 %v3616_v61, %s3031_s24  ;;  %1080 = vrot.lane.b32.xlu1 %v3638_v11, %s3032_s25 }
 0x330   : > { %1158 = vrot.lane.b32.xlu0 %v3623_v63, %s3026_s19  ;;  %1150 = vrot.lane.b32.xlu1 %v3649_v13, %s3026_s19 }
 0x334   : > { %1140 = vrot.lane.b32.xlu0 %v3623_v63, %s3029_s22  ;;  %1132 = vrot.lane.b32.xlu1 %v3649_v13, %s3029_s22 }
 0x338   : > { %1122 = vrot.lane.b32.xlu0 %v3623_v63, %s3028_s21  ;;  %1114 = vrot.lane.b32.xlu1 %v3649_v13, %s3028_s21 }
 0x33c   : > { %1152 = vrot.lane.b32.xlu0 %v3638_v11, %s3026_s19  ;;  %1096 = vrot.lane.b32.xlu1 %v3649_v13, %s3030_s23 }
 0x340   : > { %1134 = vrot.lane.b32.xlu0 %v3638_v11, %s3029_s22  ;;  %1078 = vrot.lane.b32.xlu1 %v3649_v13, %s3032_s25 }
 0x344   : > { %1116 = vrot.lane.b32.xlu0 %v3638_v11, %s3028_s21  ;;  %1060 = vrot.lane.b32.xlu1 %v3649_v13, %s3031_s24 }
 0x348   : > { %1066 = vrot.lane.b32.xlu0 %v3605_v53, %s3031_s24  ;;  %1154 = vrot.lane.b32.xlu1 %v3676_v2, %s3026_s19 }
 0x34c   : > { %1040 = vrot.lane.b32.xlu0 %v3616_v61, %s3034_s28  ;;  %1136 = vrot.lane.b32.xlu1 %v3676_v2, %s3029_s22 }
 0x350   : > { %1048 = vrot.lane.b32.xlu0 %v3605_v53, %s3034_s28  ;;  %1118 = vrot.lane.b32.xlu1 %v3676_v2, %s3028_s21 }
 0x354   : > { %1176 = vrot.lane.b32.xlu0 %v3623_v63, %s3027_s20  ;;  %1062 = vrot.lane.b32.xlu1 %v3638_v11, %s3031_s24 }
 0x358   : > { %1100 = vrot.lane.b32.xlu0 %v3676_v2, %s3030_s23  ;;  %1042 = vrot.lane.b32.xlu1 %v3649_v13, %s3034_s28 }
 0x35c   : > { %1082 = vrot.lane.b32.xlu0 %v3676_v2, %s3032_s25  ;;  %1050 = vrot.lane.b32.xlu1 %v3623_v63, %s3034_s28 }
 0x360   : > { %1064 = vrot.lane.b32.xlu0 %v3676_v2, %s3031_s24  ;;  %1044 = vrot.lane.b32.xlu1 %v3638_v11, %s3034_s28 }
 0x364   : > { %1046 = vrot.lane.b32.xlu0 %v3676_v2, %s3034_s28  ;;  %1168 = vrot.lane.b32.xlu1 %v3649_v13, %s3027_s20 }
 0x368   : > { %1170 = vrot.lane.b32.xlu0 %v3638_v11, %s3027_s20  ;;  %1172 = vrot.lane.b32.xlu1 %v3676_v2, %s3027_s20 }
 0x36c   : > { %1166 = vrot.lane.b32.xlu0 %v3616_v61, %s3027_s20  ;;  %1174 = vrot.lane.b32.xlu1 %v3605_v53, %s3027_s20 }
 0x370   : > { %1186 = vperm.xlu0 %3015, %v2927_v6   ;;  %1191 = vperm.xlu1 %3016, %v2928_v12  }
 0x382   : > { %v3729_v18 = vpop.permute.xlu0 %1102  ;;  %v1157_v19 = vpop.permute.xlu1 %1156 }
 0x386   : > { %v3731_v56 = vpop.permute.xlu0 %1084  ;;  %v3733_v20 = vpop.permute.xlu1 %1138 }
 0x38a   : > { %v1149_v21 = vpop.permute.xlu0 %1148  ;;  %v3735_v22 = vpop.permute.xlu1 %1120 }
 0x38b   : > { %v1164_v38 = vsel %vm438_vm3, %v1157_v19, %v1149_v21 }
 0x38e   : > { %v3737_v16 = vpop.permute.xlu0 %1130  ;;  %v3739_v23 = vpop.permute.xlu1 %1104 }
 0x38f   : > { %v1146_v44 = vsel %vm428_vm5, %v3733_v20, %v3737_v16 }
 0x392   : > { %v3741_v24 = vpop.permute.xlu0 %1112  ;;  %v3743_v25 = vpop.permute.xlu1 %1086 }
 0x393   : > { %v1128_v50 = vsel %vm418_vm4, %v3735_v22, %v3741_v24 }
 0x396   : > { %v3745_v26 = vpop.permute.xlu0 %1094  ;;  %v3747_v28 = vpop.permute.xlu1 %1068 }
 0x39a   : > { %v3749_v3 = vpop.permute.xlu0 %1076  ;;  %v3751_v8 = vpop.permute.xlu1 %1098 }
 0x39e   : > { %v3753_v30 = vpop.permute.xlu0 %1058  ;;  %v3755_v31 = vpop.permute.xlu1 %1080 }
 0x3a2   : > { %v1159_v32 = vpop.permute.xlu0 %1158  ;;  %v1151_v33 = vpop.permute.xlu1 %1150 }
 0x3a3   : > { %v1165_v35 = vsel %vm438_vm3, %v1159_v32, %v1151_v33 }
 0x3a4   : > { %1278 = vmatpush1.msra.mxu1 %v1165_v35 }
 0x3a5   : > { %1279 = vmatprep.subr.mxu1 %v3033_v4 }
 0x3a6   : > { %v1141_v39 = vpop.permute.xlu0 %1140  ;;  %1280 = vmatpush1.msra.mxu1 %v1164_v38  ;;  %v1133_v40 = vpop.permute.xlu1 %1132 }
 0x3a7   : > { %1281 = vmatprep.subr.mxu1 %v3033_v4  ;;  %v1147_v43 = vsel %vm428_vm5, %v1141_v39, %v1133_v40 }
 0x3a8   : > { %1282 = vmatpush1.msra.mxu1 %v1147_v43 }
 0x3a9   : > { %1283 = vmatprep.subr.mxu1 %v3033_v4 }
 0x3aa   : > { %v1123_v46 = vpop.permute.xlu0 %1122  ;;  %1284 = vmatpush1.msra.mxu1 %v1146_v44  ;;  %v1115_v47 = vpop.permute.xlu1 %1114 }
 0x3ab   : > { %1285 = vmatprep.subr.mxu1 %v3033_v4  ;;  %v1129_v49 = vsel %vm418_vm4, %v1123_v46, %v1115_v47 }
 0x3ac   : > { %1286 = vmatpush1.msra.mxu1 %v1129_v49 }
 0x3ad   : > { %1287 = vmatprep.subr.mxu1 %v3033_v4 }
 0x3ae   : > { %v1153_v51 = vpop.permute.xlu0 %1152  ;;  %1288 = vmatpush1.msra.mxu1 %v1128_v50  ;;  %v1097_v55 = vpop.permute.xlu1 %1096 }
 0x3af   : > { %1289 = vmatprep.subr.mxu1 %v3033_v4  ;;  %v1162_v1 = vsel %vm438_vm3, %v1149_v21, %v1153_v51 }
 0x3b0   : > { %1290 = vmatpush1.msra.mxu1 %v3623_v63 }
 0x3b1   : > { %1291 = vmatprep.subr.mxu1 %v3033_v4 }
 0x3b2   : > { %v1135_v57 = vpop.permute.xlu0 %1134  ;;  %1292 = vmatpush1.msra.mxu1 %v3605_v53  ;;  %v3782_v58 = vpop.permute.xlu1 %1078  ;;  %v1160_v53 = vsel %vm438_vm3, %v1153_v51, %v1157_v19 }
 0x3b3   : > { %1293 = vmatprep.subr.mxu1 %v3033_v4  ;;  %v1142_v54 = vsel %vm428_vm5, %v1135_v57, %v3733_v20  ;;  %v1144_v6 = vsel %vm428_vm5, %v3737_v16, %v1135_v57 }
 0x3b6   : > { %v1117_v59 = vpop.permute.xlu0 %1116  ;;  %v3785_v60 = vpop.permute.xlu1 %1060 }
 0x3b7   : > { %v1124_v20 = vsel %vm418_vm4, %v1117_v59, %v3735_v22  ;;  %v1126_v16 = vsel %vm418_vm4, %v3741_v24, %v1117_v59 }
 0x3ba   : > { %v3787_v62 = vpop.permute.xlu0 %1066  ;;  %v1155_v7 = vpop.permute.xlu1 %1154 }
 0x3bb   : > { %v1161_v52 = vsel %vm438_vm3, %v1155_v7, %v1159_v32  ;;  %v1163_v63 = vsel %vm438_vm3, %v1151_v33, %v1155_v7 }
 0x3bc   : > { %1200 = vmatprep.subr.mxu0 %v1161_v52 }
 0x3bd   : > { %1201 = vmatpush1.msra.mxu0 %v1163_v63 }
 0x3be   : > { %v3795_v9 = vpop.permute.xlu0 %1040  ;;  %1202 = vmatprep.subr.mxu0 %v1160_v53  ;;  %v1137_v0 = vpop.permute.xlu1 %1136 }
 0x3bf   : > { %1203 = vmatpush1.msra.mxu0 %v1162_v1  ;;  %v1143_v5 = vsel %vm428_vm5, %v1137_v0, %v1141_v39  ;;  %v1145_v14 = vsel %vm428_vm5, %v1133_v40, %v1137_v0  ;;  %v1093_v40 = vsel %vm398_vm7, %v3743_v25, %v3782_v58  ;;  %v2923_v0 = vld [vmem:[%s5388_s4 + $0x20] sm:$0xff] }
 0x3c0   : > { %1204 = vmatprep.subr.mxu0 %v1143_v5 }
 0x3c1   : > { %1205 = vmatpush1.msra.mxu0 %v1145_v14 }
 0x3c2   : > { %v3806_v15 = vpop.permute.xlu0 %1048  ;;  %1206 = vmatprep.subr.mxu0 %v1142_v54  ;;  %v1119_v17 = vpop.permute.xlu1 %1118  ;;  %v2926_v54 = vld [vmem:[%s5388_s4 + $0x38] sm:$0xff] }
 0x3c3   : > { %1207 = vmatpush1.msra.mxu0 %v1144_v6  ;;  %v1125_v12 = vsel %vm418_vm4, %v1119_v17, %v1123_v46  ;;  %v1127_v19 = vsel %vm418_vm4, %v1115_v47, %v1119_v17  ;;  %v1075_v47 = vsel %vm388_vm8, %v3747_v28, %v3785_v60 }
 0x3c4   : > { %1208 = vmatprep.subr.mxu0 %v1125_v12 }
 0x3c5   : > { %1209 = vmatpush1.msra.mxu0 %v1127_v19 }
 0x3c6   : > { %v3818_v21 = vpop.permute.xlu0 %1176  ;;  %1210 = vmatprep.subr.mxu0 %v1124_v20  ;;  %v1063_v32 = vpop.permute.xlu1 %1062 }
 0x3c7   : > { %1211 = vmatpush1.msra.mxu0 %v1126_v16 }
 0x3c8   : > { %1212 = vmatprep.subr.mxu0 %v3676_v2  ;;  %v1111_v2 = vsel %vm408_vm6, %v3739_v23, %v1097_v55 }
 0x3c9   : > { %1213 = vmatpush1.msra.mxu0 %v3649_v13 }
 0x3ca   : > { %v1101_v33 = vpop.permute.xlu0 %1100  ;;  %1214 = vmatprep.subr.mxu0 %v3638_v11  ;;  %v1043_v35 = vpop.permute.xlu1 %1042  ;;  %v1106_v11 = vsel %vm408_vm6, %v3751_v8, %v3729_v18 }
 0x3cb   : > { %1215 = vmatpush1.msra.mxu0 %v3616_v61  ;;  %v1109_v22 = vsel %vm408_vm6, %v1097_v55, %v1101_v33  ;;  %v1107_v38 = vsel %vm408_vm6, %v1101_v33, %v3739_v23  ;;  %v1108_v61 = vsel %vm408_vm6, %v3745_v26, %v3751_v8  ;;  %v1110_v23 = vsel %vm408_vm6, %v3729_v18, %v3745_v26 }
 0x3cc   : > { %1216 = vmatprep.subr.mxu0 %v1109_v22  ;;  %1294 = vmatpush1.msra.mxu1 %v1107_v38  ;;  %v1090_v18 = vsel %vm398_vm7, %v3749_v3, %v3755_v31  ;;  %v1088_v26 = vsel %vm398_vm7, %v3755_v31, %v3731_v56 }
 0x3cd   : > { %1217 = vmatpush1.msra.mxu0 %v1111_v2  ;;  %1295 = vmatprep.subr.mxu1 %v3033_v4 }
 0x3ce   : > { %v1083_v13 = vpop.permute.xlu0 %1082  ;;  %1218 = vmatprep.subr.mxu0 %v1108_v61  ;;  %1296 = vmatpush1.msra.mxu1 %v1106_v11  ;;  %v1051_v24 = vpop.permute.xlu1 %1050 }
 0x3cf   : > { %1219 = vmatpush1.msra.mxu0 %v1110_v23  ;;  %1297 = vmatprep.subr.mxu1 %v3033_v4  ;;  %v1091_v39 = vsel %vm398_vm7, %v3782_v58, %v1083_v13  ;;  %v1089_v8 = vsel %vm398_vm7, %v1083_v13, %v3743_v25  ;;  %v1092_v25 = vsel %vm398_vm7, %v3731_v56, %v3749_v3 }
 0x3d0   : > { %1220 = vmatprep.subr.mxu0 %v1091_v39  ;;  %1298 = vmatpush1.msra.mxu1 %v1089_v8  ;;  %v1072_v56 = vsel %vm388_vm8, %v3753_v30, %v1063_v32  ;;  %v1070_v3 = vsel %vm388_vm8, %v1063_v32, %v3787_v62  ;;  %v1057_v57 = vsel %vm378_vm9, %v1051_v24, %v1043_v35 }
 0x3d1   : > { %1221 = vmatpush1.msra.mxu0 %v1093_v40  ;;  %1299 = vmatprep.subr.mxu1 %v3033_v4 }
 0x3d2   : > { %v1065_v43 = vpop.permute.xlu0 %1064  ;;  %1222 = vmatprep.subr.mxu0 %v1090_v18  ;;  %1300 = vmatpush1.msra.mxu1 %v1088_v26  ;;  %v1045_v44 = vpop.permute.xlu1 %1044 }
 0x3d3   : > { %1223 = vmatpush1.msra.mxu0 %v1092_v25  ;;  %1301 = vmatprep.subr.mxu1 %v3033_v4  ;;  %v1073_v46 = vsel %vm388_vm8, %v3785_v60, %v1065_v43  ;;  %v1071_v31 = vsel %vm388_vm8, %v1065_v43, %v3747_v28  ;;  %v1074_v28 = vsel %vm388_vm8, %v3787_v62, %v3753_v30 }
 0x3d4   : > { %1224 = vmatprep.subr.mxu0 %v1073_v46  ;;  %1302 = vmatpush1.msra.mxu1 %v1071_v31  ;;  %v1054_v30 = vsel %vm378_vm9, %v3795_v9, %v1045_v44  ;;  %v1052_v58 = vsel %vm378_vm9, %v1045_v44, %v3806_v15  ;;  %v1056_v62 = vsel %vm378_vm9, %v3806_v15, %v3795_v9  ;;  %v2925_v15 = vld [vmem:[%s5388_s4 + $0x30] sm:$0xff] }
 0x3d5   : > { %1225 = vmatpush1.msra.mxu0 %v1075_v47  ;;  %1303 = vmatprep.subr.mxu1 %v3033_v4 }
 0x3d6   : > { %v1047_v49 = vpop.permute.xlu0 %1046  ;;  %1226 = vmatprep.subr.mxu0 %v1072_v56  ;;  %1304 = vmatpush1.msra.mxu1 %v1070_v3  ;;  %v1169_v50 = vpop.permute.xlu1 %1168 }
 0x3d7   : > { %1227 = vmatpush1.msra.mxu0 %v1074_v28  ;;  %1305 = vmatprep.subr.mxu1 %v3033_v4  ;;  %v1055_v51 = vsel %vm378_vm9, %v1043_v35, %v1047_v49  ;;  %v1053_v55 = vsel %vm378_vm9, %v1047_v49, %v1051_v24  ;;  %v1183_v52 = vsel %vm448_vm1, %v3818_v21, %v1169_v50 }
 0x3d8   : > { %1228 = vmatprep.subr.mxu0 %v1055_v51  ;;  %1306 = vmatpush1.msra.mxu1 %v1053_v55  ;;  %v2934_v51 = vld [vmem:[%s5388_s4 + $0x48] sm:$0xff]  ;;  %v2937_v55 = vld [vmem:[%s5389_s5 + $0x20] sm:$0xff] }
 0x3d9   : > { %1229 = vmatpush1.msra.mxu0 %v1057_v57  ;;  %1307 = vmatprep.subr.mxu1 %v3033_v4  ;;  %v2938_v57 = vld [vmem:[%s5389_s5 + $0x28] sm:$0xff] }
 0x3da   : > { %v1171_v59 = vpop.permute.xlu0 %1170  ;;  %1230 = vmatprep.subr.mxu0 %v1054_v30  ;;  %1308 = vmatpush1.msra.mxu1 %v1052_v58  ;;  %v1173_v60 = vpop.permute.xlu1 %1172 }
 0x3db   : > { %1231 = vmatpush1.msra.mxu0 %v1056_v62  ;;  %1337 = vmatprep.subr.mxu1 %v3033_v4  ;;  %v1179_v7 = vsel %vm448_vm1, %v1173_v60, %v3818_v21  ;;  %v1181_v63 = vsel %vm448_vm1, %v1169_v50, %v1173_v60 }
 0x3dc   : > { %1260 = vmatprep.subr.mxu0 %v1179_v7  ;;  %1338 = vmatpush2.msra.mxu1 %v1183_v52 }
 0x3dd   : > { %1261 = vmatpush2.msra.mxu0 %v1181_v63  ;;  %1339 = vmatprep.subr.mxu1 %v3033_v4 }
 0x3de   : > { %v1167_v53 = vpop.permute.xlu0 %1166  ;;  %v1175_v9 = vpop.permute.xlu1 %1174 }
 0x3df   : > { %v1178_v1 = vsel %vm448_vm1, %v1171_v59, %v1175_v9  ;;  %v1182_v5 = vsel %vm448_vm1, %v1175_v9, %v1167_v53  ;;  %v1180_v14 = vsel %vm448_vm1, %v1167_v53, %v1171_v59 }
 0x3e0   : > { %1262 = vmatprep.subr.mxu0 %v1178_v1  ;;  %1340 = vmatpush2.msra.mxu1 %v1182_v5 }
 0x3e1   : > { %1263 = vmatpush2.msra.mxu0 %v1180_v14  ;;  %1342 = vmatmul.mubr.f32.vlgmr.msra.gmra.mxu1 %v2923_v0 }
 0x3e2   : > { %1265 = vmatmul.mubr.f32.vlgmr.msra.gmra.mxu0 %v2923_v0  ;;  %2932 = vmatprep.mubr.msk.f32.mxu1 %vm861_vm10, %v2926_v54 }
 0x3e3   : > { %2930 = vmatprep.mubr.msk.f32.mxu0 %vm861_vm10, %v2926_v54  ;;  %1615 = vmatprep.subr.mxu1 %v3033_v4 }
 0x3e5   : > { %1347 = vmatmul.mubr.f32.gmra.mxu1 %v2925_v15 }
 0x3e6   : > { %1271 = vmatmul.mubr.f32.gmra.mxu0 %v2925_v15  ;;  %2941 = vmatprep.mubr.msk.f32.mxu1 %vm861_vm10, %v2934_v51 }
 0x3e7   : > { %2939 = vmatprep.mubr.msk.f32.mxu0 %vm861_vm10, %v2934_v51 }
 0x3eb   : > { %v1187_v17 = vpop.permute.xlu0 %1186  ;;  %v1192_v35 = vpop.permute.xlu1 %1191 }
 0x4a1   : > { %v1343_v6 = vpop.f32.mrf.mxu1 }
 0x4a2   : > { %v1344_v12 = vadd.f32 %v1343_v6, %v1187_v17  ;;  %v1266_v19 = vpop.f32.mrf.mxu0 }
 0x4a3   : > { %v1345_v20 = vpop.f32.mrf.mxu1  ;;  %v1267_v32 = vadd.f32 %v1266_v19, %v1187_v17 }
 0x4a4   : > { %v1354_v21 = vmul.f32 %v1344_v12, %v3266_v27  ;;  %v1268_v39 = vpop.f32.mrf.mxu0 }
 0x4a5   : > { %v1348_v16 = vpop.f32.mrf.mxu1  ;;  %v1352_v2 = vmul.f32 %v1267_v32, %v3279_v34  ;;  %v1269_v8 = vadd.f32 %v1268_v39, %v1187_v17 }
 0x4a6   : > { %v1360_v33 = vmul.f32 0.15, %v1354_v21  ;;  %v1349_v61 = vadd.f32 %v1348_v16, %v1192_v35  ;;  %v1272_v26 = vpop.f32.mrf.mxu0 }
 0x4a7   : > { %v1350_v22 = vpop.f32.mrf.mxu1  ;;  %v1358_v11 = vmul.f32 0.15, %v1352_v2  ;;  %v1353_v18 = vmul.f32 %v1269_v8, %v3299_v41  ;;  %v1273_v44 = vadd.f32 %v1272_v26, %v1192_v35 }
 0x4a8   : > { %v3942_v38 = vadd.f32 %v1360_v33, %v3289_v37  ;;  %v1357_v13 = vmul.f32 %v1349_v61, %v3266_v27  ;;  %v1274_v56 = vpop.f32.mrf.mxu0 }
 0x4a9   : > { %v3955_v24 = vadd.f32 %v1358_v11, %v3282_v36  ;;  %v1359_v43 = vmul.f32 0.15, %v1353_v18  ;;  %v1355_v46 = vmul.f32 %v1273_v44, %v3279_v34  ;;  %v1275_v3 = vadd.f32 %v1274_v56, %v1192_v35 }
 0x4aa   : > { %1440 = vrot.lane.b32.xlu0 %v3942_v38, %s3030_s23  ;;  %1494 = vrot.lane.b32.xlu1 %v3942_v38, %s3026_s19  ;;  %v1363_v23 = vmul.f32 0.15, %v1357_v13 }
 0x4ab   : > { %v3978_v25 = vadd.f32 %v1359_v43, %v3306_v42  ;;  %v1361_v31 = vmul.f32 0.15, %v1355_v46  ;;  %v1356_v49 = vmul.f32 %v1275_v3, %v3299_v41 }
 0x4ac   : > { %v3962_v40 = vadd.f32 %v1363_v23, %v3269_v29 }
 0x4ad   : > { %v3990_v47 = vadd.f32 %v1361_v31, %v3317_v45  ;;  %v1362_v50 = vmul.f32 0.15, %v1356_v49 }
 0x4ae   : > { %1422 = vrot.lane.b32.xlu0 %v3942_v38, %s3032_s25  ;;  %1476 = vrot.lane.b32.xlu1 %v3942_v38, %s3029_s22 }
 0x4af   : > { %v4018_v28 = vadd.f32 %v1362_v50, %v3344_v48 }
 0x4b2   : > { %1458 = vrot.lane.b32.xlu1 %v3942_v38, %s3028_s21  ;;  %1486 = vrot.lane.b32.xlu0 %v3955_v24, %s3026_s19 }
 0x4b6   : > { %1468 = vrot.lane.b32.xlu0 %v3955_v24, %s3029_s22  ;;  %1442 = vrot.lane.b32.xlu1 %v3962_v40, %s3030_s23 }
 0x4ba   : > { %1450 = vrot.lane.b32.xlu0 %v3955_v24, %s3028_s21  ;;  %1424 = vrot.lane.b32.xlu1 %v3962_v40, %s3032_s25 }
 0x4be   : > { %1432 = vrot.lane.b32.xlu0 %v3955_v24, %s3030_s23  ;;  %1406 = vrot.lane.b32.xlu1 %v3962_v40, %s3031_s24 }
 0x4c2   : > { %1414 = vrot.lane.b32.xlu0 %v3955_v24, %s3032_s25  ;;  %1436 = vrot.lane.b32.xlu1 %v3978_v25, %s3030_s23 }
 0x4c6   : > { %1396 = vrot.lane.b32.xlu0 %v3955_v24, %s3031_s24  ;;  %1418 = vrot.lane.b32.xlu1 %v3978_v25, %s3032_s25 }
 0x4ca   : > { %1496 = vrot.lane.b32.xlu0 %v3962_v40, %s3026_s19  ;;  %1488 = vrot.lane.b32.xlu1 %v3990_v47, %s3026_s19 }
 0x4ce   : > { %1478 = vrot.lane.b32.xlu0 %v3962_v40, %s3029_s22  ;;  %1470 = vrot.lane.b32.xlu1 %v3990_v47, %s3029_s22 }
 0x4d2   : > { %1460 = vrot.lane.b32.xlu0 %v3962_v40, %s3028_s21  ;;  %1452 = vrot.lane.b32.xlu1 %v3990_v47, %s3028_s21 }
 0x4d6   : > { %1490 = vrot.lane.b32.xlu0 %v3978_v25, %s3026_s19  ;;  %1434 = vrot.lane.b32.xlu1 %v3990_v47, %s3030_s23 }
 0x4da   : > { %1472 = vrot.lane.b32.xlu0 %v3978_v25, %s3029_s22  ;;  %1416 = vrot.lane.b32.xlu1 %v3990_v47, %s3032_s25 }
 0x4de   : > { %1454 = vrot.lane.b32.xlu0 %v3978_v25, %s3028_s21  ;;  %1398 = vrot.lane.b32.xlu1 %v3990_v47, %s3031_s24 }
 0x4e2   : > { %1404 = vrot.lane.b32.xlu0 %v3942_v38, %s3031_s24  ;;  %1492 = vrot.lane.b32.xlu1 %v4018_v28, %s3026_s19 }
 0x4e6   : > { %1378 = vrot.lane.b32.xlu0 %v3955_v24, %s3034_s28  ;;  %1474 = vrot.lane.b32.xlu1 %v4018_v28, %s3029_s22 }
 0x4ea   : > { %1386 = vrot.lane.b32.xlu0 %v3942_v38, %s3034_s28  ;;  %1456 = vrot.lane.b32.xlu1 %v4018_v28, %s3028_s21 }
 0x4ee   : > { %1514 = vrot.lane.b32.xlu0 %v3962_v40, %s3027_s20  ;;  %1400 = vrot.lane.b32.xlu1 %v3978_v25, %s3031_s24 }
 0x4f2   : > { %1438 = vrot.lane.b32.xlu0 %v4018_v28, %s3030_s23  ;;  %1380 = vrot.lane.b32.xlu1 %v3990_v47, %s3034_s28 }
 0x4f6   : > { %1420 = vrot.lane.b32.xlu0 %v4018_v28, %s3032_s25  ;;  %1388 = vrot.lane.b32.xlu1 %v3962_v40, %s3034_s28 }
 0x4fa   : > { %1402 = vrot.lane.b32.xlu0 %v4018_v28, %s3031_s24  ;;  %1382 = vrot.lane.b32.xlu1 %v3978_v25, %s3034_s28 }
 0x4fe   : > { %1384 = vrot.lane.b32.xlu0 %v4018_v28, %s3034_s28  ;;  %1506 = vrot.lane.b32.xlu1 %v3990_v47, %s3027_s20 }
 0x502   : > { %1508 = vrot.lane.b32.xlu0 %v3978_v25, %s3027_s20  ;;  %1510 = vrot.lane.b32.xlu1 %v4018_v28, %s3027_s20 }
 0x506   : > { %1504 = vrot.lane.b32.xlu0 %v3955_v24, %s3027_s20  ;;  %1512 = vrot.lane.b32.xlu1 %v3942_v38, %s3027_s20 }
 0x50a   : > { %1524 = vperm.xlu0 %3015, %v2937_v55   ;;  %1529 = vperm.xlu1 %3016, %v2938_v57  }
 0x51c   : > { %v4071_v30 = vpop.permute.xlu0 %1440  ;;  %v1495_v58 = vpop.permute.xlu1 %1494 }
 0x520   : > { %v4073_v59 = vpop.permute.xlu0 %1422  ;;  %v4075_v60 = vpop.permute.xlu1 %1476 }
 0x524   : > { %v1487_v62 = vpop.permute.xlu0 %1486  ;;  %v4077_v7 = vpop.permute.xlu1 %1458 }
 0x525   : > { %v1502_v19 = vsel %vm438_vm3, %v1495_v58, %v1487_v62 }
 0x528   : > { %v4079_v52 = vpop.permute.xlu0 %1468  ;;  %v4081_v63 = vpop.permute.xlu1 %1442 }
 0x529   : > { %v1484_v16 = vsel %vm428_vm5, %v4075_v60, %v4079_v52 }
 0x52c   : > { %v4083_v53 = vpop.permute.xlu0 %1450  ;;  %v4085_v9 = vpop.permute.xlu1 %1424 }
 0x52d   : > { %v1466_v2 = vsel %vm418_vm4, %v4077_v7, %v4083_v53 }
 0x530   : > { %v4087_v0 = vpop.permute.xlu0 %1432  ;;  %v4089_v1 = vpop.permute.xlu1 %1406 }
 0x534   : > { %v4091_v5 = vpop.permute.xlu0 %1414  ;;  %v4093_v14 = vpop.permute.xlu1 %1436 }
 0x538   : > { %v4095_v54 = vpop.permute.xlu0 %1396  ;;  %v4097_v15 = vpop.permute.xlu1 %1418 }
 0x53c   : > { %v1497_v17 = vpop.permute.xlu0 %1496  ;;  %v1489_v6 = vpop.permute.xlu1 %1488 }
 0x53d   : > { %v1503_v12 = vsel %vm438_vm3, %v1497_v17, %v1489_v6 }
 0x53e   : > { %1616 = vmatpush1.msra.mxu1 %v1503_v12 }
 0x53f   : > { %1617 = vmatprep.subr.mxu1 %v3033_v4 }
 0x540   : > { %v1479_v20 = vpop.permute.xlu0 %1478  ;;  %1618 = vmatpush1.msra.mxu1 %v1502_v19  ;;  %v1471_v21 = vpop.permute.xlu1 %1470 }
 0x541   : > { %1619 = vmatprep.subr.mxu1 %v3033_v4  ;;  %v1485_v32 = vsel %vm428_vm5, %v1479_v20, %v1471_v21 }
 0x542   : > { %1620 = vmatpush1.msra.mxu1 %v1485_v32  ;;  %v1446_v32 = vsel %vm408_vm6, %v4087_v0, %v4093_v14 }
 0x543   : > { %1621 = vmatprep.subr.mxu1 %v3033_v4 }
 0x544   : > { %v1461_v33 = vpop.permute.xlu0 %1460  ;;  %1622 = vmatpush1.msra.mxu1 %v1484_v16  ;;  %v1453_v35 = vpop.permute.xlu1 %1452  ;;  %v1444_v16 = vsel %vm408_vm6, %v4093_v14, %v4071_v30 }
 0x545   : > { %1623 = vmatprep.subr.mxu1 %v3033_v4  ;;  %v1467_v22 = vsel %vm418_vm4, %v1461_v33, %v1453_v35 }
 0x546   : > { %1624 = vmatpush1.msra.mxu1 %v1467_v22 }
 0x547   : > { %1625 = vmatprep.subr.mxu1 %v3033_v4 }
 0x548   : > { %v1491_v61 = vpop.permute.xlu0 %1490  ;;  %1626 = vmatpush1.msra.mxu1 %v1466_v2  ;;  %v1435_v11 = vpop.permute.xlu1 %1434 }
 0x549   : > { %1627 = vmatprep.subr.mxu1 %v3033_v4  ;;  %v1498_v46 = vsel %vm438_vm3, %v1491_v61, %v1495_v58  ;;  %v1500_v3 = vsel %vm438_vm3, %v1487_v62, %v1491_v61 }
 0x54a   : > { %1628 = vmatpush1.msra.mxu1 %v3962_v40 }
 0x54b   : > { %1629 = vmatprep.subr.mxu1 %v3033_v4 }
 0x54c   : > { %v1473_v13 = vpop.permute.xlu0 %1472  ;;  %1630 = vmatpush1.msra.mxu1 %v3942_v38  ;;  %v4124_v23 = vpop.permute.xlu1 %1416 }
 0x54d   : > { %1631 = vmatprep.subr.mxu1 %v3033_v4  ;;  %v1480_v51 = vsel %vm428_vm5, %v1473_v13, %v4075_v60  ;;  %v1482_v58 = vsel %vm428_vm5, %v4079_v52, %v1473_v13  ;;  %v1431_v2 = vsel %vm398_vm7, %v4085_v9, %v4124_v23 }
 0x550   : > { %v1455_v39 = vpop.permute.xlu0 %1454  ;;  %v4127_v8 = vpop.permute.xlu1 %1398 }
 0x551   : > { %v1462_v60 = vsel %vm418_vm4, %v1455_v39, %v4077_v7  ;;  %v1464_v52 = vsel %vm418_vm4, %v4083_v53, %v1455_v39  ;;  %v1449_v53 = vsel %vm408_vm6, %v4081_v63, %v1435_v11 }
 0x554   : > { %v4129_v18 = vpop.permute.xlu0 %1404  ;;  %v1493_v26 = vpop.permute.xlu1 %1492 }
 0x555   : > { %v1499_v43 = vsel %vm438_vm3, %v1493_v26, %v1497_v17  ;;  %v1501_v44 = vsel %vm438_vm3, %v1489_v6, %v1493_v26 }
 0x556   : > { %1538 = vmatprep.subr.mxu0 %v1499_v43 }
 0x557   : > { %1539 = vmatpush1.msra.mxu0 %v1501_v44 }
 0x558   : > { %v4137_v31 = vpop.permute.xlu0 %1378  ;;  %1540 = vmatprep.subr.mxu0 %v1498_v46  ;;  %v1475_v56 = vpop.permute.xlu1 %1474 }
 0x559   : > { %1541 = vmatpush1.msra.mxu0 %v1500_v3  ;;  %v1481_v49 = vsel %vm428_vm5, %v1475_v56, %v1479_v20  ;;  %v1483_v50 = vsel %vm428_vm5, %v1471_v21, %v1475_v56 }
 0x55a   : > { %1542 = vmatprep.subr.mxu0 %v1481_v49 }
 0x55b   : > { %1543 = vmatpush1.msra.mxu0 %v1483_v50 }
 0x55c   : > { %v4148_v55 = vpop.permute.xlu0 %1386  ;;  %1544 = vmatprep.subr.mxu0 %v1480_v51  ;;  %v1457_v57 = vpop.permute.xlu1 %1456 }
 0x55d   : > { %1545 = vmatpush1.msra.mxu0 %v1482_v58  ;;  %v1463_v62 = vsel %vm418_vm4, %v1457_v57, %v1461_v33  ;;  %v1465_v17 = vsel %vm418_vm4, %v1453_v35, %v1457_v57  ;;  %v1394_v3 = vsel %vm378_vm9, %v4148_v55, %v4137_v31  ;;  %v2933_v57 = vld [vmem:[%s5388_s4 + $0x40] sm:$0xff] }
 0x55e   : > { %1546 = vmatprep.subr.mxu0 %v1463_v62 }
 0x55f   : > { %1547 = vmatpush1.msra.mxu0 %v1465_v17 }
 0x560   : > { %v4160_v6 = vpop.permute.xlu0 %1514  ;;  %1548 = vmatprep.subr.mxu0 %v1462_v60  ;;  %v1401_v12 = vpop.permute.xlu1 %1400  ;;  %v2936_v60 = vld [vmem:[%s5388_s4 + $0x58] sm:$0xff] }
 0x561   : > { %1549 = vmatpush1.msra.mxu0 %v1464_v52 }
 0x562   : > { %1550 = vmatprep.subr.mxu0 %v4018_v28 }
 0x563   : > { %1551 = vmatpush1.msra.mxu0 %v3990_v47 }
 0x564   : > { %v1439_v19 = vpop.permute.xlu0 %1438  ;;  %1552 = vmatprep.subr.mxu0 %v3978_v25  ;;  %v1381_v20 = vpop.permute.xlu1 %1380 }
 0x565   : > { %1553 = vmatpush1.msra.mxu0 %v3955_v24  ;;  %v1447_v7 = vsel %vm408_vm6, %v1435_v11, %v1439_v19  ;;  %v1445_v21 = vsel %vm408_vm6, %v1439_v19, %v4081_v63  ;;  %v1448_v63 = vsel %vm408_vm6, %v4071_v30, %v4087_v0  ;;  %v1428_v30 = vsel %vm398_vm7, %v4091_v5, %v4097_v15 }
 0x566   : > { %1554 = vmatprep.subr.mxu0 %v1447_v7  ;;  %1632 = vmatpush1.msra.mxu1 %v1445_v21  ;;  %v1426_v0 = vsel %vm398_vm7, %v4097_v15, %v4073_v59 }
 0x567   : > { %1555 = vmatpush1.msra.mxu0 %v1449_v53  ;;  %1633 = vmatprep.subr.mxu1 %v3033_v4 }
 0x568   : > { %v1421_v33 = vpop.permute.xlu0 %1420  ;;  %1556 = vmatprep.subr.mxu0 %v1446_v32  ;;  %1634 = vmatpush1.msra.mxu1 %v1444_v16  ;;  %v1389_v35 = vpop.permute.xlu1 %1388 }
 0x569   : > { %1557 = vmatpush1.msra.mxu0 %v1448_v63  ;;  %1635 = vmatprep.subr.mxu1 %v3033_v4  ;;  %v1429_v22 = vsel %vm398_vm7, %v4124_v23, %v1421_v33  ;;  %v1427_v14 = vsel %vm398_vm7, %v1421_v33, %v4085_v9  ;;  %v1430_v9 = vsel %vm398_vm7, %v4073_v59, %v4091_v5 }
 0x56a   : > { %1558 = vmatprep.subr.mxu0 %v1429_v22  ;;  %1636 = vmatpush1.msra.mxu1 %v1427_v14  ;;  %v1413_v23 = vsel %vm388_vm8, %v4089_v1, %v4127_v8  ;;  %v1410_v59 = vsel %vm388_vm8, %v4095_v54, %v1401_v12  ;;  %v1408_v5 = vsel %vm388_vm8, %v1401_v12, %v4129_v18 }
 0x56b   : > { %1559 = vmatpush1.msra.mxu0 %v1431_v2  ;;  %1637 = vmatprep.subr.mxu1 %v3033_v4  ;;  %v1395_v44 = vsel %vm378_vm9, %v1389_v35, %v1381_v20 }
 0x56c   : > { %v1403_v61 = vpop.permute.xlu0 %1402  ;;  %1560 = vmatprep.subr.mxu0 %v1428_v30  ;;  %1638 = vmatpush1.msra.mxu1 %v1426_v0  ;;  %v1383_v11 = vpop.permute.xlu1 %1382 }
 0x56d   : > { %1561 = vmatpush1.msra.mxu0 %v1430_v9  ;;  %1639 = vmatprep.subr.mxu1 %v3033_v4  ;;  %v1411_v13 = vsel %vm388_vm8, %v4127_v8, %v1403_v61  ;;  %v1409_v15 = vsel %vm388_vm8, %v1403_v61, %v4089_v1  ;;  %v1412_v1 = vsel %vm388_vm8, %v4129_v18, %v4095_v54 }
 0x56e   : > { %1562 = vmatprep.subr.mxu0 %v1411_v13  ;;  %1640 = vmatpush1.msra.mxu1 %v1409_v15  ;;  %v1392_v54 = vsel %vm378_vm9, %v4137_v31, %v1383_v11  ;;  %v1390_v18 = vsel %vm378_vm9, %v1383_v11, %v4148_v55 }
 0x56f   : > { %1563 = vmatpush1.msra.mxu0 %v1413_v23  ;;  %1641 = vmatprep.subr.mxu1 %v3033_v4 }
 0x570   : > { %v1385_v39 = vpop.permute.xlu0 %1384  ;;  %1564 = vmatprep.subr.mxu0 %v1410_v59  ;;  %1642 = vmatpush1.msra.mxu1 %v1408_v5  ;;  %v1507_v26 = vpop.permute.xlu1 %1506 }
 0x571   : > { %1565 = vmatpush1.msra.mxu0 %v1412_v1  ;;  %1643 = vmatprep.subr.mxu1 %v3033_v4  ;;  %v1393_v8 = vsel %vm378_vm9, %v1381_v20, %v1385_v39  ;;  %v1391_v43 = vsel %vm378_vm9, %v1385_v39, %v1389_v35  ;;  %v1521_v50 = vsel %vm448_vm1, %v4160_v6, %v1507_v26 }
 0x572   : > { %1566 = vmatprep.subr.mxu0 %v1393_v8  ;;  %1644 = vmatpush1.msra.mxu1 %v1391_v43  ;;  %v2944_v8 = vld [vmem:[%s5388_s4 + $0x68] sm:$0xff]  ;;  %v2947_v43 = vld [vmem:[%s5389_s5 + $0x30] sm:$0xff] }
 0x573   : > { %1567 = vmatpush1.msra.mxu0 %v1395_v44  ;;  %1645 = vmatprep.subr.mxu1 %v3033_v4  ;;  %v2948_v44 = vld [vmem:[%s5389_s5 + $0x38] sm:$0xff] }
 0x574   : > { %v1509_v46 = vpop.permute.xlu0 %1508  ;;  %1568 = vmatprep.subr.mxu0 %v1392_v54  ;;  %1646 = vmatpush1.msra.mxu1 %v1390_v18  ;;  %v1511_v56 = vpop.permute.xlu1 %1510 }
 0x575   : > { %1569 = vmatpush1.msra.mxu0 %v1394_v3  ;;  %1675 = vmatprep.subr.mxu1 %v3033_v4  ;;  %v1517_v49 = vsel %vm448_vm1, %v1511_v56, %v4160_v6  ;;  %v1519_v51 = vsel %vm448_vm1, %v1507_v26, %v1511_v56  ;;  %v2935_v6 = vld [vmem:[%s5388_s4 + $0x50] sm:$0xff] }
 0x576   : > { %1598 = vmatprep.subr.mxu0 %v1517_v49  ;;  %1676 = vmatpush2.msra.mxu1 %v1521_v50 }
 0x577   : > { %1599 = vmatpush2.msra.mxu0 %v1519_v51  ;;  %1677 = vmatprep.subr.mxu1 %v3033_v4 }
 0x578   : > { %v1505_v31 = vpop.permute.xlu0 %1504  ;;  %v1513_v55 = vpop.permute.xlu1 %1512 }
 0x579   : > { %v1516_v58 = vsel %vm448_vm1, %v1509_v46, %v1513_v55  ;;  %v1520_v62 = vsel %vm448_vm1, %v1513_v55, %v1505_v31  ;;  %v1518_v17 = vsel %vm448_vm1, %v1505_v31, %v1509_v46 }
 0x57a   : > { %1600 = vmatprep.subr.mxu0 %v1516_v58  ;;  %1678 = vmatpush2.msra.mxu1 %v1520_v62 }
 0x57b   : > { %1601 = vmatpush2.msra.mxu0 %v1518_v17  ;;  %1680 = vmatmul.mubr.f32.vlgmr.msra.gmra.mxu1 %v2933_v57 }
 0x57c   : > { %1603 = vmatmul.mubr.f32.vlgmr.msra.gmra.mxu0 %v2933_v57  ;;  %2942 = vmatprep.mubr.msk.f32.mxu1 %vm861_vm10, %v2936_v60 }
 0x57d   : > { %2940 = vmatprep.mubr.msk.f32.mxu0 %vm861_vm10, %v2936_v60  ;;  %1947 = vmatprep.subr.mxu1 %v3033_v4 }
 0x57f   : > { %1685 = vmatmul.mubr.f32.gmra.mxu1 %v2935_v6 }
 0x580   : > { %1609 = vmatmul.mubr.f32.gmra.mxu0 %v2935_v6  ;;  %2951 = vmatprep.mubr.msk.f32.mxu1 %vm861_vm10, %v2944_v8 }
 0x581   : > { %2949 = vmatprep.mubr.msk.f32.mxu0 %vm861_vm10, %v2944_v8 }
 0x585   : > { %v1525_v12 = vpop.permute.xlu0 %1524  ;;  %v1530_v35 = vpop.permute.xlu1 %1529 }
 0x63b   : > { %v1681_v52 = vpop.f32.mrf.mxu1 }
 0x63c   : > { %v1682_v19 = vadd.f32 %v1681_v52, %v1525_v12  ;;  %v1604_v20 = vpop.f32.mrf.mxu0 }
 0x63d   : > { %v1683_v7 = vpop.f32.mrf.mxu1  ;;  %v1605_v16 = vadd.f32 %v1604_v20, %v1525_v12 }
 0x63e   : > { %v1692_v21 = vmax.f32 %v1682_v19, 0.0  ;;  %v1606_v0 = vpop.f32.mrf.mxu0 }
 0x63f   : > { %v1686_v53 = vpop.f32.mrf.mxu1  ;;  %v1690_v63 = vmax.f32 %v1605_v16, 0.0  ;;  %v1607_v61 = vadd.f32 %v1606_v0, %v1525_v12 }
 0x640   : > { %v4283_v32 = vmul.f32 %v1692_v21, %v3266_v27  ;;  %v1687_v22 = vadd.f32 %v1686_v53, %v1530_v35  ;;  %v1610_v9 = vpop.f32.mrf.mxu0 }
 0x641   : > { %v1688_v33 = vpop.f32.mrf.mxu1  ;;  %v4294_v14 = vmul.f32 %v1690_v63, %v3279_v34  ;;  %v1691_v11 = vmax.f32 %v1607_v61, 0.0  ;;  %v1611_v15 = vadd.f32 %v1610_v9, %v1530_v35 }
 0x642   : > { %1772 = vrot.lane.b32.xlu0 %v4283_v32, %s3030_s23  ;;  %1826 = vrot.lane.b32.xlu1 %v4283_v32, %s3026_s19  ;;  %v1695_v2 = vmax.f32 %v1687_v22, 0.0  ;;  %v1612_v5 = vpop.f32.mrf.mxu0 }
 0x643   : > { %v4316_v13 = vmul.f32 %v1691_v11, %v3299_v41  ;;  %v1693_v23 = vmax.f32 %v1611_v15, 0.0  ;;  %v1613_v39 = vadd.f32 %v1612_v5, %v1530_v35 }
 0x644   : > { %v4301_v30 = vmul.f32 %v1695_v2, %v3266_v27 }
 0x645   : > { %v4327_v59 = vmul.f32 %v1693_v23, %v3279_v34  ;;  %v1694_v26 = vmax.f32 %v1613_v39, 0.0 }
 0x646   : > { %1754 = vrot.lane.b32.xlu0 %v4283_v32, %s3032_s25  ;;  %1808 = vrot.lane.b32.xlu1 %v4283_v32, %s3029_s22 }
 0x647   : > { %v4354_v1 = vmul.f32 %v1694_v26, %v3299_v41 }
 0x64a   : > { %1790 = vrot.lane.b32.xlu1 %v4283_v32, %s3028_s21  ;;  %1818 = vrot.lane.b32.xlu0 %v4294_v14, %s3026_s19 }
 0x64e   : > { %1800 = vrot.lane.b32.xlu0 %v4294_v14, %s3029_s22  ;;  %1774 = vrot.lane.b32.xlu1 %v4301_v30, %s3030_s23 }
 0x652   : > { %1782 = vrot.lane.b32.xlu0 %v4294_v14, %s3028_s21  ;;  %1756 = vrot.lane.b32.xlu1 %v4301_v30, %s3032_s25 }
 0x656   : > { %1764 = vrot.lane.b32.xlu0 %v4294_v14, %s3030_s23  ;;  %1738 = vrot.lane.b32.xlu1 %v4301_v30, %s3031_s24 }
 0x65a   : > { %1746 = vrot.lane.b32.xlu0 %v4294_v14, %s3032_s25  ;;  %1768 = vrot.lane.b32.xlu1 %v4316_v13, %s3030_s23 }
 0x65e   : > { %1728 = vrot.lane.b32.xlu0 %v4294_v14, %s3031_s24  ;;  %1750 = vrot.lane.b32.xlu1 %v4316_v13, %s3032_s25 }
 0x662   : > { %1828 = vrot.lane.b32.xlu0 %v4301_v30, %s3026_s19  ;;  %1820 = vrot.lane.b32.xlu1 %v4327_v59, %s3026_s19 }
 0x666   : > { %1810 = vrot.lane.b32.xlu0 %v4301_v30, %s3029_s22  ;;  %1802 = vrot.lane.b32.xlu1 %v4327_v59, %s3029_s22 }
 0x66a   : > { %1792 = vrot.lane.b32.xlu0 %v4301_v30, %s3028_s21  ;;  %1784 = vrot.lane.b32.xlu1 %v4327_v59, %s3028_s21 }
 0x66e   : > { %1822 = vrot.lane.b32.xlu0 %v4316_v13, %s3026_s19  ;;  %1766 = vrot.lane.b32.xlu1 %v4327_v59, %s3030_s23 }
 0x672   : > { %1804 = vrot.lane.b32.xlu0 %v4316_v13, %s3029_s22  ;;  %1748 = vrot.lane.b32.xlu1 %v4327_v59, %s3032_s25 }
 0x676   : > { %1786 = vrot.lane.b32.xlu0 %v4316_v13, %s3028_s21  ;;  %1730 = vrot.lane.b32.xlu1 %v4327_v59, %s3031_s24 }
 0x67a   : > { %1736 = vrot.lane.b32.xlu0 %v4283_v32, %s3031_s24  ;;  %1824 = vrot.lane.b32.xlu1 %v4354_v1, %s3026_s19 }
 0x67e   : > { %1710 = vrot.lane.b32.xlu0 %v4294_v14, %s3034_s28  ;;  %1806 = vrot.lane.b32.xlu1 %v4354_v1, %s3029_s22 }
 0x682   : > { %1718 = vrot.lane.b32.xlu0 %v4283_v32, %s3034_s28  ;;  %1788 = vrot.lane.b32.xlu1 %v4354_v1, %s3028_s21 }
 0x686   : > { %1846 = vrot.lane.b32.xlu0 %v4301_v30, %s3027_s20  ;;  %1732 = vrot.lane.b32.xlu1 %v4316_v13, %s3031_s24 }
 0x68a   : > { %1770 = vrot.lane.b32.xlu0 %v4354_v1, %s3030_s23  ;;  %1712 = vrot.lane.b32.xlu1 %v4327_v59, %s3034_s28 }
 0x68e   : > { %1752 = vrot.lane.b32.xlu0 %v4354_v1, %s3032_s25  ;;  %1720 = vrot.lane.b32.xlu1 %v4301_v30, %s3034_s28 }
 0x692   : > { %1734 = vrot.lane.b32.xlu0 %v4354_v1, %s3031_s24  ;;  %1714 = vrot.lane.b32.xlu1 %v4316_v13, %s3034_s28 }
 0x696   : > { %1716 = vrot.lane.b32.xlu0 %v4354_v1, %s3034_s28  ;;  %1838 = vrot.lane.b32.xlu1 %v4327_v59, %s3027_s20 }
 0x69a   : > { %1840 = vrot.lane.b32.xlu0 %v4316_v13, %s3027_s20  ;;  %1842 = vrot.lane.b32.xlu1 %v4354_v1, %s3027_s20 }
 0x69e   : > { %1836 = vrot.lane.b32.xlu0 %v4294_v14, %s3027_s20  ;;  %1844 = vrot.lane.b32.xlu1 %v4283_v32, %s3027_s20 }
 0x6a2   : > { %1856 = vperm.xlu0 %3015, %v2947_v43   ;;  %1861 = vperm.xlu1 %3016, %v2948_v44  }
 0x6b4   : > { %v4407_v54 = vpop.permute.xlu0 %1772  ;;  %v1827_v18 = vpop.permute.xlu1 %1826 }
 0x6b8   : > { %v4409_v46 = vpop.permute.xlu0 %1754  ;;  %v4411_v56 = vpop.permute.xlu1 %1808 }
 0x6bc   : > { %v1819_v3 = vpop.permute.xlu0 %1818  ;;  %v4413_v49 = vpop.permute.xlu1 %1790 }
 0x6bd   : > { %v1834_v20 = vsel %vm438_vm3, %v1827_v18, %v1819_v3 }
 0x6c0   : > { %v4415_v50 = vpop.permute.xlu0 %1800  ;;  %v4417_v51 = vpop.permute.xlu1 %1774 }
 0x6c1   : > { %v1816_v16 = vsel %vm428_vm5, %v4411_v56, %v4415_v50 }
 0x6c4   : > { %v4419_v31 = vpop.permute.xlu0 %1782  ;;  %v4421_v55 = vpop.permute.xlu1 %1756 }
 0x6c5   : > { %v1798_v22 = vsel %vm418_vm4, %v4413_v49, %v4419_v31 }
 0x6c8   : > { %v4423_v57 = vpop.permute.xlu0 %1764  ;;  %v4425_v58 = vpop.permute.xlu1 %1738 }
 0x6cc   : > { %v4427_v62 = vpop.permute.xlu0 %1746  ;;  %v4429_v17 = vpop.permute.xlu1 %1768 }
 0x6d0   : > { %v4431_v60 = vpop.permute.xlu0 %1728  ;;  %v4433_v6 = vpop.permute.xlu1 %1750 }
 0x6d4   : > { %v1829_v12 = vpop.permute.xlu0 %1828  ;;  %v1821_v52 = vpop.permute.xlu1 %1820 }
 0x6d5   : > { %v1835_v19 = vsel %vm438_vm3, %v1829_v12, %v1821_v52 }
 0x6d6   : > { %1948 = vmatpush1.msra.mxu1 %v1835_v19 }
 0x6d7   : > { %1949 = vmatprep.subr.mxu1 %v3033_v4 }
 0x6d8   : > { %v1811_v7 = vpop.permute.xlu0 %1810  ;;  %1950 = vmatpush1.msra.mxu1 %v1834_v20  ;;  %v1803_v21 = vpop.permute.xlu1 %1802 }
 0x6d9   : > { %1951 = vmatprep.subr.mxu1 %v3033_v4  ;;  %v1817_v53 = vsel %vm428_vm5, %v1811_v7, %v1803_v21 }
 0x6da   : > { %1952 = vmatpush1.msra.mxu1 %v1817_v53 }
 0x6db   : > { %1953 = vmatprep.subr.mxu1 %v3033_v4 }
 0x6dc   : > { %v1793_v33 = vpop.permute.xlu0 %1792  ;;  %1954 = vmatpush1.msra.mxu1 %v1816_v16  ;;  %v1785_v35 = vpop.permute.xlu1 %1784 }
 0x6dd   : > { %1955 = vmatprep.subr.mxu1 %v3033_v4  ;;  %v1799_v63 = vsel %vm418_vm4, %v1793_v33, %v1785_v35 }
 0x6de   : > { %1956 = vmatpush1.msra.mxu1 %v1799_v63 }
 0x6df   : > { %1957 = vmatprep.subr.mxu1 %v3033_v4 }
 0x6e0   : > { %v1823_v2 = vpop.permute.xlu0 %1822  ;;  %1958 = vmatpush1.msra.mxu1 %v1798_v22  ;;  %v1767_v0 = vpop.permute.xlu1 %1766 }
 0x6e1   : > { %1959 = vmatprep.subr.mxu1 %v3033_v4  ;;  %v1832_v43 = vsel %vm438_vm3, %v1819_v3, %v1823_v2 }
 0x6e2   : > { %1960 = vmatpush1.msra.mxu1 %v4301_v30 }
 0x6e3   : > { %1961 = vmatprep.subr.mxu1 %v3033_v4 }
 0x6e4   : > { %v1805_v61 = vpop.permute.xlu0 %1804  ;;  %1962 = vmatpush1.msra.mxu1 %v4283_v32  ;;  %v4460_v11 = vpop.permute.xlu1 %1748  ;;  %v1830_v32 = vsel %vm438_vm3, %v1823_v2, %v1827_v18 }
 0x6e5   : > { %1963 = vmatprep.subr.mxu1 %v3033_v4  ;;  %v1812_v18 = vsel %vm428_vm5, %v1805_v61, %v4411_v56  ;;  %v1814_v3 = vsel %vm428_vm5, %v4415_v50, %v1805_v61  ;;  %v1763_v22 = vsel %vm398_vm7, %v4421_v55, %v4460_v11 }
 0x6e8   : > { %v1787_v9 = vpop.permute.xlu0 %1786  ;;  %v4463_v15 = vpop.permute.xlu1 %1730 }
 0x6e9   : > { %v1794_v56 = vsel %vm418_vm4, %v1787_v9, %v4413_v49  ;;  %v1796_v50 = vsel %vm418_vm4, %v4419_v31, %v1787_v9 }
 0x6ec   : > { %v4465_v23 = vpop.permute.xlu0 %1736  ;;  %v1825_v5 = vpop.permute.xlu1 %1824 }
 0x6ed   : > { %v1831_v39 = vsel %vm438_vm3, %v1825_v5, %v1829_v12  ;;  %v1833_v30 = vsel %vm438_vm3, %v1821_v52, %v1825_v5 }
 0x6ee   : > { %1870 = vmatprep.subr.mxu0 %v1831_v39 }
 0x6ef   : > { %1871 = vmatpush1.msra.mxu0 %v1833_v30 }
 0x6f0   : > { %v4473_v26 = vpop.permute.xlu0 %1710  ;;  %1872 = vmatprep.subr.mxu0 %v1830_v32  ;;  %v1807_v8 = vpop.permute.xlu1 %1806 }
 0x6f1   : > { %1873 = vmatpush1.msra.mxu0 %v1832_v43  ;;  %v1813_v44 = vsel %vm428_vm5, %v1807_v8, %v1811_v7  ;;  %v1815_v12 = vsel %vm428_vm5, %v1803_v21, %v1807_v8 }
 0x6f2   : > { %1874 = vmatprep.subr.mxu0 %v1813_v44 }
 0x6f3   : > { %1875 = vmatpush1.msra.mxu0 %v1815_v12 }
 0x6f4   : > { %v4484_v52 = vpop.permute.xlu0 %1718  ;;  %1876 = vmatprep.subr.mxu0 %v1812_v18  ;;  %v1789_v19 = vpop.permute.xlu1 %1788 }
 0x6f5   : > { %1877 = vmatpush1.msra.mxu0 %v1814_v3  ;;  %v1795_v20 = vsel %vm418_vm4, %v1789_v19, %v1793_v33  ;;  %v1797_v7 = vsel %vm418_vm4, %v1785_v35, %v1789_v19  ;;  %v1726_v43 = vsel %vm378_vm9, %v4484_v52, %v4473_v26  ;;  %v2943_v19 = vld [vmem:[%s5388_s4 + $0x60] sm:$0xff] }
 0x6f6   : > { %1878 = vmatprep.subr.mxu0 %v1795_v20 }
 0x6f7   : > { %1879 = vmatpush1.msra.mxu0 %v1797_v7 }
 0x6f8   : > { %v4496_v21 = vpop.permute.xlu0 %1846  ;;  %1880 = vmatprep.subr.mxu0 %v1794_v56  ;;  %v1733_v53 = vpop.permute.xlu1 %1732  ;;  %v2946_v56 = vld [vmem:[%s5388_s4 + $0x78] sm:$0xff] }
 0x6f9   : > { %1881 = vmatpush1.msra.mxu0 %v1796_v50 }
 0x6fa   : > { %1882 = vmatprep.subr.mxu0 %v4354_v1  ;;  %v1781_v1 = vsel %vm408_vm6, %v4417_v51, %v1767_v0 }
 0x6fb   : > { %1883 = vmatpush1.msra.mxu0 %v4327_v59 }
 0x6fc   : > { %v1771_v16 = vpop.permute.xlu0 %1770  ;;  %1884 = vmatprep.subr.mxu0 %v4316_v13  ;;  %v1713_v33 = vpop.permute.xlu1 %1712  ;;  %v1776_v13 = vsel %vm408_vm6, %v4429_v17, %v4407_v54 }
 0x6fd   : > { %1885 = vmatpush1.msra.mxu0 %v4294_v14  ;;  %v1779_v49 = vsel %vm408_vm6, %v1767_v0, %v1771_v16  ;;  %v1777_v35 = vsel %vm408_vm6, %v1771_v16, %v4417_v51  ;;  %v1778_v14 = vsel %vm408_vm6, %v4423_v57, %v4429_v17  ;;  %v1780_v51 = vsel %vm408_vm6, %v4407_v54, %v4423_v57 }
 0x6fe   : > { %1886 = vmatprep.subr.mxu0 %v1779_v49  ;;  %1964 = vmatpush1.msra.mxu1 %v1777_v35  ;;  %v1760_v54 = vsel %vm398_vm7, %v4427_v62, %v4433_v6  ;;  %v1758_v57 = vsel %vm398_vm7, %v4433_v6, %v4409_v46 }
 0x6ff   : > { %1887 = vmatpush1.msra.mxu0 %v1781_v1  ;;  %1965 = vmatprep.subr.mxu1 %v3033_v4 }
 0x700   : > { %v1753_v59 = vpop.permute.xlu0 %1752  ;;  %1888 = vmatprep.subr.mxu0 %v1778_v14  ;;  %1966 = vmatpush1.msra.mxu1 %v1776_v13  ;;  %v1721_v31 = vpop.permute.xlu1 %1720 }
 0x701   : > { %1889 = vmatpush1.msra.mxu0 %v1780_v51  ;;  %1967 = vmatprep.subr.mxu1 %v3033_v4  ;;  %v1761_v63 = vsel %vm398_vm7, %v4460_v11, %v1753_v59  ;;  %v1759_v17 = vsel %vm398_vm7, %v1753_v59, %v4421_v55  ;;  %v1762_v55 = vsel %vm398_vm7, %v4409_v46, %v4427_v62 }
 0x702   : > { %1890 = vmatprep.subr.mxu0 %v1761_v63  ;;  %1968 = vmatpush1.msra.mxu1 %v1759_v17  ;;  %v1745_v11 = vsel %vm388_vm8, %v4425_v58, %v4463_v15  ;;  %v1742_v46 = vsel %vm388_vm8, %v4431_v60, %v1733_v53  ;;  %v1740_v62 = vsel %vm388_vm8, %v1733_v53, %v4465_v23 }
 0x703   : > { %1891 = vmatpush1.msra.mxu0 %v1763_v22  ;;  %1969 = vmatprep.subr.mxu1 %v3033_v4  ;;  %v1727_v30 = vsel %vm378_vm9, %v1721_v31, %v1713_v33 }
 0x704   : > { %v1735_v2 = vpop.permute.xlu0 %1734  ;;  %1892 = vmatprep.subr.mxu0 %v1760_v54  ;;  %1970 = vmatpush1.msra.mxu1 %v1758_v57  ;;  %v1715_v0 = vpop.permute.xlu1 %1714 }
 0x705   : > { %1893 = vmatpush1.msra.mxu0 %v1762_v55  ;;  %1971 = vmatprep.subr.mxu1 %v3033_v4  ;;  %v1743_v61 = vsel %vm388_vm8, %v4463_v15, %v1735_v2  ;;  %v1741_v6 = vsel %vm388_vm8, %v1735_v2, %v4425_v58  ;;  %v1744_v58 = vsel %vm388_vm8, %v4465_v23, %v4431_v60 }
 0x706   : > { %1894 = vmatprep.subr.mxu0 %v1743_v61  ;;  %1972 = vmatpush1.msra.mxu1 %v1741_v6  ;;  %v1724_v60 = vsel %vm378_vm9, %v4473_v26, %v1715_v0  ;;  %v1722_v23 = vsel %vm378_vm9, %v1715_v0, %v4484_v52 }
 0x707   : > { %1895 = vmatpush1.msra.mxu0 %v1745_v11  ;;  %1973 = vmatprep.subr.mxu1 %v3033_v4 }
 0x708   : > { %v1717_v9 = vpop.permute.xlu0 %1716  ;;  %1896 = vmatprep.subr.mxu0 %v1742_v46  ;;  %1974 = vmatpush1.msra.mxu1 %v1740_v62  ;;  %v1839_v5 = vpop.permute.xlu1 %1838 }
 0x709   : > { %1897 = vmatpush1.msra.mxu0 %v1744_v58  ;;  %1975 = vmatprep.subr.mxu1 %v3033_v4  ;;  %v1725_v15 = vsel %vm378_vm9, %v1713_v33, %v1717_v9  ;;  %v1723_v39 = vsel %vm378_vm9, %v1717_v9, %v1721_v31  ;;  %v1853_v12 = vsel %vm448_vm1, %v4496_v21, %v1839_v5 }
 0x70a   : > { %1898 = vmatprep.subr.mxu0 %v1725_v15  ;;  %1976 = vmatpush1.msra.mxu1 %v1723_v39  ;;  %v2044_v39 = vld [vmem:[%s5391_s7] sm:$0xff] }
 0x70b   : > { %1899 = vmatpush1.msra.mxu0 %v1727_v30  ;;  %1977 = vmatprep.subr.mxu1 %v3033_v4  ;;  %v2045_v30 = vld [vmem:[%s5391_s7 + $0x8] sm:$0xff] }
 0x70c   : > { %v1841_v32 = vpop.permute.xlu0 %1840  ;;  %1900 = vmatprep.subr.mxu0 %v1724_v60  ;;  %1978 = vmatpush1.msra.mxu1 %v1722_v23  ;;  %v1843_v8 = vpop.permute.xlu1 %1842 }
 0x70d   : > { %1901 = vmatpush1.msra.mxu0 %v1726_v43  ;;  %2007 = vmatprep.subr.mxu1 %v3033_v4  ;;  %v1849_v44 = vsel %vm448_vm1, %v1843_v8, %v4496_v21  ;;  %v1851_v18 = vsel %vm448_vm1, %v1839_v5, %v1843_v8  ;;  %v2945_v21 = vld [vmem:[%s5388_s4 + $0x70] sm:$0xff] }
 0x70e   : > { %1930 = vmatprep.subr.mxu0 %v1849_v44  ;;  %2008 = vmatpush2.msra.mxu1 %v1853_v12 }
 0x70f   : > { %1931 = vmatpush2.msra.mxu0 %v1851_v18  ;;  %2009 = vmatprep.subr.mxu1 %v3033_v4 }
 0x710   : > { %v1837_v26 = vpop.permute.xlu0 %1836  ;;  %v1845_v52 = vpop.permute.xlu1 %1844 }
 0x711   : > { %v1848_v3 = vsel %vm448_vm1, %v1841_v32, %v1845_v52  ;;  %v1852_v20 = vsel %vm448_vm1, %v1845_v52, %v1837_v26  ;;  %v1850_v7 = vsel %vm448_vm1, %v1837_v26, %v1841_v32 }
 0x712   : > { %1932 = vmatprep.subr.mxu0 %v1848_v3  ;;  %2010 = vmatpush2.msra.mxu1 %v1852_v20 }
 0x713   : > { %1933 = vmatpush2.msra.mxu0 %v1850_v7  ;;  %2012 = vmatmul.mubr.f32.vlgmr.msra.gmra.mxu1 %v2943_v19 }
 0x714   : > { %1935 = vmatmul.mubr.f32.vlgmr.msra.gmra.mxu0 %v2943_v19  ;;  %2952 = vmatprep.mubr.msk.f32.mxu1 %vm861_vm10, %v2946_v56 }
 0x715   : > { %2950 = vmatprep.mubr.msk.f32.mxu0 %vm861_vm10, %v2946_v56  ;;  %2283 = vmatprep.subr.mxu1 %v3033_v4 }
 0x717   : > { %2017 = vmatmul.mubr.f32.gmra.mxu1 %v2945_v21 }
 0x718   : > { %1941 = vmatmul.mubr.f32.gmra.mxu0 %v2945_v21 }
 0x71d   : > { %v1857_v53 = vpop.permute.xlu0 %1856  ;;  %v1862_v59 = vpop.permute.xlu1 %1861 }
 0x7d3   : > { %v2013_v50 = vpop.f32.mrf.mxu1 }
 0x7d4   : > { %v2014_v16 = vadd.f32 %v2013_v50, %v1857_v53  ;;  %v1936_v33 = vpop.f32.mrf.mxu0 }
 0x7d5   : > { %v2015_v49 = vpop.f32.mrf.mxu1  ;;  %v1937_v1 = vadd.f32 %v1936_v33, %v1857_v53 }
 0x7d6   : > { %v2024_v35 = vmul.f32 %v2014_v16, %v3266_v27  ;;  %v1938_v2 = vpop.f32.mrf.mxu0 }
 0x7d7   : > { %v2018_v14 = vpop.f32.mrf.mxu1  ;;  %v2022_v63 = vmul.f32 %v1937_v1, %v3279_v34  ;;  %v1939_v0 = vadd.f32 %v1938_v2, %v1857_v53 }
 0x7d8   : > { %v2030_v13 = vmul.f32 0.15, %v2024_v35  ;;  %v2019_v17 = vadd.f32 %v2018_v14, %v1862_v59  ;;  %v1942_v61 = vpop.f32.mrf.mxu0 }
 0x7d9   : > { %v2020_v31 = vpop.f32.mrf.mxu1  ;;  %v2028_v22 = vmul.f32 0.15, %v2022_v63  ;;  %v1943_v11 = vadd.f32 %v1942_v61, %v1862_v59 }
 0x7da   : > { %v4620_v51 = vadd.f32 %v2030_v13, %v3942_v38  ;;  %v2027_v54 = vmul.f32 %v2019_v17, %v3266_v27 }
 0x7db   : > { %v4633_v38 = vadd.f32 %v2028_v22, %v3955_v24  ;;  %v2023_v24 = vmul.f32 %v1939_v0, %v3299_v41  ;;  %v2025_v46 = vmul.f32 %v1943_v11, %v3279_v34 }
 0x7dc   : > { %2108 = vrot.lane.b32.xlu0 %v4620_v51, %s3030_s23  ;;  %2162 = vrot.lane.b32.xlu1 %v4620_v51, %s3026_s19  ;;  %v2033_v57 = vmul.f32 0.15, %v2027_v54 }
 0x7dd   : > { %v2029_v6 = vmul.f32 0.15, %v2023_v24  ;;  %v2031_v62 = vmul.f32 0.15, %v2025_v46 }
 0x7de   : > { %v4640_v55 = vadd.f32 %v2033_v57, %v3962_v40 }
 0x7df   : > { %v4656_v40 = vadd.f32 %v2029_v6, %v3978_v25  ;;  %v4668_v9 = vadd.f32 %v2031_v62, %v3990_v47  ;;  %v1944_v25 = vpop.f32.mrf.mxu0 }
 0x7e0   : > { %2090 = vrot.lane.b32.xlu0 %v4620_v51, %s3032_s25  ;;  %2144 = vrot.lane.b32.xlu1 %v4620_v51, %s3029_s22  ;;  %v1945_v47 = vadd.f32 %v1944_v25, %v1862_v59 }
 0x7e2   : > { %v2026_v5 = vmul.f32 %v1945_v47, %v3299_v41 }
 0x7e4   : > { %2126 = vrot.lane.b32.xlu1 %v4620_v51, %s3028_s21  ;;  %2154 = vrot.lane.b32.xlu0 %v4633_v38, %s3026_s19  ;;  %v2032_v58 = vmul.f32 0.15, %v2026_v5 }
 0x7e6   : > { %v4696_v15 = vadd.f32 %v2032_v58, %v4018_v28  ;;  %v2041_v28 = vld [vmem:[%s5390_s6 + $0x8] sm:$0xff] }
 0x7e7   : > { %2955 = vmatprep.mubr.msk.f32.mxu1 %vm861_vm10, %v2041_v28  ;;  %2953 = vmatprep.mubr.msk.f32.mxu0 %vm861_vm10, %v2041_v28 }
 0x7e8   : > { %2136 = vrot.lane.b32.xlu0 %v4633_v38, %s3029_s22  ;;  %2110 = vrot.lane.b32.xlu1 %v4640_v55, %s3030_s23 }
 0x7ec   : > { %2118 = vrot.lane.b32.xlu0 %v4633_v38, %s3028_s21  ;;  %2092 = vrot.lane.b32.xlu1 %v4640_v55, %s3032_s25 }
 0x7f0   : > { %2100 = vrot.lane.b32.xlu0 %v4633_v38, %s3030_s23  ;;  %2074 = vrot.lane.b32.xlu1 %v4640_v55, %s3031_s24 }
 0x7f4   : > { %2082 = vrot.lane.b32.xlu0 %v4633_v38, %s3032_s25  ;;  %2104 = vrot.lane.b32.xlu1 %v4656_v40, %s3030_s23 }
 0x7f8   : > { %2064 = vrot.lane.b32.xlu0 %v4633_v38, %s3031_s24  ;;  %2086 = vrot.lane.b32.xlu1 %v4656_v40, %s3032_s25 }
 0x7fc   : > { %2164 = vrot.lane.b32.xlu0 %v4640_v55, %s3026_s19  ;;  %2156 = vrot.lane.b32.xlu1 %v4668_v9, %s3026_s19 }
 0x800   : > { %2146 = vrot.lane.b32.xlu0 %v4640_v55, %s3029_s22  ;;  %2138 = vrot.lane.b32.xlu1 %v4668_v9, %s3029_s22 }
 0x804   : > { %2128 = vrot.lane.b32.xlu0 %v4640_v55, %s3028_s21  ;;  %2120 = vrot.lane.b32.xlu1 %v4668_v9, %s3028_s21 }
 0x808   : > { %2158 = vrot.lane.b32.xlu0 %v4656_v40, %s3026_s19  ;;  %2102 = vrot.lane.b32.xlu1 %v4668_v9, %s3030_s23 }
 0x80c   : > { %2140 = vrot.lane.b32.xlu0 %v4656_v40, %s3029_s22  ;;  %2084 = vrot.lane.b32.xlu1 %v4668_v9, %s3032_s25 }
 0x810   : > { %2122 = vrot.lane.b32.xlu0 %v4656_v40, %s3028_s21  ;;  %2066 = vrot.lane.b32.xlu1 %v4668_v9, %s3031_s24 }
 0x814   : > { %2072 = vrot.lane.b32.xlu0 %v4620_v51, %s3031_s24  ;;  %2160 = vrot.lane.b32.xlu1 %v4696_v15, %s3026_s19 }
 0x818   : > { %2046 = vrot.lane.b32.xlu0 %v4633_v38, %s3034_s28  ;;  %2142 = vrot.lane.b32.xlu1 %v4696_v15, %s3029_s22 }
 0x81c   : > { %2054 = vrot.lane.b32.xlu0 %v4620_v51, %s3034_s28  ;;  %2124 = vrot.lane.b32.xlu1 %v4696_v15, %s3028_s21 }
 0x820   : > { %2182 = vrot.lane.b32.xlu0 %v4640_v55, %s3027_s20  ;;  %2068 = vrot.lane.b32.xlu1 %v4656_v40, %s3031_s24 }
 0x824   : > { %2106 = vrot.lane.b32.xlu0 %v4696_v15, %s3030_s23  ;;  %2048 = vrot.lane.b32.xlu1 %v4668_v9, %s3034_s28 }
 0x828   : > { %2088 = vrot.lane.b32.xlu0 %v4696_v15, %s3032_s25  ;;  %2056 = vrot.lane.b32.xlu1 %v4640_v55, %s3034_s28 }
 0x82c   : > { %2070 = vrot.lane.b32.xlu0 %v4696_v15, %s3031_s24  ;;  %2050 = vrot.lane.b32.xlu1 %v4656_v40, %s3034_s28 }
 0x830   : > { %2052 = vrot.lane.b32.xlu0 %v4696_v15, %s3034_s28  ;;  %2174 = vrot.lane.b32.xlu1 %v4668_v9, %s3027_s20 }
 0x834   : > { %2176 = vrot.lane.b32.xlu0 %v4656_v40, %s3027_s20  ;;  %2178 = vrot.lane.b32.xlu1 %v4696_v15, %s3027_s20 }
 0x838   : > { %2172 = vrot.lane.b32.xlu0 %v4633_v38, %s3027_s20  ;;  %2180 = vrot.lane.b32.xlu1 %v4620_v51, %s3027_s20 }
 0x83c   : > { %2192 = vperm.xlu0 %3015, %v2044_v39   ;;  %2197 = vperm.xlu1 %3016, %v2045_v30  }
 0x84e   : > { %v4749_v60 = vpop.permute.xlu0 %2108  ;;  %v2163_v23 = vpop.permute.xlu1 %2162 }
 0x852   : > { %v4751_v32 = vpop.permute.xlu0 %2090  ;;  %v4753_v8 = vpop.permute.xlu1 %2144 }
 0x856   : > { %v2155_v43 = vpop.permute.xlu0 %2154  ;;  %v4755_v44 = vpop.permute.xlu1 %2126 }
 0x857   : > { %v2170_v33 = vsel %vm438_vm3, %v2163_v23, %v2155_v43 }
 0x85a   : > { %v2137_v12 = vpop.permute.xlu0 %2136  ;;  %v4757_v18 = vpop.permute.xlu1 %2110 }
 0x85b   : > { %v2152_v14 = vsel %vm428_vm5, %v4753_v8, %v2137_v12 }
 0x85e   : > { %v4759_v26 = vpop.permute.xlu0 %2118  ;;  %v4761_v52 = vpop.permute.xlu1 %2092 }
 0x85f   : > { %v2134_v63 = vsel %vm418_vm4, %v4755_v44, %v4759_v26 }
 0x862   : > { %v4763_v19 = vpop.permute.xlu0 %2100  ;;  %v4765_v3 = vpop.permute.xlu1 %2074 }
 0x866   : > { %v4767_v20 = vpop.permute.xlu0 %2082  ;;  %v4769_v7 = vpop.permute.xlu1 %2104 }
 0x86a   : > { %v4771_v56 = vpop.permute.xlu0 %2064  ;;  %v4773_v21 = vpop.permute.xlu1 %2086 }
 0x86e   : > { %v2165_v53 = vpop.permute.xlu0 %2164  ;;  %v2157_v50 = vpop.permute.xlu1 %2156 }
 0x86f   : > { %v2171_v16 = vsel %vm438_vm3, %v2165_v53, %v2157_v50 }
 0x870   : > { %2284 = vmatpush1.msra.mxu1 %v2171_v16 }
 0x871   : > { %2285 = vmatprep.subr.mxu1 %v3033_v4 }
 0x872   : > { %v2147_v49 = vpop.permute.xlu0 %2146  ;;  %2286 = vmatpush1.msra.mxu1 %v2170_v33  ;;  %v2139_v35 = vpop.permute.xlu1 %2138 }
 0x873   : > { %v2153_v1 = vsel %vm428_vm5, %v2147_v49, %v2139_v35  ;;  %2287 = vmatprep.subr.mxu1 %v3033_v4 }
 0x874   : > { %2288 = vmatpush1.msra.mxu1 %v2153_v1 }
 0x875   : > { %2289 = vmatprep.subr.mxu1 %v3033_v4 }
 0x876   : > { %v2129_v13 = vpop.permute.xlu0 %2128  ;;  %2290 = vmatpush1.msra.mxu1 %v2152_v14  ;;  %v2121_v59 = vpop.permute.xlu1 %2120 }
 0x877   : > { %v2135_v31 = vsel %vm418_vm4, %v2129_v13, %v2121_v59  ;;  %2291 = vmatprep.subr.mxu1 %v3033_v4 }
 0x878   : > { %2292 = vmatpush1.msra.mxu1 %v2135_v31 }
 0x879   : > { %2293 = vmatprep.subr.mxu1 %v3033_v4 }
 0x87a   : > { %v2159_v17 = vpop.permute.xlu0 %2158  ;;  %2294 = vmatpush1.msra.mxu1 %v2134_v63  ;;  %v2103_v22 = vpop.permute.xlu1 %2102 }
 0x87b   : > { %2295 = vmatprep.subr.mxu1 %v3033_v4  ;;  %v2168_v11 = vsel %vm438_vm3, %v2155_v43, %v2159_v17  ;;  %v2117_v33 = vsel %vm408_vm6, %v4757_v18, %v2103_v22 }
 0x87c   : > { %2296 = vmatpush1.msra.mxu1 %v4640_v55 }
 0x87d   : > { %2297 = vmatprep.subr.mxu1 %v3033_v4 }
 0x87e   : > { %v2141_v54 = vpop.permute.xlu0 %2140  ;;  %2298 = vmatpush1.msra.mxu1 %v4620_v51  ;;  %v2085_v57 = vpop.permute.xlu1 %2084  ;;  %v2166_v51 = vsel %vm438_vm3, %v2159_v17, %v2163_v23 }
 0x87f   : > { %2299 = vmatprep.subr.mxu1 %v3033_v4  ;;  %v2148_v5 = vsel %vm428_vm5, %v2141_v54, %v4753_v8  ;;  %v2150_v58 = vsel %vm428_vm5, %v2137_v12, %v2141_v54 }
 0x882   : > { %v2123_v2 = vpop.permute.xlu0 %2122  ;;  %v4800_v0 = vpop.permute.xlu1 %2066 }
 0x883   : > { %v2130_v8 = vsel %vm418_vm4, %v2123_v2, %v4755_v44  ;;  %v2132_v43 = vsel %vm418_vm4, %v4759_v26, %v2123_v2 }
 0x886   : > { %v4802_v24 = vpop.permute.xlu0 %2072  ;;  %v2161_v61 = vpop.permute.xlu1 %2160 }
 0x887   : > { %v2169_v6 = vsel %vm438_vm3, %v2157_v50, %v2161_v61  ;;  %v2167_v55 = vsel %vm438_vm3, %v2161_v61, %v2165_v53  ;;  %v2080_v31 = vsel %vm388_vm8, %v4802_v24, %v4771_v56 }
 0x888   : > { %2206 = vmatprep.subr.mxu0 %v2167_v55 }
 0x889   : > { %2207 = vmatpush1.msra.mxu0 %v2169_v6 }
 0x88a   : > { %v4812_v46 = vpop.permute.xlu0 %2046  ;;  %2208 = vmatprep.subr.mxu0 %v2166_v51  ;;  %v2143_v62 = vpop.permute.xlu1 %2142 }
 0x88b   : > { %v2151_v25 = vsel %vm428_vm5, %v2139_v35, %v2143_v62  ;;  %2209 = vmatpush1.msra.mxu0 %v2168_v11  ;;  %v2149_v47 = vsel %vm428_vm5, %v2143_v62, %v2147_v49 }
 0x88c   : > { %2210 = vmatprep.subr.mxu0 %v2149_v47 }
 0x88d   : > { %2211 = vmatpush1.msra.mxu0 %v2151_v25 }
 0x88e   : > { %v4823_v28 = vpop.permute.xlu0 %2054  ;;  %2212 = vmatprep.subr.mxu0 %v2148_v5  ;;  %v2125_v39 = vpop.permute.xlu1 %2124  ;;  %v2043_v5 = vld [vmem:[%s5390_s6 + $0x18] sm:$0xff] }
 0x88f   : > { %v2133_v30 = vsel %vm418_vm4, %v2121_v59, %v2125_v39  ;;  %2213 = vmatpush1.msra.mxu0 %v2150_v58  ;;  %v2131_v23 = vsel %vm418_vm4, %v2125_v39, %v2129_v13  ;;  %v2062_v2 = vsel %vm378_vm9, %v4823_v28, %v4812_v46  ;;  %v2042_v58 = vld [vmem:[%s5390_s6 + $0x10] sm:$0xff] }
 0x890   : > { %2214 = vmatprep.subr.mxu0 %v2131_v23 }
 0x891   : > { %2215 = vmatpush1.msra.mxu0 %v2133_v30 }
 0x892   : > { %v4835_v12 = vpop.permute.xlu0 %2182  ;;  %2216 = vmatprep.subr.mxu0 %v2130_v8  ;;  %v2069_v53 = vpop.permute.xlu1 %2068 }
 0x893   : > { %2217 = vmatpush1.msra.mxu0 %v2132_v43  ;;  %v2078_v59 = vsel %vm388_vm8, %v4771_v56, %v2069_v53 }
 0x894   : > { %2218 = vmatprep.subr.mxu0 %v4696_v15 }
 0x895   : > { %2219 = vmatpush1.msra.mxu0 %v4668_v9  ;;  %v2116_v9 = vsel %vm408_vm6, %v4749_v60, %v4763_v19 }
 0x896   : > { %v2107_v50 = vpop.permute.xlu0 %2106  ;;  %2220 = vmatprep.subr.mxu0 %v4656_v40  ;;  %v2049_v16 = vpop.permute.xlu1 %2048  ;;  %v2112_v40 = vsel %vm408_vm6, %v4769_v7, %v4749_v60  ;;  %v2094_v60 = vsel %vm398_vm7, %v4773_v21, %v4751_v32 }
 0x897   : > { %v2113_v44 = vsel %vm408_vm6, %v2107_v50, %v4757_v18  ;;  %2221 = vmatpush1.msra.mxu0 %v4633_v38  ;;  %v2115_v26 = vsel %vm408_vm6, %v2103_v22, %v2107_v50  ;;  %v2114_v38 = vsel %vm408_vm6, %v4763_v19, %v4769_v7  ;;  %v2099_v7 = vsel %vm398_vm7, %v4761_v52, %v2085_v57 }
 0x898   : > { %2222 = vmatprep.subr.mxu0 %v2115_v26  ;;  %2300 = vmatpush1.msra.mxu1 %v2113_v44  ;;  %v2096_v19 = vsel %vm398_vm7, %v4767_v20, %v4773_v21 }
 0x899   : > { %2223 = vmatpush1.msra.mxu0 %v2117_v33  ;;  %2301 = vmatprep.subr.mxu1 %v3033_v4 }
 0x89a   : > { %v2089_v15 = vpop.permute.xlu0 %2088  ;;  %2224 = vmatprep.subr.mxu0 %v2114_v38  ;;  %2302 = vmatpush1.msra.mxu1 %v2112_v40  ;;  %v2057_v18 = vpop.permute.xlu1 %2056  ;;  %v2364_v38 = vmul.f32 0.15, %v3282_v36 }
 0x89b   : > { %v2095_v49 = vsel %vm398_vm7, %v2089_v15, %v4761_v52  ;;  %2225 = vmatpush1.msra.mxu0 %v2116_v9  ;;  %2303 = vmatprep.subr.mxu1 %v3033_v4  ;;  %v2097_v35 = vsel %vm398_vm7, %v2085_v57, %v2089_v15  ;;  %v2098_v52 = vsel %vm398_vm7, %v4751_v32, %v4767_v20  ;;  %v2369_v15 = vmul.f32 0.15, %v3269_v29 }
 0x89c   : > { %2226 = vmatprep.subr.mxu0 %v2097_v35  ;;  %2304 = vmatpush1.msra.mxu1 %v2095_v49  ;;  %v2081_v32 = vsel %vm388_vm8, %v4765_v3, %v4800_v0  ;;  %v2076_v20 = vsel %vm388_vm8, %v2069_v53, %v4802_v24  ;;  %v2063_v54 = vsel %vm378_vm9, %v2057_v18, %v2049_v16  ;;  %v2365_v35 = vmul.f32 0.15, %v3306_v42 }
 0x89d   : > { %2227 = vmatpush1.msra.mxu0 %v2099_v7  ;;  %2305 = vmatprep.subr.mxu1 %v3033_v4 }
 0x89e   : > { %v2071_v1 = vpop.permute.xlu0 %2070  ;;  %2228 = vmatprep.subr.mxu0 %v2096_v19  ;;  %2306 = vmatpush1.msra.mxu1 %v2094_v60  ;;  %v2051_v14 = vpop.permute.xlu1 %2050 }
 0x89f   : > { %v2077_v13 = vsel %vm388_vm8, %v2071_v1, %v4765_v3  ;;  %2229 = vmatpush1.msra.mxu0 %v2098_v52  ;;  %2307 = vmatprep.subr.mxu1 %v3033_v4  ;;  %v2079_v21 = vsel %vm388_vm8, %v4800_v0, %v2071_v1  ;;  %v2058_v56 = vsel %vm378_vm9, %v2051_v14, %v4823_v28  ;;  %v2367_v52 = vmul.f32 0.15, %v3317_v45 }
 0x8a0   : > { %2230 = vmatprep.subr.mxu0 %v2079_v21  ;;  %2308 = vmatpush1.msra.mxu1 %v2077_v13  ;;  %v2060_v57 = vsel %vm378_vm9, %v4812_v46, %v2051_v14  ;;  %v2040_v46 = vld [vmem:[%s5390_s6] sm:$0xff]  ;;  %v2368_v14 = vmul.f32 0.15, %v3344_v48  ;;  %v2393_v48 = vld [vmem:[%s5393_s9 + $0x8] sm:$0xff] }
 0x8a1   : > { %2231 = vmatpush1.msra.mxu0 %v2081_v32  ;;  %2309 = vmatprep.subr.mxu1 %v3033_v4  ;;  %v2392_v21 = vld [vmem:[%s5393_s9] sm:$0xff]  ;;  %v2395_v32 = vld [vmem:[%s5393_s9 + $0x18] sm:$0xff] }
 0x8a2   : > { %v2053_v63 = vpop.permute.xlu0 %2052  ;;  %2232 = vmatprep.subr.mxu0 %v2078_v59  ;;  %2310 = vmatpush1.msra.mxu1 %v2076_v20  ;;  %v2175_v3 = vpop.permute.xlu1 %2174  ;;  %v2394_v20 = vld [vmem:[%s5393_s9 + $0x10] sm:$0xff]  ;;  %v2397_v59 = vld [vmem:[%s5393_s9 + $0x28] sm:$0xff] }
 0x8a3   : > { %v2059_v17 = vsel %vm378_vm9, %v2053_v63, %v2057_v18  ;;  %2233 = vmatpush1.msra.mxu0 %v2080_v31  ;;  %2311 = vmatprep.subr.mxu1 %v3033_v4  ;;  %v2061_v22 = vsel %vm378_vm9, %v2049_v16, %v2053_v63  ;;  %v2189_v61 = vsel %vm448_vm1, %v4835_v12, %v2175_v3  ;;  %v2396_v31 = vld [vmem:[%s5393_s9 + $0x20] sm:$0xff]  ;;  %v2399_v63 = vld [vmem:[%s5393_s9 + $0x38] sm:$0xff] }
 0x8a4   : > { %2234 = vmatprep.subr.mxu0 %v2061_v22  ;;  %2312 = vmatpush1.msra.mxu1 %v2059_v17 }
 0x8a5   : > { %2235 = vmatpush1.msra.mxu0 %v2063_v54  ;;  %2313 = vmatprep.subr.mxu1 %v3033_v4 }
 0x8a6   : > { %v2177_v0 = vpop.permute.xlu0 %2176  ;;  %2236 = vmatprep.subr.mxu0 %v2060_v57  ;;  %2314 = vmatpush1.msra.mxu1 %v2058_v56  ;;  %v2179_v24 = vpop.permute.xlu1 %2178 }
 0x8a7   : > { %v2187_v6 = vsel %vm448_vm1, %v2175_v3, %v2179_v24  ;;  %2237 = vmatpush1.msra.mxu0 %v2062_v2  ;;  %2343 = vmatprep.subr.mxu1 %v3033_v4  ;;  %v2185_v55 = vsel %vm448_vm1, %v2179_v24, %v4835_v12  ;;  %v2366_v12 = vmul.f32 0.15, %v3289_v37  ;;  %v2398_v3 = vld [vmem:[%s5393_s9 + $0x30] sm:$0xff] }
 0x8a8   : > { %2266 = vmatprep.subr.mxu0 %v2185_v55  ;;  %2344 = vmatpush2.msra.mxu1 %v2189_v61 }
 0x8a9   : > { %2267 = vmatpush2.msra.mxu0 %v2187_v6  ;;  %2345 = vmatprep.subr.mxu1 %v3033_v4 }
 0x8aa   : > { %v2173_v51 = vpop.permute.xlu0 %2172  ;;  %v2181_v11 = vpop.permute.xlu1 %2180 }
 0x8ab   : > { %v2186_v62 = vsel %vm448_vm1, %v2173_v51, %v2177_v0  ;;  %v2188_v25 = vsel %vm448_vm1, %v2181_v11, %v2173_v51  ;;  %v2184_v47 = vsel %vm448_vm1, %v2177_v0, %v2181_v11 }
 0x8ac   : > { %2268 = vmatprep.subr.mxu0 %v2184_v47  ;;  %2346 = vmatpush2.msra.mxu1 %v2188_v25 }
 0x8ad   : > { %2269 = vmatpush2.msra.mxu0 %v2186_v62  ;;  %2348 = vmatmul.mubr.f32.vlgmr.msra.gmra.mxu1 %v2040_v46 }
 0x8ae   : > { %2271 = vmatmul.mubr.f32.vlgmr.msra.gmra.mxu0 %v2040_v46  ;;  %2956 = vmatprep.mubr.msk.f32.mxu1 %vm861_vm10, %v2043_v5 }
 0x8af   : > { %2954 = vmatprep.mubr.msk.f32.mxu0 %vm861_vm10, %v2043_v5  ;;  %2721 = vmatprep.subr.mxu1 %v3033_v4 }
 0x8b1   : > { %2353 = vmatmul.mubr.f32.gmra.mxu1 %v2042_v58 }
 0x8b2   : > { %2277 = vmatmul.mubr.f32.gmra.mxu0 %v2042_v58 }
 0x8b7   : > { %v2193_v28 = vpop.permute.xlu0 %2192  ;;  %v2198_v26 = vpop.permute.xlu1 %2197 }
 0x96d   : > { %v2349_v39 = vpop.f32.mrf.mxu1 }
 0x96e   : > { %v2350_v30 = vadd.f32 %v2349_v39, %v2193_v28  ;;  %v2272_v23 = vpop.f32.mrf.mxu0 }
 0x96f   : > { %v2351_v8 = vpop.f32.mrf.mxu1  ;;  %v2273_v16 = vadd.f32 %v2272_v23, %v2193_v28 }
 0x970   : > { %v2360_v43 = vmul.f32 %v2350_v30, %v3266_v27  ;;  %v2274_v36 = vpop.f32.mrf.mxu0 }
 0x971   : > { %v2354_v53 = vpop.f32.mrf.mxu1  ;;  %v2358_v33 = vmul.f32 %v2273_v16, %v3279_v34  ;;  %v2275_v49 = vadd.f32 %v2274_v36, %v2193_v28 }
 0x972   : > { %v4954_v50 = vadd.f32 %v2366_v12, %v2360_v43  ;;  %v2355_v40 = vadd.f32 %v2354_v53, %v2198_v26  ;;  %v2278_v29 = vpop.f32.mrf.mxu0 }
 0x973   : > { %v2356_v44 = vpop.f32.mrf.mxu1  ;;  %v4966_v37 = vadd.f32 %v2364_v38, %v2358_v33  ;;  %v2279_v60 = vadd.f32 %v2278_v29, %v2198_v26 }
 0x974   : > { %2462 = vrot.lane.b32.xlu0 %v4954_v50, %s3030_s23  ;;  %2516 = vrot.lane.b32.xlu1 %v4954_v50, %s3026_s19  ;;  %v2363_v9 = vmul.f32 %v2355_v40, %v3266_v27  ;;  %v2359_v27 = vmul.f32 %v2275_v49, %v3299_v41 }
 0x975   : > { %v2361_v19 = vmul.f32 %v2279_v60, %v3279_v34  ;;  %v2280_v34 = vpop.f32.mrf.mxu0 }
 0x976   : > { %v4974_v18 = vadd.f32 %v2369_v15, %v2363_v9  ;;  %v4990_v7 = vadd.f32 %v2365_v35, %v2359_v27  ;;  %v2281_v45 = vadd.f32 %v2280_v34, %v2198_v26 }
 0x977   : > { %v5002_v42 = vadd.f32 %v2367_v52, %v2361_v19 }
 0x978   : > { %2444 = vrot.lane.b32.xlu0 %v4954_v50, %s3032_s25  ;;  %2498 = vrot.lane.b32.xlu1 %v4954_v50, %s3029_s22  ;;  %v2362_v1 = vmul.f32 %v2281_v45, %v3299_v41  ;;  %v2377_v41 = vld [vmem:[%s5392_s8 + $0x8] sm:$0xff] }
 0x979   : > { %2965 = vmatprep.mubr.msk.f32.mxu1 %vm861_vm10, %v2377_v41  ;;  %2957 = vmatprep.mubr.msk.f32.mxu0 %vm861_vm10, %v2377_v41 }
 0x97a   : > { %v5030_v13 = vadd.f32 %v2368_v14, %v2362_v1 }
 0x97c   : > { %2480 = vrot.lane.b32.xlu1 %v4954_v50, %s3028_s21  ;;  %2508 = vrot.lane.b32.xlu0 %v4966_v37, %s3026_s19 }
 0x980   : > { %2490 = vrot.lane.b32.xlu0 %v4966_v37, %s3029_s22  ;;  %2464 = vrot.lane.b32.xlu1 %v4974_v18, %s3030_s23 }
 0x984   : > { %2472 = vrot.lane.b32.xlu0 %v4966_v37, %s3028_s21  ;;  %2446 = vrot.lane.b32.xlu1 %v4974_v18, %s3032_s25 }
 0x988   : > { %2454 = vrot.lane.b32.xlu0 %v4966_v37, %s3030_s23  ;;  %2428 = vrot.lane.b32.xlu1 %v4974_v18, %s3031_s24 }
 0x98c   : > { %2436 = vrot.lane.b32.xlu0 %v4966_v37, %s3032_s25  ;;  %2458 = vrot.lane.b32.xlu1 %v4990_v7, %s3030_s23 }
 0x990   : > { %2418 = vrot.lane.b32.xlu0 %v4966_v37, %s3031_s24  ;;  %2440 = vrot.lane.b32.xlu1 %v4990_v7, %s3032_s25 }
 0x994   : > { %2518 = vrot.lane.b32.xlu0 %v4974_v18, %s3026_s19  ;;  %2510 = vrot.lane.b32.xlu1 %v5002_v42, %s3026_s19 }
 0x998   : > { %2500 = vrot.lane.b32.xlu0 %v4974_v18, %s3029_s22  ;;  %2492 = vrot.lane.b32.xlu1 %v5002_v42, %s3029_s22 }
 0x99c   : > { %2482 = vrot.lane.b32.xlu0 %v4974_v18, %s3028_s21  ;;  %2474 = vrot.lane.b32.xlu1 %v5002_v42, %s3028_s21 }
 0x9a0   : > { %2512 = vrot.lane.b32.xlu0 %v4990_v7, %s3026_s19  ;;  %2456 = vrot.lane.b32.xlu1 %v5002_v42, %s3030_s23 }
 0x9a4   : > { %2494 = vrot.lane.b32.xlu0 %v4990_v7, %s3029_s22  ;;  %2438 = vrot.lane.b32.xlu1 %v5002_v42, %s3032_s25 }
 0x9a8   : > { %2476 = vrot.lane.b32.xlu0 %v4990_v7, %s3028_s21  ;;  %2420 = vrot.lane.b32.xlu1 %v5002_v42, %s3031_s24 }
 0x9ac   : > { %2426 = vrot.lane.b32.xlu0 %v4954_v50, %s3031_s24  ;;  %2514 = vrot.lane.b32.xlu1 %v5030_v13, %s3026_s19 }
 0x9b0   : > { %2400 = vrot.lane.b32.xlu0 %v4966_v37, %s3034_s28  ;;  %2496 = vrot.lane.b32.xlu1 %v5030_v13, %s3029_s22 }
 0x9b4   : > { %2408 = vrot.lane.b32.xlu0 %v4954_v50, %s3034_s28  ;;  %2478 = vrot.lane.b32.xlu1 %v5030_v13, %s3028_s21 }
 0x9b8   : > { %2536 = vrot.lane.b32.xlu0 %v4974_v18, %s3027_s20  ;;  %2422 = vrot.lane.b32.xlu1 %v4990_v7, %s3031_s24 }
 0x9bc   : > { %2460 = vrot.lane.b32.xlu0 %v5030_v13, %s3030_s23  ;;  %2402 = vrot.lane.b32.xlu1 %v5002_v42, %s3034_s28 }
 0x9c0   : > { %2442 = vrot.lane.b32.xlu0 %v5030_v13, %s3032_s25  ;;  %2410 = vrot.lane.b32.xlu1 %v4974_v18, %s3034_s28 }
 0x9c4   : > { %2424 = vrot.lane.b32.xlu0 %v5030_v13, %s3031_s24  ;;  %2404 = vrot.lane.b32.xlu1 %v4990_v7, %s3034_s28 }
 0x9c8   : > { %2406 = vrot.lane.b32.xlu0 %v5030_v13, %s3034_s28  ;;  %2528 = vrot.lane.b32.xlu1 %v5002_v42, %s3027_s20 }
 0x9cc   : > { %2530 = vrot.lane.b32.xlu0 %v4990_v7, %s3027_s20  ;;  %2532 = vrot.lane.b32.xlu1 %v5030_v13, %s3027_s20 }
 0x9d0   : > { %2526 = vrot.lane.b32.xlu0 %v4966_v37, %s3027_s20  ;;  %2534 = vrot.lane.b32.xlu1 %v4954_v50, %s3027_s20 }
 0x9d4   : > { %2551 = vperm.xlu0 %3015, %v2393_v48   ;;  %2546 = vperm.xlu1 %3016, %v2392_v21  }
 0x9d8   : > { %2561 = vperm.xlu0 %3015, %v2395_v32   ;;  %2556 = vperm.xlu1 %3016, %v2394_v20  }
 0x9dc   : > { %2571 = vperm.xlu0 %3015, %v2397_v59   ;;  %2566 = vperm.xlu1 %3016, %v2396_v31  }
 0x9e0   : > { %2581 = vperm.xlu0 %3015, %v2399_v63   ;;  %2576 = vperm.xlu1 %3016, %v2398_v3  }
 0x9e6   : > { %v5101_v17 = vpop.permute.xlu0 %2462  ;;  %v2517_v22 = vpop.permute.xlu1 %2516 }
 0x9ea   : > { %v5103_v54 = vpop.permute.xlu0 %2444  ;;  %v5105_v56 = vpop.permute.xlu1 %2498 }
 0x9ee   : > { %v2509_v57 = vpop.permute.xlu0 %2508  ;;  %v5107_v2 = vpop.permute.xlu1 %2480 }
 0x9ef   : > { %v2524_v28 = vsel %vm438_vm3, %v2517_v22, %v2509_v57 }
 0x9f2   : > { %v2491_v0 = vpop.permute.xlu0 %2490  ;;  %v5109_v24 = vpop.permute.xlu1 %2464 }
 0x9f3   : > { %v2506_v8 = vsel %vm428_vm5, %v5105_v56, %v2491_v0 }
 0x9f6   : > { %v5111_v61 = vpop.permute.xlu0 %2472  ;;  %v5113_v6 = vpop.permute.xlu1 %2446 }
 0x9f7   : > { %v2488_v16 = vsel %vm418_vm4, %v5107_v2, %v5111_v61 }
 0x9fa   : > { %v5115_v55 = vpop.permute.xlu0 %2454  ;;  %v5117_v51 = vpop.permute.xlu1 %2428 }
 0x9fe   : > { %v5119_v11 = vpop.permute.xlu0 %2436  ;;  %v5121_v46 = vpop.permute.xlu1 %2458 }
 0xa02   : > { %v5123_v62 = vpop.permute.xlu0 %2418  ;;  %v5125_v25 = vpop.permute.xlu1 %2440 }
 0xa06   : > { %v2519_v47 = vpop.permute.xlu0 %2518  ;;  %v2511_v5 = vpop.permute.xlu1 %2510 }
 0xa07   : > { %v2525_v58 = vsel %vm438_vm3, %v2519_v47, %v2511_v5 }
 0xa08   : > { %2722 = vmatpush1.msra.mxu1 %v2525_v58 }
 0xa09   : > { %2723 = vmatprep.subr.mxu1 %v3033_v4 }
 0xa0a   : > { %v2501_v39 = vpop.permute.xlu0 %2500  ;;  %2724 = vmatpush1.msra.mxu1 %v2524_v28  ;;  %v2493_v30 = vpop.permute.xlu1 %2492 }
 0xa0b   : > { %v2507_v23 = vsel %vm428_vm5, %v2501_v39, %v2493_v30  ;;  %2725 = vmatprep.subr.mxu1 %v3033_v4 }
 0xa0c   : > { %2726 = vmatpush1.msra.mxu1 %v2507_v23 }
 0xa0d   : > { %2727 = vmatprep.subr.mxu1 %v3033_v4 }
 0xa0e   : > { %v2483_v43 = vpop.permute.xlu0 %2482  ;;  %2728 = vmatpush1.msra.mxu1 %v2506_v8  ;;  %v2475_v12 = vpop.permute.xlu1 %2474 }
 0xa0f   : > { %v2489_v53 = vsel %vm418_vm4, %v2483_v43, %v2475_v12  ;;  %2729 = vmatprep.subr.mxu1 %v3033_v4 }
 0xa10   : > { %2730 = vmatpush1.msra.mxu1 %v2489_v53 }
 0xa11   : > { %2731 = vmatprep.subr.mxu1 %v3033_v4 }
 0xa12   : > { %v2513_v44 = vpop.permute.xlu0 %2512  ;;  %2732 = vmatpush1.msra.mxu1 %v2488_v16  ;;  %v2457_v26 = vpop.permute.xlu1 %2456 }
 0xa13   : > { %2733 = vmatprep.subr.mxu1 %v3033_v4  ;;  %v2522_v27 = vsel %vm438_vm3, %v2509_v57, %v2513_v44 }
 0xa14   : > { %2734 = vmatpush1.msra.mxu1 %v4974_v18 }
 0xa15   : > { %2735 = vmatprep.subr.mxu1 %v3033_v4 }
 0xa16   : > { %v2495_v33 = vpop.permute.xlu0 %2494  ;;  %2736 = vmatpush1.msra.mxu1 %v4954_v50  ;;  %v2439_v40 = vpop.permute.xlu1 %2438  ;;  %v2520_v50 = vsel %vm438_vm3, %v2513_v44, %v2517_v22  ;;  %v2471_v22 = vsel %vm408_vm6, %v5109_v24, %v2457_v26 }
 0xa17   : > { %2737 = vmatprep.subr.mxu1 %v3033_v4  ;;  %v2502_v52 = vsel %vm428_vm5, %v2495_v33, %v5105_v56  ;;  %v2504_v34 = vsel %vm428_vm5, %v2491_v0, %v2495_v33  ;;  %v2453_v0 = vsel %vm398_vm7, %v5113_v6, %v2439_v40 }
 0xa1a   : > { %v2477_v38 = vpop.permute.xlu0 %2476  ;;  %v5152_v9 = vpop.permute.xlu1 %2420 }
 0xa1b   : > { %v2484_v48 = vsel %vm418_vm4, %v2477_v38, %v5107_v2  ;;  %v2486_v21 = vsel %vm418_vm4, %v5111_v61, %v2477_v38  ;;  %v2452_v61 = vsel %vm398_vm7, %v5103_v54, %v5119_v11 }
 0xa1e   : > { %v5154_v15 = vpop.permute.xlu0 %2426  ;;  %v2515_v36 = vpop.permute.xlu1 %2514 }
 0xa1f   : > { %v2523_v49 = vsel %vm438_vm3, %v2511_v5, %v2515_v36  ;;  %v2521_v18 = vsel %vm438_vm3, %v2515_v36, %v2519_v47  ;;  %v2434_v5 = vsel %vm388_vm8, %v5154_v15, %v5123_v62  ;;  %v2379_v36 = vld [vmem:[%s5392_s8 + $0x18] sm:$0xff] }
 0xa20   : > { %2608 = vmatprep.subr.mxu0 %v2521_v18  ;;  %v2383_v18 = vld [vmem:[%s5392_s8 + $0x38] sm:$0xff] }
 0xa21   : > { %2609 = vmatpush1.msra.mxu0 %v2523_v49  ;;  %v2380_v49 = vld [vmem:[%s5392_s8 + $0x20] sm:$0xff] }
 0xa22   : > { %v5164_v29 = vpop.permute.xlu0 %2400  ;;  %2610 = vmatprep.subr.mxu0 %v2520_v50  ;;  %v2497_v35 = vpop.permute.xlu1 %2496  ;;  %v2382_v50 = vld [vmem:[%s5392_s8 + $0x30] sm:$0xff] }
 0xa23   : > { %v2505_v60 = vsel %vm428_vm5, %v2493_v30, %v2497_v35  ;;  %2611 = vmatpush1.msra.mxu0 %v2522_v27  ;;  %v2503_v19 = vsel %vm428_vm5, %v2497_v35, %v2501_v39  ;;  %v2385_v27 = vld [vmem:[%s5392_s8 + $0x48] sm:$0xff]  ;;  %v2387_v35 = vld [vmem:[%s5392_s8 + $0x58] sm:$0xff] }
 0xa24   : > { %2612 = vmatprep.subr.mxu0 %v2503_v19  ;;  %v2389_v19 = vld [vmem:[%s5392_s8 + $0x68] sm:$0xff] }
 0xa25   : > { %2613 = vmatpush1.msra.mxu0 %v2505_v60  ;;  %v2386_v60 = vld [vmem:[%s5392_s8 + $0x50] sm:$0xff] }
 0xa26   : > { %v5175_v45 = vpop.permute.xlu0 %2408  ;;  %2614 = vmatprep.subr.mxu0 %v2502_v52  ;;  %v2479_v1 = vpop.permute.xlu1 %2478  ;;  %v2388_v52 = vld [vmem:[%s5392_s8 + $0x60] sm:$0xff] }
 0xa27   : > { %v2487_v14 = vsel %vm418_vm4, %v2475_v12, %v2479_v1  ;;  %2615 = vmatpush1.msra.mxu0 %v2504_v34  ;;  %v2485_v41 = vsel %vm418_vm4, %v2479_v1, %v2483_v43  ;;  %v2416_v8 = vsel %vm378_vm9, %v5175_v45, %v5164_v29  ;;  %v2391_v34 = vld [vmem:[%s5392_s8 + $0x78] sm:$0xff] }
 0xa28   : > { %2616 = vmatprep.subr.mxu0 %v2485_v41 }
 0xa29   : > { %2617 = vmatpush1.msra.mxu0 %v2487_v14 }
 0xa2a   : > { %v5187_v32 = vpop.permute.xlu0 %2536  ;;  %2618 = vmatprep.subr.mxu0 %v2484_v48  ;;  %v2423_v20 = vpop.permute.xlu1 %2422 }
 0xa2b   : > { %2619 = vmatpush1.msra.mxu0 %v2486_v21  ;;  %v2432_v47 = vsel %vm388_vm8, %v5123_v62, %v2423_v20 }
 0xa2c   : > { %2620 = vmatprep.subr.mxu0 %v5030_v13 }
 0xa2d   : > { %2621 = vmatpush1.msra.mxu0 %v5002_v42  ;;  %v2470_v42 = vsel %vm408_vm6, %v5101_v17, %v5115_v55 }
 0xa2e   : > { %v2461_v59 = vpop.permute.xlu0 %2460  ;;  %2622 = vmatprep.subr.mxu0 %v4990_v7  ;;  %v2403_v31 = vpop.permute.xlu1 %2402  ;;  %v2466_v7 = vsel %vm408_vm6, %v5121_v46, %v5101_v17  ;;  %v2448_v17 = vsel %vm398_vm7, %v5125_v25, %v5103_v54  ;;  %v2435_v54 = vsel %vm388_vm8, %v5117_v51, %v5152_v9 }
 0xa2f   : > { %v2467_v63 = vsel %vm408_vm6, %v2461_v59, %v5109_v24  ;;  %2623 = vmatpush1.msra.mxu0 %v4966_v37  ;;  %v2469_v3 = vsel %vm408_vm6, %v2457_v26, %v2461_v59  ;;  %v2468_v37 = vsel %vm408_vm6, %v5115_v55, %v5121_v46  ;;  %v2450_v24 = vsel %vm398_vm7, %v5119_v11, %v5125_v25 }
 0xa30   : > { %2624 = vmatprep.subr.mxu0 %v2469_v3  ;;  %2738 = vmatpush1.msra.mxu1 %v2467_v63  ;;  %v2430_v11 = vsel %vm388_vm8, %v2423_v20, %v5154_v15 }
 0xa31   : > { %2625 = vmatpush1.msra.mxu0 %v2471_v22  ;;  %2739 = vmatprep.subr.mxu1 %v3033_v4 }
 0xa32   : > { %v2443_v13 = vpop.permute.xlu0 %2442  ;;  %2626 = vmatprep.subr.mxu0 %v2468_v37  ;;  %2740 = vmatpush1.msra.mxu1 %v2466_v7  ;;  %v2411_v56 = vpop.permute.xlu1 %2410 }
 0xa33   : > { %v2449_v57 = vsel %vm398_vm7, %v2443_v13, %v5113_v6  ;;  %2627 = vmatpush1.msra.mxu0 %v2470_v42  ;;  %2741 = vmatprep.subr.mxu1 %v3033_v4  ;;  %v2451_v2 = vsel %vm398_vm7, %v2439_v40, %v2443_v13  ;;  %v2417_v30 = vsel %vm378_vm9, %v2411_v56, %v2403_v31  ;;  %v2376_v40 = vld [vmem:[%s5392_s8] sm:$0xff] }
 0xa34   : > { %2628 = vmatprep.subr.mxu0 %v2451_v2  ;;  %2742 = vmatpush1.msra.mxu1 %v2449_v57 }
 0xa35   : > { %2629 = vmatpush1.msra.mxu0 %v2453_v0  ;;  %2743 = vmatprep.subr.mxu1 %v3033_v4 }
 0xa36   : > { %v2425_v6 = vpop.permute.xlu0 %2424  ;;  %2630 = vmatprep.subr.mxu0 %v2450_v24  ;;  %2744 = vmatpush1.msra.mxu1 %v2448_v17  ;;  %v2405_v55 = vpop.permute.xlu1 %2404 }
 0xa37   : > { %v2431_v46 = vsel %vm388_vm8, %v2425_v6, %v5117_v51  ;;  %2631 = vmatpush1.msra.mxu0 %v2452_v61  ;;  %2745 = vmatprep.subr.mxu1 %v3033_v4  ;;  %v2433_v25 = vsel %vm388_vm8, %v5152_v9, %v2425_v6  ;;  %v2412_v62 = vsel %vm378_vm9, %v2405_v55, %v5175_v45  ;;  %v2390_v45 = vld [vmem:[%s5392_s8 + $0x70] sm:$0xff] }
 0xa38   : > { %2632 = vmatprep.subr.mxu0 %v2433_v25  ;;  %2746 = vmatpush1.msra.mxu1 %v2431_v46  ;;  %v2414_v23 = vsel %vm378_vm9, %v5164_v29, %v2405_v55  ;;  %v2384_v29 = vld [vmem:[%s5392_s8 + $0x40] sm:$0xff] }
 0xa39   : > { %2633 = vmatpush1.msra.mxu0 %v2435_v54  ;;  %2747 = vmatprep.subr.mxu1 %v3033_v4 }
 0xa3a   : > { %v2407_v58 = vpop.permute.xlu0 %2406  ;;  %2634 = vmatprep.subr.mxu0 %v2432_v47  ;;  %2748 = vmatpush1.msra.mxu1 %v2430_v11  ;;  %v2529_v51 = vpop.permute.xlu1 %2528 }
 0xa3b   : > { %v2413_v28 = vsel %vm378_vm9, %v2407_v58, %v2411_v56  ;;  %2635 = vmatpush1.msra.mxu0 %v2434_v5  ;;  %2749 = vmatprep.subr.mxu1 %v3033_v4  ;;  %v2415_v39 = vsel %vm378_vm9, %v2403_v31, %v2407_v58  ;;  %v2543_v53 = vsel %vm448_vm1, %v5187_v32, %v2529_v51 }
 0xa3c   : > { %2636 = vmatprep.subr.mxu0 %v2415_v39  ;;  %2750 = vmatpush1.msra.mxu1 %v2413_v28 }
 0xa3d   : > { %2637 = vmatpush1.msra.mxu0 %v2417_v30  ;;  %2751 = vmatprep.subr.mxu1 %v3033_v4 }
 0xa3e   : > { %v2531_v43 = vpop.permute.xlu0 %2530  ;;  %2638 = vmatprep.subr.mxu0 %v2414_v23  ;;  %2752 = vmatpush1.msra.mxu1 %v2412_v62  ;;  %v2533_v12 = vpop.permute.xlu1 %2532 }
 0xa3f   : > { %v2541_v16 = vsel %vm448_vm1, %v2529_v51, %v2533_v12  ;;  %2639 = vmatpush1.msra.mxu0 %v2416_v8  ;;  %2781 = vmatprep.subr.mxu1 %v3033_v4  ;;  %v2539_v44 = vsel %vm448_vm1, %v2533_v12, %v5187_v32 }
 0xa40   : > { %2668 = vmatprep.subr.mxu0 %v2539_v44  ;;  %2782 = vmatpush2.msra.mxu1 %v2543_v53 }
 0xa41   : > { %2669 = vmatpush2.msra.mxu0 %v2541_v16  ;;  %2783 = vmatprep.subr.mxu1 %v3033_v4  ;;  %v2378_v4 = vld [vmem:[%s5392_s8 + $0x10] sm:$0xff] }
 0xa42   : > { %v2527_v26 = vpop.permute.xlu0 %2526  ;;  %v2535_v33 = vpop.permute.xlu1 %2534 }
 0xa43   : > { %v2540_v38 = vsel %vm448_vm1, %v2527_v26, %v2531_v43  ;;  %v2542_v9 = vsel %vm448_vm1, %v2535_v33, %v2527_v26  ;;  %v2538_v15 = vsel %vm448_vm1, %v2531_v43, %v2535_v33 }
 0xa44   : > { %2670 = vmatprep.subr.mxu0 %v2538_v15  ;;  %2784 = vmatpush2.msra.mxu1 %v2542_v9 }
 0xa45   : > { %2671 = vmatpush2.msra.mxu0 %v2540_v38  ;;  %2786 = vmatmul.mubr.f32.vlgmr.msra.gmra.mxu1 %v2376_v40 }
 0xa46   : > { %2673 = vmatmul.mubr.f32.vlgmr.msra.gmra.mxu0 %v2376_v40  ;;  %2966 = vmatprep.mubr.msk.f32.mxu1 %vm861_vm10, %v2379_v36 }
 0xa47   : > { %2958 = vmatprep.mubr.msk.f32.mxu0 %vm861_vm10, %v2379_v36 }
 0xa49   : > { %2791 = vmatmul.mubr.f32.gmra.mxu1 %v2378_v4 }
 0xa4a   : > { %2679 = vmatmul.mubr.f32.gmra.mxu0 %v2378_v4  ;;  %2967 = vmatprep.mubr.msk.f32.mxu1 %vm861_vm10, %v2381_v10 }
 0xa4b   : > { %2959 = vmatprep.mubr.msk.f32.mxu0 %vm861_vm10, %v2381_v10 }
 0xa4d   : > { %2796 = vmatmul.mubr.f32.gmra.mxu1 %v2380_v49 }
 0xa4e   : > { %2685 = vmatmul.mubr.f32.gmra.mxu0 %v2380_v49  ;;  %2968 = vmatprep.mubr.msk.f32.mxu1 %vm861_vm10, %v2383_v18 }
 0xa4f   : > { %2960 = vmatprep.mubr.msk.f32.mxu0 %vm861_vm10, %v2383_v18  ;;  %v2547_v1 = vpop.permute.xlu1 %2546  ;;  %v2552_v59 = vpop.permute.xlu0 %2551 }
 0xa51   : > { %2801 = vmatmul.mubr.f32.gmra.mxu1 %v2382_v50 }
 0xa52   : > { %2691 = vmatmul.mubr.f32.gmra.mxu0 %v2382_v50  ;;  %2969 = vmatprep.mubr.msk.f32.mxu1 %vm861_vm10, %v2385_v27 }
 0xa53   : > { %2961 = vmatprep.mubr.msk.f32.mxu0 %vm861_vm10, %v2385_v27  ;;  %v2557_v13 = vpop.permute.xlu1 %2556  ;;  %v2562_v6 = vpop.permute.xlu0 %2561 }
 0xa55   : > { %2806 = vmatmul.mubr.f32.gmra.mxu1 %v2384_v29 }
 0xa56   : > { %2697 = vmatmul.mubr.f32.gmra.mxu0 %v2384_v29  ;;  %2970 = vmatprep.mubr.msk.f32.mxu1 %vm861_vm10, %v2387_v35 }
 0xa57   : > { %2962 = vmatprep.mubr.msk.f32.mxu0 %vm861_vm10, %v2387_v35  ;;  %v2567_v58 = vpop.permute.xlu1 %2566  ;;  %v2572_v43 = vpop.permute.xlu0 %2571 }
 0xa59   : > { %2811 = vmatmul.mubr.f32.gmra.mxu1 %v2386_v60 }
 0xa5a   : > { %2703 = vmatmul.mubr.f32.gmra.mxu0 %v2386_v60  ;;  %2971 = vmatprep.mubr.msk.f32.mxu1 %vm861_vm10, %v2389_v19 }
 0xa5b   : > { %2963 = vmatprep.mubr.msk.f32.mxu0 %vm861_vm10, %v2389_v19  ;;  %v2577_v38 = vpop.permute.xlu1 %2576  ;;  %v2582_v50 = vpop.permute.xlu0 %2581 }
 0xa5d   : > { %2816 = vmatmul.mubr.f32.gmra.mxu1 %v2388_v52 }
 0xa5e   : > { %2709 = vmatmul.mubr.f32.gmra.mxu0 %v2388_v52  ;;  %2972 = vmatprep.mubr.msk.f32.mxu1 %vm861_vm10, %v2391_v34 }
 0xa5f   : > { %2964 = vmatprep.mubr.msk.f32.mxu0 %vm861_vm10, %v2391_v34 }
 0xa61   : > { %2821 = vmatmul.mubr.f32.gmra.mxu1 %v2390_v45 }
 0xa62   : > { %2715 = vmatmul.mubr.f32.gmra.mxu0 %v2390_v45 }
 0xb05   : > { %v2787_v14 = vpop.f32.mrf.mxu1 }
 0xb06   : > { %v2788_v41 = vadd.f32 %v2787_v14, %v2547_v1  ;;  %v2674_v48 = vpop.f32.mrf.mxu0 }
 0xb07   : > { %v2675_v21 = vadd.f32 %v2674_v48, %v2547_v1  ;;  %v2789_v32 = vpop.f32.mrf.mxu1 }
 0xb08   : > { %2828 = vst [vmem:[%s5355_s16 + $0x10] sm:$0xff] %v2788_v41  ;;  %v2676_v20 = vpop.f32.mrf.mxu0 }
 0xb09   : > { %2826 = vst [vmem:[%s5355_s16] sm:$0xff] %v2675_v21  ;;  %v2677_v31 = vadd.f32 %v2676_v20, %v2547_v1  ;;  %v2792_v63 = vpop.f32.mrf.mxu1 }
 0xb0a   : > { %v2793_v3 = vadd.f32 %v2792_v63, %v2552_v59  ;;  %v2680_v22 = vpop.f32.mrf.mxu0 }
 0xb0b   : > { %2827 = vst [vmem:[%s5355_s16 + $0x8] sm:$0xff] %v2677_v31  ;;  %v2681_v7 = vadd.f32 %v2680_v22, %v2552_v59  ;;  %v2794_v37 = vpop.f32.mrf.mxu1 }
 0xb0c   : > { %2831 = vst [vmem:[%s5355_s16 + $0x28] sm:$0xff] %v2793_v3  ;;  %v2682_v42 = vpop.f32.mrf.mxu0 }
 0xb0d   : > { %2829 = vst [vmem:[%s5355_s16 + $0x18] sm:$0xff] %v2681_v7  ;;  %v2683_v56 = vadd.f32 %v2682_v42, %v2552_v59  ;;  %v2797_v57 = vpop.f32.mrf.mxu1 }
 0xb0e   : > { %v2798_v2 = vadd.f32 %v2797_v57, %v2557_v13  ;;  %v2686_v0 = vpop.f32.mrf.mxu0 }
 0xb0f   : > { %2830 = vst [vmem:[%s5355_s16 + $0x20] sm:$0xff] %v2683_v56  ;;  %v2687_v17 = vadd.f32 %v2686_v0, %v2557_v13  ;;  %v2799_v24 = vpop.f32.mrf.mxu1 }
 0xb10   : > { %2834 = vst [vmem:[%s5355_s16 + $0x40] sm:$0xff] %v2798_v2  ;;  %v2688_v61 = vpop.f32.mrf.mxu0 }
 0xb11   : > { %2832 = vst [vmem:[%s5355_s16 + $0x30] sm:$0xff] %v2687_v17  ;;  %v2689_v55 = vadd.f32 %v2688_v61, %v2557_v13  ;;  %v2802_v46 = vpop.f32.mrf.mxu1 }
 0xb12   : > { %v2803_v25 = vadd.f32 %v2802_v46, %v2562_v6  ;;  %v2692_v54 = vpop.f32.mrf.mxu0 }
 0xb13   : > { %2833 = vst [vmem:[%s5355_s16 + $0x38] sm:$0xff] %v2689_v55  ;;  %v2693_v11 = vadd.f32 %v2692_v54, %v2562_v6  ;;  %v2804_v47 = vpop.f32.mrf.mxu1 }
 0xb14   : > { %2837 = vst [vmem:[%s5355_s16 + $0x58] sm:$0xff] %v2803_v25  ;;  %v2694_v5 = vpop.f32.mrf.mxu0 }
 0xb15   : > { %2835 = vst [vmem:[%s5355_s16 + $0x48] sm:$0xff] %v2693_v11  ;;  %v2695_v51 = vadd.f32 %v2694_v5, %v2562_v6  ;;  %v2807_v28 = vpop.f32.mrf.mxu1 }
 0xb16   : > { %v2808_v39 = vadd.f32 %v2807_v28, %v2567_v58  ;;  %v2698_v30 = vpop.f32.mrf.mxu0 }
 0xb17   : > { %2836 = vst [vmem:[%s5355_s16 + $0x50] sm:$0xff] %v2695_v51  ;;  %v2699_v62 = vadd.f32 %v2698_v30, %v2567_v58  ;;  %v2809_v23 = vpop.f32.mrf.mxu1 }
 0xb18   : > { %2840 = vst [vmem:[%s5355_s16 + $0x70] sm:$0xff] %v2808_v39  ;;  %v2700_v8 = vpop.f32.mrf.mxu0 }
 0xb19   : > { %2838 = vst [vmem:[%s5355_s16 + $0x60] sm:$0xff] %v2699_v62  ;;  %v2701_v12 = vadd.f32 %v2700_v8, %v2567_v58  ;;  %v2812_v53 = vpop.f32.mrf.mxu1 }
 0xb1a   : > { %v2813_v16 = vadd.f32 %v2812_v53, %v2572_v43  ;;  %v2704_v44 = vpop.f32.mrf.mxu0 }
 0xb1b   : > { %2839 = vst [vmem:[%s5355_s16 + $0x68] sm:$0xff] %v2701_v12  ;;  %v2705_v26 = vadd.f32 %v2704_v44, %v2572_v43  ;;  %v2814_v33 = vpop.f32.mrf.mxu1 }
 0xb1c   : > { %2843 = vst [vmem:[%s5355_s16 + $0x88] sm:$0xff] %v2813_v16  ;;  %v2706_v40 = vpop.f32.mrf.mxu0 }
 0xb1d   : > { %2841 = vst [vmem:[%s5355_s16 + $0x78] sm:$0xff] %v2705_v26  ;;  %v2707_v9 = vadd.f32 %v2706_v40, %v2572_v43  ;;  %v2817_v15 = vpop.f32.mrf.mxu1 }
 0xb1e   : > { %v2818_v36 = vadd.f32 %v2817_v15, %v2577_v38  ;;  %v2710_v4 = vpop.f32.mrf.mxu0 }
 0xb1f   : > { %2842 = vst [vmem:[%s5355_s16 + $0x80] sm:$0xff] %v2707_v9  ;;  %v2711_v10 = vadd.f32 %v2710_v4, %v2577_v38  ;;  %v2819_v49 = vpop.f32.mrf.mxu1 }
 0xb20   : > { %2846 = vst [vmem:[%s5355_s16 + $0xa0] sm:$0xff] %v2818_v36  ;;  %v2712_v18 = vpop.f32.mrf.mxu0 }
 0xb21   : > { %2844 = vst [vmem:[%s5355_s16 + $0x90] sm:$0xff] %v2711_v10  ;;  %v2713_v27 = vadd.f32 %v2712_v18, %v2577_v38  ;;  %v2822_v29 = vpop.f32.mrf.mxu1 }
 0xb22   : > { %v2823_v35 = vadd.f32 %v2822_v29, %v2582_v50  ;;  %v2716_v60 = vpop.f32.mrf.mxu0 }
 0xb23   : > { %2845 = vst [vmem:[%s5355_s16 + $0x98] sm:$0xff] %v2713_v27  ;;  %v2717_v19 = vadd.f32 %v2716_v60, %v2582_v50  ;;  %v2824_v52 = vpop.f32.mrf.mxu1 }
 0xb24   : > { %2849 = vst [vmem:[%s5355_s16 + $0xb8] sm:$0xff] %v2823_v35  ;;  %v2718_v34 = vpop.f32.mrf.mxu0 }
 0xb25   : > { %2847 = vst [vmem:[%s5355_s16 + $0xa8] sm:$0xff] %v2717_v19  ;;  %v2719_v45 = vadd.f32 %v2718_v34, %v2582_v50 }
 0xb27   : > { %2848 = vst [vmem:[%s5355_s16 + $0xb0] sm:$0xff] %v2719_v45 }
 0xb28 PF: > { %s20_s13 = sadd.s32 1, %s3024_s13  }
 0xb29   : > { %p17_p4 = scmp.ge.s32.totalorder %s20_s13, 4  }
 0xb2b   :  { %19 = sbr.rel (!%p17_p4) target bundleno = 1 (0x1), region = 96 }

// kernel: resnet_forward.3
= control target key start
LH: loop header
LB: loop body
LE: loop exit
PB: predicated region body
PF: predicated region fallthrough
CT: control target
= control target key end

     0   :  { %s1205_s12 = smov 0   ;;  %s2178_s0 = inlined_call_operand.vmem [shape: f32[2,16,1280], index: 0, kind: input, shape index: {}]   ;;  %s2179_s1 = inlined_call_operand.vmem [shape: f32[4,144], index: 1, kind: input, shape index: {}]   ;;  %s2180_s2 = inlined_call_operand.vmem [shape: f32[4,1], index: 2, kind: input, shape index: {}]   ;;  %s2181_s3 = inlined_call_operand.vmem [shape: f32[2,4,1280], index: 3, kind: output, shape index: {}]  }
   0x1 LB: > { %s1128_s13 = sadd.s32 4294967295, %s1174_s12   ;;  %p1132_p0 = scmp.ge.s32.totalorder %s1174_s12, 1  ;;  %s1174_s12 = sphi %s1205_s12, %s13_s12  }
   0x2   : > { %p137_p1 = scmp.lt.s32.totalorder %s1174_s12, 3 }
   0x4   : > { %p138_p2 = pnand %p1132_p0, %p137_p1 }
   0x5   : > { %p161_p3 = scmp.lt.s32.totalorder (!%p138_p2), %s1128_s13, 1  ;;  %s1176_s18 = smov (!%p138_p2), 94  }
   0x6   : > { %141 = sbr.rel (%p138_p2) target bundleno = 651 (0x28b), region = 32  ;;  %s1177_s19 = smov (!%p138_p2), 95  }
   0x7   : > { %s1178_s20 = smov (!%p138_p2), 127   ;;  %s1179_s21 = smov (!%p138_p2), 1  }
   0x8   : > { %s1180_s22 = smov (!%p138_p2), 33   ;;  %s1181_s23 = smov (!%p138_p2), 34  }
   0x9   : > { %s1182_s24 = smov (!%p138_p2), 35   ;;  %s1183_s25 = smov (!%p138_p2), 93  }
   0xb   : > { %s2183_s13 = smov (!%p161_p3, %s1128_s13), 1  ;;  %v1336_v8 = vld [vmem:[%s2179_s1] sm:$0xff]  ;;  %vm690_vm0 = vcmask 130048   ;;  %v233_v18 = vlaneseq }
   0xc   : > { %s1142_s14 = smul.u32 160, %s2183_s13  ;;  %v1340_v9 = vcombine.high %v1336_v8, %v1336_v8 }
   0xd   : > { %v1398_v19 = vand.u32 127, %v233_v18  ;;  %s1143_s5 = smul.u32 40, %s2183_s13 }
   0xe   : > { %s1219_s17 = scalar_lea.vmem %s2178_s0, %s1142_s14  ;;  %1135 = vmatprep.mubr.msk.f32.mxu0 %vm690_vm0, %v1340_v9  ;;  %1136 = vmatprep.mubr.msk.f32.mxu1 %vm690_vm0, %v1340_v9 }
   0xf   : > { %v1222_v0 = vld [vmem:[%s1219_s17 + $0x58] sm:$0xff]  ;;  %v1225_v1 = vld [vmem:[%s1219_s17 + $0x50] sm:$0xff]  ;;  %v1232_v2 = vld [vmem:[%s1219_s17 + $0x60] sm:$0xff]  ;;  %vm601_vm1 = vcmp.lt.s32.totalorder %v1398_v19, 94  ;;  %vm540_vm2 = vcmp.lt.s32.totalorder %v1398_v19, 95  ;;  %vm479_vm3 = vcmp.lt.s32.totalorder %v1398_v19, 127  ;;  %s170_s8 = scalar_lea.vmem %s2181_s3, %s1143_s5 }
  0x10   : > { %567 = vrot.lane.b32.xlu0 %v1222_v0, %s1176_s18  ;;  %563 = vrot.lane.b32.xlu1 %v1225_v1, %s1176_s18  ;;  %v1235_v3 = vld [vmem:[%s1219_s17 + $0x8] sm:$0xff]  ;;  %v1242_v4 = vld [vmem:[%s1219_s17 + $0x10] sm:$0xff]  ;;  %vm418_vm4 = vcmp.lt.s32.totalorder %v1398_v19, 1  ;;  %vm357_vm5 = vcmp.lt.s32.totalorder %v1398_v19, 33  ;;  %vm296_vm6 = vcmp.lt.s32.totalorder %v1398_v19, 34  ;;  %vm235_vm7 = vcmp.lt.s32.totalorder %v1398_v19, 35 }
  0x11   : > { %v1245_v5 = vld [vmem:[%s1219_s17] sm:$0xff]  ;;  %v1280_v6 = vld [vmem:[%s1219_s17 + $0x98] sm:$0xff]  ;;  %v1287_v7 = vld [vmem:[%s1219_s17 + $0x48] sm:$0xff]  ;;  %vm662_vm8 = vcmp.lt.s32.totalorder %v1398_v19, 93 }
  0x12   : > { %v1355_v10 = vld [vmem:[%s1219_s17 + $0x68] sm:$0xff]  ;;  %v1358_v11 = vld [vmem:[%s1219_s17 + $0x70] sm:$0xff]  ;;  %v1365_v12 = vld [vmem:[%s1219_s17 + $0x78] sm:$0xff] }
  0x13   : > { %v1368_v13 = vld [vmem:[%s1219_s17 + $0x80] sm:$0xff]  ;;  %v1375_v14 = vld [vmem:[%s1219_s17 + $0x18] sm:$0xff]  ;;  %v1385_v16 = vld [vmem:[%s1219_s17 + $0x28] sm:$0xff] }
  0x14   : > { %571 = vrot.lane.b32.xlu0 %v1232_v2, %s1176_s18  ;;  %565 = vrot.lane.b32.xlu1 %v1235_v3, %s1176_s18  ;;  %v1378_v15 = vld [vmem:[%s1219_s17 + $0x20] sm:$0xff]  ;;  %v1388_v17 = vld [vmem:[%s1219_s17 + $0x30] sm:$0xff] }
  0x18   : > { %569 = vrot.lane.b32.xlu0 %v1242_v4, %s1176_s18  ;;  %561 = vrot.lane.b32.xlu1 %v1245_v5, %s1176_s18 }
  0x1c   : > { %506 = vrot.lane.b32.xlu0 %v1222_v0, %s1177_s19  ;;  %510 = vrot.lane.b32.xlu1 %v1232_v2, %s1177_s19 }
  0x20   : > { %502 = vrot.lane.b32.xlu0 %v1225_v1, %s1177_s19  ;;  %504 = vrot.lane.b32.xlu1 %v1235_v3, %s1177_s19 }
  0x24   : > { %508 = vrot.lane.b32.xlu0 %v1242_v4, %s1177_s19  ;;  %500 = vrot.lane.b32.xlu1 %v1245_v5, %s1177_s19 }
  0x28   : > { %445 = vrot.lane.b32.xlu0 %v1222_v0, %s1178_s20  ;;  %449 = vrot.lane.b32.xlu1 %v1232_v2, %s1178_s20 }
  0x2c   : > { %441 = vrot.lane.b32.xlu0 %v1225_v1, %s1178_s20  ;;  %443 = vrot.lane.b32.xlu1 %v1235_v3, %s1178_s20 }
  0x30   : > { %447 = vrot.lane.b32.xlu0 %v1242_v4, %s1178_s20  ;;  %439 = vrot.lane.b32.xlu1 %v1245_v5, %s1178_s20 }
  0x34   : > { %380 = vrot.lane.b32.xlu0 %v1225_v1, %s1179_s21  ;;  %384 = vrot.lane.b32.xlu1 %v1222_v0, %s1179_s21 }
  0x38   : > { %416 = vrot.lane.b32.xlu0 %v1280_v6, %s1179_s21  ;;  %378 = vrot.lane.b32.xlu1 %v1245_v5, %s1179_s21 }
  0x3c   : > { %382 = vrot.lane.b32.xlu0 %v1235_v3, %s1179_s21  ;;  %414 = vrot.lane.b32.xlu1 %v1287_v7, %s1179_s21 }
  0x40   : > { %319 = vrot.lane.b32.xlu0 %v1225_v1, %s1180_s22  ;;  %323 = vrot.lane.b32.xlu1 %v1222_v0, %s1180_s22 }
  0x44   : > { %355 = vrot.lane.b32.xlu0 %v1280_v6, %s1180_s22  ;;  %317 = vrot.lane.b32.xlu1 %v1245_v5, %s1180_s22 }
  0x48   : > { %321 = vrot.lane.b32.xlu0 %v1235_v3, %s1180_s22  ;;  %353 = vrot.lane.b32.xlu1 %v1287_v7, %s1180_s22 }
  0x4c   : > { %258 = vrot.lane.b32.xlu0 %v1225_v1, %s1181_s23  ;;  %262 = vrot.lane.b32.xlu1 %v1222_v0, %s1181_s23 }
  0x50   : > { %294 = vrot.lane.b32.xlu0 %v1280_v6, %s1181_s23  ;;  %256 = vrot.lane.b32.xlu1 %v1245_v5, %s1181_s23 }
  0x54   : > { %260 = vrot.lane.b32.xlu0 %v1235_v3, %s1181_s23  ;;  %292 = vrot.lane.b32.xlu1 %v1287_v7, %s1181_s23 }
  0x58   : > { %195 = vrot.lane.b32.xlu0 %v1225_v1, %s1182_s24  ;;  %199 = vrot.lane.b32.xlu1 %v1222_v0, %s1182_s24 }
  0x5c   : > { %231 = vrot.lane.b32.xlu0 %v1280_v6, %s1182_s24  ;;  %193 = vrot.lane.b32.xlu1 %v1245_v5, %s1182_s24 }
  0x60   : > { %197 = vrot.lane.b32.xlu0 %v1235_v3, %s1182_s24  ;;  %229 = vrot.lane.b32.xlu1 %v1287_v7, %s1182_s24 }
  0x64   : > { %628 = vrot.lane.b32.xlu0 %v1222_v0, %s1183_s25  ;;  %632 = vrot.lane.b32.xlu1 %v1232_v2, %s1183_s25 }
  0x68   : > { %624 = vrot.lane.b32.xlu0 %v1225_v1, %s1183_s25  ;;  %626 = vrot.lane.b32.xlu1 %v1235_v3, %s1183_s25 }
  0x6c   : > { %630 = vrot.lane.b32.xlu0 %v1242_v4, %s1183_s25  ;;  %622 = vrot.lane.b32.xlu1 %v1245_v5, %s1183_s25 }
  0x70   : > { %575 = vrot.lane.b32.xlu0 %v1355_v10, %s1176_s18  ;;  %579 = vrot.lane.b32.xlu1 %v1358_v11, %s1176_s18 }
  0x74   : > { %583 = vrot.lane.b32.xlu0 %v1365_v12, %s1176_s18  ;;  %587 = vrot.lane.b32.xlu1 %v1368_v13, %s1176_s18 }
  0x78   : > { %573 = vrot.lane.b32.xlu0 %v1375_v14, %s1176_s18  ;;  %577 = vrot.lane.b32.xlu1 %v1378_v15, %s1176_s18 }
  0x7c   : > { %581 = vrot.lane.b32.xlu0 %v1385_v16, %s1176_s18  ;;  %585 = vrot.lane.b32.xlu1 %v1388_v17, %s1176_s18 }
  0x80   : > { %514 = vrot.lane.b32.xlu0 %v1355_v10, %s1177_s19  ;;  %518 = vrot.lane.b32.xlu1 %v1358_v11, %s1177_s19 }
  0x82   : > { %v568_v20 = vpop.permute.xlu0 %567  ;;  %v1400_v21 = vpop.permute.xlu1 %563 }
  0x83   : > { %v619_v25 = vsel %vm601_vm1, %v1400_v21, %v568_v20 }
  0x84   : > { %522 = vrot.lane.b32.xlu0 %v1365_v12, %s1177_s19  ;;  %526 = vrot.lane.b32.xlu1 %v1368_v13, %s1177_s19 }
  0x86   : > { %v1407_v22 = vpop.permute.xlu0 %571  ;;  %v566_v23 = vpop.permute.xlu1 %565 }
  0x87   : > { %v617_v24 = vsel %vm601_vm1, %v568_v20, %v1407_v22 }
  0x88   : > { %693 = vmatprep.subr.mxu0 %v617_v24  ;;  %512 = vrot.lane.b32.xlu0 %v1375_v14, %s1177_s19 }
  0x89   : > { %516 = vrot.lane.b32.xlu1 %v1378_v15, %s1177_s19  ;;  %694 = vmatpush1.msra.mxu0 %v619_v25 }
  0x8a   : > { %v1419_v26 = vpop.permute.xlu0 %569  ;;  %v1421_v27 = vpop.permute.xlu1 %561 }
  0x8b   : > { %v616_v28 = vsel %vm601_vm1, %v566_v23, %v1419_v26  ;;  %v618_v29 = vsel %vm601_vm1, %v1421_v27, %v566_v23 }
  0x8c   : > { %520 = vrot.lane.b32.xlu0 %v1385_v16, %s1177_s19  ;;  %695 = vmatprep.subr.mxu0 %v616_v28 }
  0x8d   : > { %524 = vrot.lane.b32.xlu1 %v1388_v17, %s1177_s19  ;;  %696 = vmatpush1.msra.mxu0 %v618_v29 }
  0x8e   : > { %v507_v30 = vpop.permute.xlu0 %506  ;;  %v1434_v31 = vpop.permute.xlu1 %510 }
  0x8f   : > { %v556_v32 = vsel %vm540_vm2, %v507_v30, %v1434_v31 }
  0x90   : > { %453 = vrot.lane.b32.xlu0 %v1355_v10, %s1178_s20  ;;  %697 = vmatprep.subr.mxu0 %v556_v32 }
  0x91   : > { %457 = vrot.lane.b32.xlu1 %v1358_v11, %s1178_s20 }
  0x92   : > { %v1443_v33 = vpop.permute.xlu0 %502  ;;  %v505_v34 = vpop.permute.xlu1 %504 }
  0x93   : > { %v558_v35 = vsel %vm540_vm2, %v1443_v33, %v507_v30 }
  0x94   : > { %461 = vrot.lane.b32.xlu0 %v1365_v12, %s1178_s20  ;;  %698 = vmatpush1.msra.mxu0 %v558_v35 }
  0x95   : > { %465 = vrot.lane.b32.xlu1 %v1368_v13, %s1178_s20 }
  0x96   : > { %v1452_v36 = vpop.permute.xlu0 %508  ;;  %v1454_v37 = vpop.permute.xlu1 %500 }
  0x97   : > { %v555_v38 = vsel %vm540_vm2, %v505_v34, %v1452_v36  ;;  %v557_v39 = vsel %vm540_vm2, %v1454_v37, %v505_v34 }
  0x98   : > { %451 = vrot.lane.b32.xlu0 %v1375_v14, %s1178_s20  ;;  %699 = vmatprep.subr.mxu0 %v555_v38 }
  0x99   : > { %455 = vrot.lane.b32.xlu1 %v1378_v15, %s1178_s20  ;;  %700 = vmatpush1.msra.mxu0 %v557_v39 }
  0x9a   : > { %v446_v40 = vpop.permute.xlu0 %445  ;;  %v1467_v41 = vpop.permute.xlu1 %449 }
  0x9b   : > { %v495_v42 = vsel %vm479_vm3, %v446_v40, %v1467_v41 }
  0x9c   : > { %459 = vrot.lane.b32.xlu0 %v1385_v16, %s1178_s20  ;;  %701 = vmatprep.subr.mxu0 %v495_v42 }
  0x9d   : > { %463 = vrot.lane.b32.xlu1 %v1388_v17, %s1178_s20 }
  0x9e   : > { %v1476_v43 = vpop.permute.xlu0 %441  ;;  %v444_v44 = vpop.permute.xlu1 %443 }
  0x9f   : > { %v497_v45 = vsel %vm479_vm3, %v1476_v43, %v446_v40 }
  0xa0   : > { %388 = vrot.lane.b32.xlu0 %v1232_v2, %s1179_s21  ;;  %702 = vmatpush1.msra.mxu0 %v497_v45 }
  0xa1   : > { %392 = vrot.lane.b32.xlu1 %v1355_v10, %s1179_s21 }
  0xa2   : > { %v1485_v46 = vpop.permute.xlu0 %447  ;;  %v1487_v47 = vpop.permute.xlu1 %439 }
  0xa3   : > { %v494_v48 = vsel %vm479_vm3, %v444_v44, %v1485_v46  ;;  %v496_v49 = vsel %vm479_vm3, %v1487_v47, %v444_v44 }
  0xa4   : > { %396 = vrot.lane.b32.xlu0 %v1358_v11, %s1179_s21  ;;  %703 = vmatprep.subr.mxu0 %v494_v48 }
  0xa5   : > { %400 = vrot.lane.b32.xlu1 %v1365_v12, %s1179_s21  ;;  %704 = vmatpush1.msra.mxu0 %v496_v49 }
  0xa6   : > { %v381_v50 = vpop.permute.xlu0 %380  ;;  %705 = vmatprep.subr.mxu0 %v1222_v0  ;;  %v1500_v51 = vpop.permute.xlu1 %384 }
  0xa7   : > { %706 = vmatpush1.msra.mxu0 %v1225_v1  ;;  %v436_v52 = vsel %vm418_vm4, %v381_v50, %v1500_v51 }
  0xa8   : > { %386 = vrot.lane.b32.xlu0 %v1242_v4, %s1179_s21  ;;  %707 = vmatprep.subr.mxu0 %v1235_v3 }
  0xa9   : > { %390 = vrot.lane.b32.xlu1 %v1375_v14, %s1179_s21  ;;  %708 = vmatpush1.msra.mxu0 %v1245_v5 }
  0xaa   : > { %v1513_v53 = vpop.permute.xlu0 %416  ;;  %709 = vmatprep.subr.mxu0 %v436_v52  ;;  %v379_v54 = vpop.permute.xlu1 %378 }
  0xab   : > { %v438_v55 = vsel %vm418_vm4, %v1513_v53, %v381_v50 }
  0xac   : > { %394 = vrot.lane.b32.xlu0 %v1378_v15, %s1179_s21  ;;  %710 = vmatpush1.msra.mxu0 %v438_v55 }
  0xad   : > { %398 = vrot.lane.b32.xlu1 %v1385_v16, %s1179_s21 }
  0xae   : > { %v1522_v56 = vpop.permute.xlu0 %382  ;;  %v1524_v57 = vpop.permute.xlu1 %414 }
  0xaf   : > { %v435_v58 = vsel %vm418_vm4, %v379_v54, %v1522_v56  ;;  %v437_v59 = vsel %vm418_vm4, %v1524_v57, %v379_v54 }
  0xb0   : > { %327 = vrot.lane.b32.xlu0 %v1232_v2, %s1180_s22  ;;  %711 = vmatprep.subr.mxu0 %v435_v58 }
  0xb1   : > { %331 = vrot.lane.b32.xlu1 %v1355_v10, %s1180_s22  ;;  %712 = vmatpush1.msra.mxu0 %v437_v59 }
  0xb2   : > { %v320_v60 = vpop.permute.xlu0 %319  ;;  %v1537_v61 = vpop.permute.xlu1 %323 }
  0xb3   : > { %v375_v62 = vsel %vm357_vm5, %v320_v60, %v1537_v61 }
  0xb4   : > { %335 = vrot.lane.b32.xlu0 %v1358_v11, %s1180_s22  ;;  %713 = vmatprep.subr.mxu0 %v375_v62 }
  0xb5   : > { %339 = vrot.lane.b32.xlu1 %v1365_v12, %s1180_s22 }
  0xb6   : > { %v1546_v63 = vpop.permute.xlu0 %355  ;;  %v318_v0 = vpop.permute.xlu1 %317 }
  0xb7   : > { %v377_v1 = vsel %vm357_vm5, %v1546_v63, %v320_v60 }
  0xb8   : > { %325 = vrot.lane.b32.xlu0 %v1242_v4, %s1180_s22  ;;  %714 = vmatpush1.msra.mxu0 %v377_v1 }
  0xb9   : > { %329 = vrot.lane.b32.xlu1 %v1375_v14, %s1180_s22 }
  0xba   : > { %v1555_v3 = vpop.permute.xlu0 %321  ;;  %v1557_v5 = vpop.permute.xlu1 %353 }
  0xbb   : > { %v374_v18 = vsel %vm357_vm5, %v318_v0, %v1555_v3  ;;  %v376_v20 = vsel %vm357_vm5, %v1557_v5, %v318_v0 }
  0xbc   : > { %333 = vrot.lane.b32.xlu0 %v1378_v15, %s1180_s22  ;;  %715 = vmatprep.subr.mxu0 %v374_v18 }
  0xbd   : > { %337 = vrot.lane.b32.xlu1 %v1385_v16, %s1180_s22  ;;  %716 = vmatpush1.msra.mxu0 %v376_v20 }
  0xbe   : > { %v259_v23 = vpop.permute.xlu0 %258  ;;  %v1570_v24 = vpop.permute.xlu1 %262 }
  0xbf   : > { %v314_v25 = vsel %vm296_vm6, %v259_v23, %v1570_v24 }
  0xc0   : > { %266 = vrot.lane.b32.xlu0 %v1232_v2, %s1181_s23  ;;  %717 = vmatprep.subr.mxu0 %v314_v25 }
  0xc1   : > { %270 = vrot.lane.b32.xlu1 %v1355_v10, %s1181_s23 }
  0xc2   : > { %v1579_v28 = vpop.permute.xlu0 %294  ;;  %v257_v29 = vpop.permute.xlu1 %256 }
  0xc3   : > { %v316_v30 = vsel %vm296_vm6, %v1579_v28, %v259_v23 }
  0xc4   : > { %274 = vrot.lane.b32.xlu0 %v1358_v11, %s1181_s23  ;;  %718 = vmatpush1.msra.mxu0 %v316_v30 }
  0xc5   : > { %278 = vrot.lane.b32.xlu1 %v1365_v12, %s1181_s23 }
  0xc6   : > { %v1588_v32 = vpop.permute.xlu0 %260  ;;  %v1590_v34 = vpop.permute.xlu1 %292 }
  0xc7   : > { %v313_v35 = vsel %vm296_vm6, %v257_v29, %v1588_v32  ;;  %v315_v38 = vsel %vm296_vm6, %v1590_v34, %v257_v29 }
  0xc8   : > { %264 = vrot.lane.b32.xlu0 %v1242_v4, %s1181_s23  ;;  %719 = vmatprep.subr.mxu0 %v313_v35 }
  0xc9   : > { %268 = vrot.lane.b32.xlu1 %v1375_v14, %s1181_s23  ;;  %720 = vmatpush1.msra.mxu0 %v315_v38 }
  0xca   : > { %v196_v39 = vpop.permute.xlu0 %195  ;;  %v1603_v40 = vpop.permute.xlu1 %199 }
  0xcb   : > { %v253_v42 = vsel %vm235_vm7, %v196_v39, %v1603_v40 }
  0xcc   : > { %272 = vrot.lane.b32.xlu0 %v1378_v15, %s1181_s23  ;;  %721 = vmatprep.subr.mxu0 %v253_v42 }
  0xcd   : > { %276 = vrot.lane.b32.xlu1 %v1385_v16, %s1181_s23 }
  0xce   : > { %v1612_v44 = vpop.permute.xlu0 %231  ;;  %v194_v45 = vpop.permute.xlu1 %193 }
  0xcf   : > { %v255_v48 = vsel %vm235_vm7, %v1612_v44, %v196_v39 }
  0xd0   : > { %203 = vrot.lane.b32.xlu0 %v1232_v2, %s1182_s24  ;;  %722 = vmatpush1.msra.mxu0 %v255_v48 }
  0xd1   : > { %207 = vrot.lane.b32.xlu1 %v1355_v10, %s1182_s24 }
  0xd2   : > { %v1621_v49 = vpop.permute.xlu0 %197  ;;  %v1623_v50 = vpop.permute.xlu1 %229 }
  0xd3   : > { %v252_v52 = vsel %vm235_vm7, %v194_v45, %v1621_v49  ;;  %v254_v54 = vsel %vm235_vm7, %v1623_v50, %v194_v45 }
  0xd4   : > { %211 = vrot.lane.b32.xlu0 %v1358_v11, %s1182_s24  ;;  %723 = vmatprep.subr.mxu0 %v252_v52 }
  0xd5   : > { %215 = vrot.lane.b32.xlu1 %v1365_v12, %s1182_s24  ;;  %724 = vmatpush1.msra.mxu0 %v254_v54 }
  0xd6   : > { %v629_v55 = vpop.permute.xlu0 %628  ;;  %v1636_v58 = vpop.permute.xlu1 %632 }
  0xd7   : > { %v678_v59 = vsel %vm662_vm8, %v629_v55, %v1636_v58 }
  0xd8   : > { %201 = vrot.lane.b32.xlu0 %v1242_v4, %s1182_s24  ;;  %753 = vmatprep.subr.mxu0 %v678_v59 }
  0xd9   : > { %205 = vrot.lane.b32.xlu1 %v1375_v14, %s1182_s24 }
  0xda   : > { %v1645_v60 = vpop.permute.xlu0 %624  ;;  %v627_v62 = vpop.permute.xlu1 %626 }
  0xdb   : > { %v680_v0 = vsel %vm662_vm8, %v1645_v60, %v629_v55  ;;  %v1701_v55 = vld [vmem:[%s1219_s17 + $0x88] sm:$0xff] }
  0xdc   : > { %209 = vrot.lane.b32.xlu0 %v1378_v15, %s1182_s24  ;;  %754 = vmatpush2.msra.mxu0 %v680_v0  ;;  %v1706_v0 = vld [vmem:[%s1219_s17 + $0x90] sm:$0xff] }
  0xdd   : > { %213 = vrot.lane.b32.xlu1 %v1385_v16, %s1182_s24 }
  0xde   : > { %v1654_v1 = vpop.permute.xlu0 %630  ;;  %v1656_v18 = vpop.permute.xlu1 %622 }
  0xdf   : > { %v677_v20 = vsel %vm662_vm8, %v627_v62, %v1654_v1  ;;  %v679_v23 = vsel %vm662_vm8, %v1656_v18, %v627_v62 }
  0xe0   : > { %636 = vrot.lane.b32.xlu0 %v1355_v10, %s1183_s25  ;;  %755 = vmatprep.subr.mxu0 %v677_v20 }
  0xe1   : > { %640 = vrot.lane.b32.xlu1 %v1358_v11, %s1183_s25  ;;  %756 = vmatpush2.msra.mxu0 %v679_v23 }
  0xe2   : > { %v576_v25 = vpop.permute.xlu0 %575  ;;  %v580_v29 = vpop.permute.xlu1 %579  ;;  %758 = vmatmul.mubr.f32.vlgmr.msra.gmra.mxu0 %v1336_v8 }
  0xe3   : > { %v613_v30 = vsel %vm601_vm1, %v576_v25, %v580_v29  ;;  %v615_v35 = vsel %vm601_vm1, %v1407_v22, %v576_v25  ;;  %1137 = vmatprep.mubr.msk.f32.mxu0 %vm690_vm0, %v1340_v9 }
  0xe4   : > { %644 = vrot.lane.b32.xlu0 %v1365_v12, %s1183_s25  ;;  %764 = vmatprep.subr.mxu1 %v613_v30 }
  0xe5   : > { %648 = vrot.lane.b32.xlu1 %v1368_v13, %s1183_s25  ;;  %765 = vmatpush1.msra.mxu1 %v615_v35 }
  0xe6   : > { %v584_v38 = vpop.permute.xlu0 %583  ;;  %v1680_v39 = vpop.permute.xlu1 %587 }
  0xe7   : > { %v609_v42 = vsel %vm601_vm1, %v584_v38, %v1680_v39  ;;  %v611_v22 = vsel %vm601_vm1, %v580_v29, %v584_v38  ;;  %v1718_v29 = vld [vmem:[%s1219_s17 + $0x38] sm:$0xff]  ;;  %v1730_v38 = vld [vmem:[%s1219_s17 + $0x40] sm:$0xff] }
  0xe8   : > { %634 = vrot.lane.b32.xlu0 %v1375_v14, %s1183_s25  ;;  %835 = vmatprep.subr.mxu0 %v609_v42 }
  0xe9   : > { %638 = vrot.lane.b32.xlu1 %v1378_v15, %s1183_s25  ;;  %836 = vmatpush1.msra.mxu0 %v611_v22 }
  0xea   : > { %v574_v45 = vpop.permute.xlu0 %573  ;;  %v578_v48 = vpop.permute.xlu1 %577 }
  0xeb   : > { %v612_v52 = vsel %vm601_vm1, %v574_v45, %v578_v48  ;;  %v614_v54 = vsel %vm601_vm1, %v1419_v26, %v574_v45 }
  0xec   : > { %642 = vrot.lane.b32.xlu0 %v1385_v16, %s1183_s25  ;;  %766 = vmatprep.subr.mxu1 %v612_v52 }
  0xed   : > { %646 = vrot.lane.b32.xlu1 %v1388_v17, %s1183_s25  ;;  %767 = vmatpush1.msra.mxu1 %v614_v54 }
  0xee   : > { %v582_v59 = vpop.permute.xlu0 %581  ;;  %v1703_v62 = vpop.permute.xlu1 %585 }
  0xef   : > { %v608_v26 = vsel %vm601_vm1, %v582_v59, %v1703_v62  ;;  %v610_v20 = vsel %vm601_vm1, %v578_v48, %v582_v59 }
  0xf0   : > { %591 = vrot.lane.b32.xlu0 %v1701_v55, %s1176_s18  ;;  %837 = vmatprep.subr.mxu0 %v608_v26 }
  0xf1   : > { %595 = vrot.lane.b32.xlu1 %v1706_v0, %s1176_s18  ;;  %838 = vmatpush1.msra.mxu0 %v610_v20 }
  0xf2   : > { %v515_v23 = vpop.permute.xlu0 %514  ;;  %v519_v25 = vpop.permute.xlu1 %518 }
  0xf3   : > { %v552_v30 = vsel %vm540_vm2, %v515_v23, %v519_v25  ;;  %v554_v35 = vsel %vm540_vm2, %v1434_v31, %v515_v23 }
  0xf4   : > { %599 = vrot.lane.b32.xlu0 %v1280_v6, %s1176_s18  ;;  %768 = vmatprep.subr.mxu1 %v552_v30 }
  0xf5   : > { %589 = vrot.lane.b32.xlu1 %v1718_v29, %s1176_s18  ;;  %769 = vmatpush1.msra.mxu1 %v554_v35 }
  0xf6   : > { %v523_v42 = vpop.permute.xlu0 %522  ;;  %v1732_v22 = vpop.permute.xlu1 %526 }
  0xf7   : > { %v548_v45 = vsel %vm540_vm2, %v523_v42, %v1732_v22  ;;  %v550_v31 = vsel %vm540_vm2, %v519_v25, %v523_v42 }
  0xf8   : > { %593 = vrot.lane.b32.xlu0 %v1730_v38, %s1176_s18  ;;  %839 = vmatprep.subr.mxu0 %v548_v45 }
  0xf9   : > { %597 = vrot.lane.b32.xlu1 %v1287_v7, %s1176_s18  ;;  %840 = vmatpush1.msra.mxu0 %v550_v31 }
  0xfa   : > { %v513_v48 = vpop.permute.xlu0 %512 }
  0xfb   : > { %v517_v52 = vpop.permute.xlu1 %516  ;;  %v553_v54 = vsel %vm540_vm2, %v1452_v36, %v513_v48 }
  0xfc   : > { %530 = vrot.lane.b32.xlu0 %v1701_v55, %s1177_s19  ;;  %v551_v59 = vsel %vm540_vm2, %v513_v48, %v517_v52 }
  0xfd   : > { %534 = vrot.lane.b32.xlu1 %v1706_v0, %s1177_s19  ;;  %770 = vmatprep.subr.mxu1 %v551_v59 }
  0xfe   : > { %771 = vmatpush1.msra.mxu1 %v553_v54  ;;  %v521_v26 = vpop.permute.xlu0 %520 }
  0xff   : > { %v1752_v20 = vpop.permute.xlu1 %524  ;;  %v549_v23 = vsel %vm540_vm2, %v517_v52, %v521_v26 }
 0x100   : > { %538 = vrot.lane.b32.xlu0 %v1280_v6, %s1177_s19  ;;  %v547_v36 = vsel %vm540_vm2, %v521_v26, %v1752_v20 }
 0x101   : > { %528 = vrot.lane.b32.xlu1 %v1718_v29, %s1177_s19  ;;  %841 = vmatprep.subr.mxu0 %v547_v36 }
 0x102   : > { %842 = vmatpush1.msra.mxu0 %v549_v23  ;;  %v454_v25 = vpop.permute.xlu0 %453 }
 0x103   : > { %v458_v30 = vpop.permute.xlu1 %457  ;;  %v493_v35 = vsel %vm479_vm3, %v1467_v41, %v454_v25 }
 0x104   : > { %532 = vrot.lane.b32.xlu0 %v1730_v38, %s1177_s19  ;;  %v491_v42 = vsel %vm479_vm3, %v454_v25, %v458_v30 }
 0x105   : > { %536 = vrot.lane.b32.xlu1 %v1287_v7, %s1177_s19  ;;  %772 = vmatprep.subr.mxu1 %v491_v42 }
 0x106   : > { %773 = vmatpush1.msra.mxu1 %v493_v35  ;;  %v462_v45 = vpop.permute.xlu0 %461 }
 0x107   : > { %v489_v31 = vsel %vm479_vm3, %v458_v30, %v462_v45  ;;  %v1774_v48 = vpop.permute.xlu1 %465 }
 0x108   : > { %469 = vrot.lane.b32.xlu0 %v1701_v55, %s1178_s20  ;;  %v487_v41 = vsel %vm479_vm3, %v462_v45, %v1774_v48 }
 0x109   : > { %473 = vrot.lane.b32.xlu1 %v1706_v0, %s1178_s20  ;;  %843 = vmatprep.subr.mxu0 %v487_v41 }
 0x10a   : > { %844 = vmatpush1.msra.mxu0 %v489_v31  ;;  %v452_v52 = vpop.permute.xlu0 %451 }
 0x10b   : > { %v456_v54 = vpop.permute.xlu1 %455  ;;  %v492_v59 = vsel %vm479_vm3, %v1485_v46, %v452_v52 }
 0x10c   : > { %477 = vrot.lane.b32.xlu0 %v1280_v6, %s1178_s20  ;;  %v490_v26 = vsel %vm479_vm3, %v452_v52, %v456_v54 }
 0x10d   : > { %467 = vrot.lane.b32.xlu1 %v1718_v29, %s1178_s20  ;;  %774 = vmatprep.subr.mxu1 %v490_v26 }
 0x10e   : > { %775 = vmatpush1.msra.mxu1 %v492_v59  ;;  %v460_v23 = vpop.permute.xlu0 %459 }
 0x10f   : > { %v488_v36 = vsel %vm479_vm3, %v456_v54, %v460_v23  ;;  %v1794_v25 = vpop.permute.xlu1 %463  ;;  %776 = vmatprep.subr.mxu1 %v1355_v10 }
 0x110   : > { %471 = vrot.lane.b32.xlu0 %v1730_v38, %s1178_s20  ;;  %v486_v46 = vsel %vm479_vm3, %v460_v23, %v1794_v25  ;;  %777 = vmatpush1.msra.mxu1 %v1232_v2 }
 0x111   : > { %475 = vrot.lane.b32.xlu1 %v1287_v7, %s1178_s20  ;;  %845 = vmatprep.subr.mxu0 %v486_v46 }
 0x112   : > { %846 = vmatpush1.msra.mxu0 %v488_v36  ;;  %v389_v30 = vpop.permute.xlu0 %388  ;;  %778 = vmatprep.subr.mxu1 %v1375_v14 }
 0x113   : > { %v393_v35 = vpop.permute.xlu1 %392  ;;  %779 = vmatpush1.msra.mxu1 %v1242_v4  ;;  %847 = vmatprep.subr.mxu0 %v1365_v12  ;;  %v434_v10 = vsel %vm418_vm4, %v1500_v51, %v389_v30 }
 0x114   : > { %404 = vrot.lane.b32.xlu0 %v1368_v13, %s1179_s21  ;;  %v432_v2 = vsel %vm418_vm4, %v389_v30, %v393_v35  ;;  %848 = vmatpush1.msra.mxu0 %v1358_v11 }
 0x115   : > { %408 = vrot.lane.b32.xlu1 %v1701_v55, %s1179_s21  ;;  %780 = vmatprep.subr.mxu1 %v432_v2 }
 0x116   : > { %781 = vmatpush1.msra.mxu1 %v434_v10  ;;  %v397_v4 = vpop.permute.xlu0 %396  ;;  %849 = vmatprep.subr.mxu0 %v1385_v16 }
 0x117   : > { %v430_v12 = vsel %vm418_vm4, %v393_v35, %v397_v4  ;;  %v1821_v14 = vpop.permute.xlu1 %400  ;;  %850 = vmatpush1.msra.mxu0 %v1378_v15 }
 0x118   : > { %412 = vrot.lane.b32.xlu0 %v1706_v0, %s1179_s21  ;;  %v428_v11 = vsel %vm418_vm4, %v397_v4, %v1821_v14 }
 0x119   : > { %402 = vrot.lane.b32.xlu1 %v1388_v17, %s1179_s21  ;;  %851 = vmatprep.subr.mxu0 %v428_v11 }
 0x11a   : > { %852 = vmatpush1.msra.mxu0 %v430_v12  ;;  %v387_v16 = vpop.permute.xlu0 %386 }
 0x11b   : > { %v391_v51 = vpop.permute.xlu1 %390  ;;  %v433_v42 = vsel %vm418_vm4, %v1522_v56, %v387_v16 }
 0x11c   : > { %406 = vrot.lane.b32.xlu0 %v1718_v29, %s1179_s21  ;;  %v431_v15 = vsel %vm418_vm4, %v387_v16, %v391_v51 }
 0x11d   : > { %410 = vrot.lane.b32.xlu1 %v1730_v38, %s1179_s21  ;;  %782 = vmatprep.subr.mxu1 %v431_v15 }
 0x11e   : > { %783 = vmatpush1.msra.mxu1 %v433_v42  ;;  %v395_v45 = vpop.permute.xlu0 %394 }
 0x11f   : > { %v429_v31 = vsel %vm418_vm4, %v391_v51, %v395_v45  ;;  %v1842_v41 = vpop.permute.xlu1 %398 }
 0x120   : > { %343 = vrot.lane.b32.xlu0 %v1368_v13, %s1180_s22  ;;  %v427_v56 = vsel %vm418_vm4, %v395_v45, %v1842_v41 }
 0x121   : > { %347 = vrot.lane.b32.xlu1 %v1701_v55, %s1180_s22  ;;  %853 = vmatprep.subr.mxu0 %v427_v56 }
 0x122   : > { %854 = vmatpush1.msra.mxu0 %v429_v31  ;;  %v328_v52 = vpop.permute.xlu0 %327 }
 0x123   : > { %v332_v54 = vpop.permute.xlu1 %331  ;;  %v373_v59 = vsel %vm357_vm5, %v1537_v61, %v328_v52 }
 0x124   : > { %351 = vrot.lane.b32.xlu0 %v1706_v0, %s1180_s22  ;;  %v371_v26 = vsel %vm357_vm5, %v328_v52, %v332_v54 }
 0x125   : > { %341 = vrot.lane.b32.xlu1 %v1388_v17, %s1180_s22  ;;  %784 = vmatprep.subr.mxu1 %v371_v26 }
 0x126   : > { %785 = vmatpush1.msra.mxu1 %v373_v59  ;;  %v336_v23 = vpop.permute.xlu0 %335 }
 0x127   : > { %v369_v36 = vsel %vm357_vm5, %v332_v54, %v336_v23  ;;  %v1862_v46 = vpop.permute.xlu1 %339 }
 0x128   : > { %345 = vrot.lane.b32.xlu0 %v1718_v29, %s1180_s22  ;;  %v367_v61 = vsel %vm357_vm5, %v336_v23, %v1862_v46 }
 0x129   : > { %349 = vrot.lane.b32.xlu1 %v1730_v38, %s1180_s22  ;;  %855 = vmatprep.subr.mxu0 %v367_v61  ;;  %v1184_v61 = vmov 0  }
 0x12a   : > { %856 = vmatpush1.msra.mxu0 %v369_v36  ;;  %v326_v30 = vpop.permute.xlu0 %325  ;;  %1161 = vset.pattern.permute.xlu0 %v1184_v61 }
 0x12b   : > { %v330_v35 = vpop.permute.xlu1 %329  ;;  %v372_v10 = vsel %vm357_vm5, %v1555_v3, %v326_v30 }
 0x12c   : > { %282 = vrot.lane.b32.xlu0 %v1368_v13, %s1181_s23  ;;  %v370_v2 = vsel %vm357_vm5, %v326_v30, %v330_v35 }
 0x12d   : > { %286 = vrot.lane.b32.xlu1 %v1701_v55, %s1181_s23  ;;  %786 = vmatprep.subr.mxu1 %v370_v2 }
 0x12e   : > { %787 = vmatpush1.msra.mxu1 %v372_v10  ;;  %v334_v4 = vpop.permute.xlu0 %333 }
 0x12f   : > { %v368_v12 = vsel %vm357_vm5, %v330_v35, %v334_v4  ;;  %v1882_v11 = vpop.permute.xlu1 %337 }
 0x130   : > { %290 = vrot.lane.b32.xlu0 %v1706_v0, %s1181_s23  ;;  %v366_v3 = vsel %vm357_vm5, %v334_v4, %v1882_v11 }
 0x131   : > { %280 = vrot.lane.b32.xlu1 %v1388_v17, %s1181_s23  ;;  %857 = vmatprep.subr.mxu0 %v366_v3 }
 0x132   : > { %858 = vmatpush1.msra.mxu0 %v368_v12  ;;  %v267_v16 = vpop.permute.xlu0 %266 }
 0x133   : > { %v271_v51 = vpop.permute.xlu1 %270  ;;  %v312_v42 = vsel %vm296_vm6, %v1570_v24, %v267_v16 }
 0x134   : > { %284 = vrot.lane.b32.xlu0 %v1718_v29, %s1181_s23  ;;  %v310_v15 = vsel %vm296_vm6, %v267_v16, %v271_v51 }
 0x135   : > { %288 = vrot.lane.b32.xlu1 %v1730_v38, %s1181_s23  ;;  %788 = vmatprep.subr.mxu1 %v310_v15 }
 0x136   : > { %789 = vmatpush1.msra.mxu1 %v312_v42  ;;  %v275_v45 = vpop.permute.xlu0 %274  ;;  %v192_v42 = vld [vmem:[%s2180_s2] sm:$0xf] }
 0x137   : > { %v308_v31 = vsel %vm296_vm6, %v271_v51, %v275_v45  ;;  %v1902_v56 = vpop.permute.xlu1 %278 }
 0x138   : > { %219 = vrot.lane.b32.xlu0 %v1368_v13, %s1182_s24  ;;  %v306_v24 = vsel %vm296_vm6, %v275_v45, %v1902_v56 }
 0x139   : > { %223 = vrot.lane.b32.xlu1 %v1701_v55, %s1182_s24  ;;  %859 = vmatprep.subr.mxu0 %v306_v24 }
 0x13a   : > { %860 = vmatpush1.msra.mxu0 %v308_v31  ;;  %v265_v52 = vpop.permute.xlu0 %264 }
 0x13b   : > { %v269_v54 = vpop.permute.xlu1 %268  ;;  %v311_v59 = vsel %vm296_vm6, %v1588_v32, %v265_v52 }
 0x13c   : > { %227 = vrot.lane.b32.xlu0 %v1706_v0, %s1182_s24  ;;  %v309_v13 = vsel %vm296_vm6, %v265_v52, %v269_v54 }
 0x13d   : > { %217 = vrot.lane.b32.xlu1 %v1388_v17, %s1182_s24  ;;  %790 = vmatprep.subr.mxu1 %v309_v13 }
 0x13e   : > { %791 = vmatpush1.msra.mxu1 %v311_v59  ;;  %v273_v26 = vpop.permute.xlu0 %272 }
 0x13f   : > { %v307_v23 = vsel %vm296_vm6, %v269_v54, %v273_v26  ;;  %v1922_v36 = vpop.permute.xlu1 %276 }
 0x140   : > { %221 = vrot.lane.b32.xlu0 %v1718_v29, %s1182_s24  ;;  %v305_v32 = vsel %vm296_vm6, %v273_v26, %v1922_v36 }
 0x141   : > { %225 = vrot.lane.b32.xlu1 %v1730_v38, %s1182_s24  ;;  %861 = vmatprep.subr.mxu0 %v305_v32 }
 0x142   : > { %862 = vmatpush1.msra.mxu0 %v307_v23  ;;  %v204_v17 = vpop.permute.xlu0 %203 }
 0x143   : > { %v208_v30 = vpop.permute.xlu1 %207  ;;  %v251_v35 = vsel %vm235_vm7, %v1603_v40, %v204_v17 }
 0x144   : > { %652 = vrot.lane.b32.xlu0 %v1701_v55, %s1183_s25  ;;  %v249_v10 = vsel %vm235_vm7, %v204_v17, %v208_v30 }
 0x145   : > { %656 = vrot.lane.b32.xlu1 %v1706_v0, %s1183_s25  ;;  %792 = vmatprep.subr.mxu1 %v249_v10 }
 0x146   : > { %793 = vmatpush1.msra.mxu1 %v251_v35  ;;  %v212_v2 = vpop.permute.xlu0 %211 }
 0x147   : > { %v247_v4 = vsel %vm235_vm7, %v208_v30, %v212_v2  ;;  %v1942_v12 = vpop.permute.xlu1 %215 }
 0x148   : > { %660 = vrot.lane.b32.xlu0 %v1280_v6, %s1183_s25  ;;  %v245_v40 = vsel %vm235_vm7, %v212_v2, %v1942_v12 }
 0x149   : > { %650 = vrot.lane.b32.xlu1 %v1718_v29, %s1183_s25  ;;  %863 = vmatprep.subr.mxu0 %v245_v40 }
 0x14a   : > { %864 = vmatpush1.msra.mxu0 %v247_v4  ;;  %v202_v3 = vpop.permute.xlu0 %201 }
 0x14b   : > { %v206_v16 = vpop.permute.xlu1 %205  ;;  %v250_v51 = vsel %vm235_vm7, %v1621_v49, %v202_v3 }
 0x14c   : > { %654 = vrot.lane.b32.xlu0 %v1730_v38, %s1183_s25  ;;  %v248_v6 = vsel %vm235_vm7, %v202_v3, %v206_v16 }
 0x14d   : > { %658 = vrot.lane.b32.xlu1 %v1287_v7, %s1183_s25  ;;  %794 = vmatprep.subr.mxu1 %v248_v6 }
 0x14e   : > { %795 = vmatpush1.msra.mxu1 %v250_v51  ;;  %v210_v15 = vpop.permute.xlu0 %209 }
 0x14f   : > { %v246_v45 = vsel %vm235_vm7, %v206_v16, %v210_v15  ;;  %v1965_v49 = vpop.permute.xlu1 %213 }
 0x150   : > { %v244_v31 = vsel %vm235_vm7, %v210_v15, %v1965_v49  ;;  %685 = vperm.xlu0 %1161, %v192_v42  }
 0x151   : > { %865 = vmatprep.subr.mxu0 %v244_v31 }
 0x152   : > { %866 = vmatpush1.msra.mxu0 %v246_v45  ;;  %v637_v7 = vpop.permute.xlu0 %636 }
 0x153   : > { %v641_v24 = vpop.permute.xlu1 %640  ;;  %v676_v52 = vsel %vm662_vm8, %v1636_v58, %v637_v7 }
 0x154   : > { %v674_v54 = vsel %vm662_vm8, %v637_v7, %v641_v24 }
 0x155   : > { %824 = vmatprep.subr.mxu1 %v674_v54 }
 0x156   : > { %825 = vmatpush2.msra.mxu1 %v676_v52  ;;  %v645_v59 = vpop.permute.xlu0 %644 }
 0x157   : > { %v672_v13 = vsel %vm662_vm8, %v641_v24, %v645_v59  ;;  %v1977_v26 = vpop.permute.xlu1 %648 }
 0x158   : > { %v670_v23 = vsel %vm662_vm8, %v645_v59, %v1977_v26 }
 0x159   : > { %895 = vmatprep.subr.mxu0 %v670_v23 }
 0x15a   : > { %896 = vmatpush2.msra.mxu0 %v672_v13  ;;  %v635_v32 = vpop.permute.xlu0 %634 }
 0x15b   : > { %v639_v17 = vpop.permute.xlu1 %638  ;;  %v675_v58 = vsel %vm662_vm8, %v1654_v1, %v635_v32 }
 0x15c   : > { %v673_v61 = vsel %vm662_vm8, %v635_v32, %v639_v17 }
 0x15d   : > { %826 = vmatprep.subr.mxu1 %v673_v61 }
 0x15e   : > { %827 = vmatpush2.msra.mxu1 %v675_v58  ;;  %v643_v30 = vpop.permute.xlu0 %642 }
 0x15f   : > { %v671_v35 = vsel %vm662_vm8, %v639_v17, %v643_v30  ;;  %v1989_v10 = vpop.permute.xlu1 %646  ;;  %829 = vmatmul.mubr.f32.vlgmr.msra.gmra.mxu1 %v1336_v8 }
 0x160   : > { %v669_v2 = vsel %vm662_vm8, %v643_v30, %v1989_v10  ;;  %1138 = vmatprep.mubr.msk.f32.mxu1 %vm690_vm0, %v1340_v9 }
 0x161   : > { %897 = vmatprep.subr.mxu0 %v669_v2 }
 0x162   : > { %898 = vmatpush2.msra.mxu0 %v671_v35  ;;  %v592_v1 = vpop.permute.xlu0 %591 }
 0x163   : > { %v607_v4 = vsel %vm601_vm1, %v1680_v39, %v592_v1  ;;  %v596_v40 = vpop.permute.xlu1 %595  ;;  %900 = vmatmul.mubr.f32.vlgmr.msra.gmra.mxu0 %v1336_v8 }
 0x164   : > { %v605_v3 = vsel %vm601_vm1, %v592_v1, %v596_v40  ;;  %1139 = vmatprep.mubr.msk.f32.mxu0 %vm690_vm0, %v1340_v9 }
 0x165   : > { %906 = vmatprep.subr.mxu1 %v605_v3 }
 0x166   : > { %907 = vmatpush1.msra.mxu1 %v607_v4  ;;  %v600_v16 = vpop.permute.xlu0 %599 }
 0x167   : > { %v603_v51 = vsel %vm601_vm1, %v596_v40, %v600_v16  ;;  %v590_v6 = vpop.permute.xlu1 %589  ;;  %v621_v39 = vsel %vm601_vm1, %v600_v16, %v1400_v21 }
 0x168   : > { %977 = vmatprep.subr.mxu0 %v621_v39  ;;  %v606_v9 = vsel %vm601_vm1, %v1703_v62, %v590_v6  ;;  %v1163_v39 = vld [vmem:[%s1219_s17 + $0x80] sm:$0xff] }
 0x169   : > { %978 = vmatpush1.msra.mxu0 %v603_v51 }
 0x16a   : > { %v594_v8 = vpop.permute.xlu0 %593 }
 0x16b   : > { %v598_v42 = vpop.permute.xlu1 %597  ;;  %v604_v15 = vsel %vm601_vm1, %v590_v6, %v594_v8 }
 0x16c   : > { %v602_v45 = vsel %vm601_vm1, %v594_v8, %v598_v42  ;;  %908 = vmatprep.subr.mxu1 %v604_v15  ;;  %v620_v31 = vsel %vm601_vm1, %v598_v42, %v1421_v27  ;;  %v1165_v8 = vld [vmem:[%s1219_s17 + $0x30] sm:$0xff]  ;;  %v1166_v42 = vld [vmem:[%s1219_s17 + $0x48] sm:$0xff] }
 0x16d   : > { %979 = vmatprep.subr.mxu0 %v620_v31  ;;  %909 = vmatpush1.msra.mxu1 %v606_v9 }
 0x16e   : > { %980 = vmatpush1.msra.mxu0 %v602_v45  ;;  %v531_v21 = vpop.permute.xlu0 %530 }
 0x16f   : > { %v546_v7 = vsel %vm540_vm2, %v1732_v22, %v531_v21  ;;  %v535_v24 = vpop.permute.xlu1 %534 }
 0x170   : > { %v544_v62 = vsel %vm540_vm2, %v531_v21, %v535_v24 }
 0x171   : > { %910 = vmatprep.subr.mxu1 %v544_v62 }
 0x172   : > { %911 = vmatpush1.msra.mxu1 %v546_v7  ;;  %v539_v52 = vpop.permute.xlu0 %538 }
 0x173   : > { %v542_v54 = vsel %vm540_vm2, %v535_v24, %v539_v52  ;;  %v529_v59 = vpop.permute.xlu1 %528  ;;  %v560_v27 = vsel %vm540_vm2, %v539_v52, %v1443_v33 }
 0x174   : > { %981 = vmatprep.subr.mxu0 %v560_v27  ;;  %v545_v32 = vsel %vm540_vm2, %v1752_v20, %v529_v59 }
 0x175   : > { %982 = vmatpush1.msra.mxu0 %v542_v54 }
 0x176   : > { %v533_v13 = vpop.permute.xlu0 %532 }
 0x177   : > { %v537_v23 = vpop.permute.xlu1 %536  ;;  %v543_v22 = vsel %vm540_vm2, %v529_v59, %v533_v13 }
 0x178   : > { %v541_v17 = vsel %vm540_vm2, %v533_v13, %v537_v23  ;;  %912 = vmatprep.subr.mxu1 %v543_v22  ;;  %v559_v58 = vsel %vm540_vm2, %v537_v23, %v1454_v37 }
 0x179   : > { %983 = vmatprep.subr.mxu0 %v559_v58  ;;  %913 = vmatpush1.msra.mxu1 %v545_v32 }
 0x17a   : > { %984 = vmatpush1.msra.mxu0 %v541_v17  ;;  %v470_v33 = vpop.permute.xlu0 %469 }
 0x17b   : > { %v485_v61 = vsel %vm479_vm3, %v1774_v48, %v470_v33  ;;  %v474_v30 = vpop.permute.xlu1 %473 }
 0x17c   : > { %v483_v20 = vsel %vm479_vm3, %v470_v33, %v474_v30 }
 0x17d   : > { %914 = vmatprep.subr.mxu1 %v483_v20 }
 0x17e   : > { %915 = vmatpush1.msra.mxu1 %v485_v61  ;;  %v478_v35 = vpop.permute.xlu0 %477 }
 0x17f   : > { %v481_v2 = vsel %vm479_vm3, %v474_v30, %v478_v35  ;;  %v468_v1 = vpop.permute.xlu1 %467  ;;  %v499_v37 = vsel %vm479_vm3, %v478_v35, %v1476_v43 }
 0x180   : > { %985 = vmatprep.subr.mxu0 %v499_v37  ;;  %v484_v3 = vsel %vm479_vm3, %v1794_v25, %v468_v1  ;;  %v1164_v25 = vld [vmem:[%s1219_s17 + $0x98] sm:$0xff] }
 0x181   : > { %986 = vmatpush1.msra.mxu0 %v481_v2 }
 0x182   : > { %v472_v48 = vpop.permute.xlu0 %471 }
 0x183   : > { %v476_v4 = vpop.permute.xlu1 %475  ;;  %v482_v40 = vsel %vm479_vm3, %v468_v1, %v472_v48 }
 0x184   : > { %v480_v16 = vsel %vm479_vm3, %v472_v48, %v476_v4  ;;  %916 = vmatprep.subr.mxu1 %v482_v40  ;;  %v498_v43 = vsel %vm479_vm3, %v476_v4, %v1487_v47 }
 0x185   : > { %987 = vmatprep.subr.mxu0 %v498_v43  ;;  %917 = vmatpush1.msra.mxu1 %v484_v3 }
 0x186   : > { %988 = vmatpush1.msra.mxu0 %v480_v16  ;;  %v405_v51 = vpop.permute.xlu0 %404  ;;  %918 = vmatprep.subr.mxu1 %v1701_v55 }
 0x187   : > { %v409_v6 = vpop.permute.xlu1 %408  ;;  %919 = vmatpush1.msra.mxu1 %v1163_v39  ;;  %989 = vmatprep.subr.mxu0 %v1164_v25  ;;  %v426_v55 = vsel %vm418_vm4, %v1821_v14, %v405_v51 }
 0x188   : > { %920 = vmatprep.subr.mxu1 %v1718_v29  ;;  %990 = vmatpush1.msra.mxu0 %v1706_v0  ;;  %v424_v47 = vsel %vm418_vm4, %v405_v51, %v409_v6 }
 0x189   : > { %921 = vmatpush1.msra.mxu1 %v1165_v8  ;;  %991 = vmatprep.subr.mxu0 %v1166_v42 }
 0x18a   : > { %v413_v15 = vpop.permute.xlu0 %412  ;;  %922 = vmatprep.subr.mxu1 %v424_v47  ;;  %992 = vmatpush1.msra.mxu0 %v1730_v38 }
 0x18b   : > { %v422_v29 = vsel %vm418_vm4, %v409_v6, %v413_v15  ;;  %v403_v9 = vpop.permute.xlu1 %402  ;;  %923 = vmatpush1.msra.mxu1 %v426_v55  ;;  %v420_v0 = vsel %vm418_vm4, %v413_v15, %v1513_v53 }
 0x18c   : > { %993 = vmatprep.subr.mxu0 %v420_v0  ;;  %v425_v38 = vsel %vm418_vm4, %v1842_v41, %v403_v9 }
 0x18d   : > { %994 = vmatpush1.msra.mxu0 %v422_v29 }
 0x18e   : > { %v407_v45 = vpop.permute.xlu0 %406 }
 0x18f   : > { %v411_v31 = vpop.permute.xlu1 %410  ;;  %v423_v14 = vsel %vm418_vm4, %v403_v9, %v407_v45 }
 0x190   : > { %v421_v21 = vsel %vm418_vm4, %v407_v45, %v411_v31  ;;  %924 = vmatprep.subr.mxu1 %v423_v14  ;;  %v419_v7 = vsel %vm418_vm4, %v411_v31, %v1524_v57  ;;  %v1167_v31 = vld [vmem:[%s2179_s1] sm:$0xff] }
 0x191   : > { %995 = vmatprep.subr.mxu0 %v419_v7  ;;  %925 = vmatpush1.msra.mxu1 %v425_v38 }
 0x192   : > { %996 = vmatpush1.msra.mxu0 %v421_v21  ;;  %v344_v53 = vpop.permute.xlu0 %343 }
 0x193   : > { %v365_v24 = vsel %vm357_vm5, %v1862_v46, %v344_v53  ;;  %v348_v62 = vpop.permute.xlu1 %347 }
 0x194   : > { %v363_v41 = vsel %vm357_vm5, %v344_v53, %v348_v62 }
 0x195   : > { %926 = vmatprep.subr.mxu1 %v363_v41 }
 0x196   : > { %927 = vmatpush1.msra.mxu1 %v365_v24  ;;  %v352_v52 = vpop.permute.xlu0 %351 }
 0x197   : > { %v361_v54 = vsel %vm357_vm5, %v348_v62, %v352_v52  ;;  %v342_v59 = vpop.permute.xlu1 %341  ;;  %v359_v57 = vsel %vm357_vm5, %v352_v52, %v1546_v63 }
 0x198   : > { %997 = vmatprep.subr.mxu0 %v359_v57  ;;  %v364_v23 = vsel %vm357_vm5, %v1882_v11, %v342_v59 }
 0x199   : > { %998 = vmatpush1.msra.mxu0 %v361_v54 }
 0x19a   : > { %v346_v27 = vpop.permute.xlu0 %345 }
 0x19b   : > { %v350_v13 = vpop.permute.xlu1 %349  ;;  %v362_v46 = vsel %vm357_vm5, %v342_v59, %v346_v27 }
 0x19c   : > { %v360_v22 = vsel %vm357_vm5, %v346_v27, %v350_v13  ;;  %928 = vmatprep.subr.mxu1 %v362_v46  ;;  %v358_v32 = vsel %vm357_vm5, %v350_v13, %v1557_v5 }
 0x19d   : > { %999 = vmatprep.subr.mxu0 %v358_v32  ;;  %929 = vmatpush1.msra.mxu1 %v364_v23 }
 0x19e   : > { %1000 = vmatpush1.msra.mxu0 %v360_v22  ;;  %v283_v63 = vpop.permute.xlu0 %282 }
 0x19f   : > { %v304_v17 = vsel %vm296_vm6, %v1902_v56, %v283_v63  ;;  %v287_v58 = vpop.permute.xlu1 %286 }
 0x1a0   : > { %v302_v11 = vsel %vm296_vm6, %v283_v63, %v287_v58 }
 0x1a1   : > { %930 = vmatprep.subr.mxu1 %v302_v11 }
 0x1a2   : > { %931 = vmatpush1.msra.mxu1 %v304_v17  ;;  %v291_v33 = vpop.permute.xlu0 %290  ;;  %v759_v14 = vpop.f32.mrf.mxu0 }
 0x1a3   : > { %v300_v61 = vsel %vm296_vm6, %v287_v58, %v291_v33  ;;  %v281_v30 = vpop.permute.xlu1 %280  ;;  %v298_v5 = vsel %vm296_vm6, %v291_v33, %v1579_v28 }
 0x1a4   : > { %1001 = vmatprep.subr.mxu0 %v298_v5  ;;  %v303_v2 = vsel %vm296_vm6, %v1922_v36, %v281_v30 }
 0x1a5   : > { %1002 = vmatpush1.msra.mxu0 %v300_v61 }
 0x1a6   : > { %v285_v20 = vpop.permute.xlu0 %284 }
 0x1a7   : > { %v289_v35 = vpop.permute.xlu1 %288  ;;  %v301_v56 = vsel %vm296_vm6, %v281_v30, %v285_v20 }
 0x1a8   : > { %v299_v1 = vsel %vm296_vm6, %v285_v20, %v289_v35  ;;  %932 = vmatprep.subr.mxu1 %v301_v56  ;;  %v297_v37 = vsel %vm296_vm6, %v289_v35, %v1590_v34 }
 0x1a9   : > { %1003 = vmatprep.subr.mxu0 %v297_v37  ;;  %933 = vmatpush1.msra.mxu1 %v303_v2 }
 0x1aa   : > { %1004 = vmatpush1.msra.mxu0 %v299_v1  ;;  %v220_v28 = vpop.permute.xlu0 %219 }
 0x1ab   : > { %v243_v48 = vsel %vm235_vm7, %v1942_v12, %v220_v28  ;;  %v224_v4 = vpop.permute.xlu1 %223 }
 0x1ac   : > { %v241_v36 = vsel %vm235_vm7, %v220_v28, %v224_v4 }
 0x1ad   : > { %934 = vmatprep.subr.mxu1 %v241_v36 }
 0x1ae   : > { %935 = vmatpush1.msra.mxu1 %v243_v48  ;;  %v228_v40 = vpop.permute.xlu0 %227 }
 0x1af   : > { %v239_v3 = vsel %vm235_vm7, %v224_v4, %v228_v40  ;;  %v218_v16 = vpop.permute.xlu1 %217  ;;  %v237_v34 = vsel %vm235_vm7, %v228_v40, %v1612_v44 }
 0x1b0   : > { %1005 = vmatprep.subr.mxu0 %v237_v34  ;;  %v242_v6 = vsel %vm235_vm7, %v1965_v49, %v218_v16 }
 0x1b1   : > { %1006 = vmatpush1.msra.mxu0 %v239_v3 }
 0x1b2   : > { %v222_v43 = vpop.permute.xlu0 %221 }
 0x1b3   : > { %v226_v51 = vpop.permute.xlu1 %225  ;;  %v240_v12 = vsel %vm235_vm7, %v218_v16, %v222_v43 }
 0x1b4   : > { %v238_v39 = vsel %vm235_vm7, %v222_v43, %v226_v51  ;;  %936 = vmatprep.subr.mxu1 %v240_v12  ;;  %v236_v25 = vsel %vm235_vm7, %v226_v51, %v1623_v50 }
 0x1b5   : > { %1007 = vmatprep.subr.mxu0 %v236_v25  ;;  %937 = vmatpush1.msra.mxu1 %v242_v6 }
 0x1b6   : > { %1008 = vmatpush1.msra.mxu0 %v238_v39  ;;  %v653_v44 = vpop.permute.xlu0 %652 }
 0x1b7   : > { %v668_v8 = vsel %vm662_vm8, %v1977_v26, %v653_v44  ;;  %v657_v47 = vpop.permute.xlu1 %656 }
 0x1b8   : > { %v666_v49 = vsel %vm662_vm8, %v653_v44, %v657_v47 }
 0x1b9   : > { %966 = vmatprep.subr.mxu1 %v666_v49 }
 0x1ba   : > { %967 = vmatpush2.msra.mxu1 %v668_v8  ;;  %v661_v42 = vpop.permute.xlu0 %660 }
 0x1bb   : > { %v664_v55 = vsel %vm662_vm8, %v657_v47, %v661_v42  ;;  %v651_v15 = vpop.permute.xlu1 %650  ;;  %v682_v50 = vsel %vm662_vm8, %v661_v42, %v1645_v60 }
 0x1bc   : > { %1037 = vmatprep.subr.mxu0 %v682_v50  ;;  %v667_v0 = vsel %vm662_vm8, %v1989_v10, %v651_v15  ;;  %v761_v10 = vpop.f32.mrf.mxu0 }
 0x1bd   : > { %1038 = vmatpush2.msra.mxu0 %v664_v55 }
 0x1be   : > { %v655_v29 = vpop.permute.xlu0 %654 }
 0x1bf   : > { %v659_v26 = vpop.permute.xlu1 %658  ;;  %v665_v9 = vsel %vm662_vm8, %v651_v15, %v655_v29 }
 0x1c0   : > { %v663_v45 = vsel %vm662_vm8, %v655_v29, %v659_v26  ;;  %968 = vmatprep.subr.mxu1 %v665_v9  ;;  %v681_v60 = vsel %vm662_vm8, %v659_v26, %v1656_v18 }
 0x1c1   : > { %1039 = vmatprep.subr.mxu0 %v681_v60  ;;  %969 = vmatpush2.msra.mxu1 %v667_v0 }
 0x1c2   : > { %1040 = vmatpush2.msra.mxu0 %v663_v45  ;;  %971 = vmatmul.mubr.f32.vlgmr.msra.gmra.mxu1 %v1167_v31 }
 0x1c3   : > { %1042 = vmatmul.mubr.f32.vlgmr.msra.gmra.mxu0 %v1167_v31 }
 0x1cb   : > { %v686_v38 = vpop.permute.xlu0 %685 }
 0x1cc   : > { %v760_v21 = vadd.f32 %v759_v14, %v686_v38  ;;  %v762_v7 = vadd.f32 %v761_v10, %v686_v38 }
 0x1ce   : > { %v1058_v19 = vcombine.low %v760_v21, %v762_v7 }
 0x1d0   : > { %1068 = vst [vmem:[%s170_s8] sm:$0xff] %v1058_v19 }
 0x21f   : > { %v830_v18 = vpop.f32.mrf.mxu1 }
 0x220   : > { %v831_v53 = vadd.f32 %v830_v18, %v686_v38 }
 0x221   : > { %v832_v24 = vpop.f32.mrf.mxu1 }
 0x222   : > { %v833_v62 = vadd.f32 %v832_v24, %v686_v38 }
 0x223   : > { %v901_v41 = vpop.f32.mrf.mxu0 }
 0x224   : > { %v902_v52 = vadd.f32 %v901_v41, %v686_v38  ;;  %v1059_v54 = vcombine.low %v831_v53, %v833_v62 }
 0x225   : > { %v903_v59 = vpop.f32.mrf.mxu0 }
 0x226   : > { %1069 = vst [vmem:[%s170_s8 + $0x8] sm:$0xff] %v1059_v54  ;;  %v904_v57 = vadd.f32 %v903_v59, %v686_v38 }
 0x228   : > { %v1060_v27 = vcombine.low %v902_v52, %v904_v57 }
 0x22a   : > { %1070 = vst [vmem:[%s170_s8 + $0x10] sm:$0xff] %v1060_v27 }
 0x282   : > { %v972_v13 = vpop.f32.mrf.mxu1 }
 0x283   : > { %v1043_v46 = vpop.f32.mrf.mxu0  ;;  %v973_v22 = vadd.f32 %v972_v13, %v686_v38 }
 0x284   : > { %v974_v23 = vpop.f32.mrf.mxu1  ;;  %v1044_v17 = vadd.f32 %v1043_v46, %v686_v38 }
 0x285   : > { %v975_v32 = vadd.f32 %v974_v23, %v686_v38  ;;  %v1045_v63 = vpop.f32.mrf.mxu0 }
 0x286   : > { %v1046_v58 = vadd.f32 %v1045_v63, %v686_v38 }
 0x287   : > { %v1061_v11 = vcombine.low %v973_v22, %v975_v32 }
 0x288   : > { %v1062_v33 = vcombine.low %v1044_v17, %v1046_v58 }
 0x289   : > { %1071 = vst [vmem:[%s170_s8 + $0x18] sm:$0xff] %v1061_v11 }
 0x28a   : > { %1072 = vst [vmem:[%s170_s8 + $0x20] sm:$0xff] %v1062_v33 }
 0x28b PF: > { %s13_s12 = sadd.s32 1, %s1174_s12  }
 0x28c   : > { %p10_p4 = scmp.ge.s32.totalorder %s13_s12, 4  }
 0x28e   :  { %12 = sbr.rel (!%p10_p4) target bundleno = 1 (0x1), region = 62 }

</bundles_post_ra>
